<compile_context>
chip_gen: v7x
topology: tpu7x:2x2x1
jax: 0.10.0
libtpu: 0.0.40
codegen_flags: <defaults>
</compile_context>

<pallas_src>
import functools

import jax
import jax.numpy as jnp
import numpy as np
from jax.experimental import pallas as pl
from jax.experimental.pallas import tpu as pltpu


# ----------------------------------------------------------------------------
# The single fused kernel
# ----------------------------------------------------------------------------
def fofe_nn_att_kernel(
    d_ref,       # (E, N)        f32  doc embeddings, lane-padded (N = B*Ld_pad)
    q_ref,       # (E, B*Lq)     f32  query embeddings
    a_ref,       # (B*Lq, B)     f32  query-FOFE alpha powers (block-diagonal)
    qsel_ref,    # (B, M1*N)     f32  batch -> column one-hot broadcast
    qselt_ref,   # (N, B)        f32  column -> batch one-hot (segment sums)
    wd_ref,      # (M1, E, 3E)   bf16 dilated-conv tap weights (taps on Cin axis)
    wq_ref,      # (E, E)        bf16 fofe_linear Linear weight
    w1d_ref,     # (4E, E)       bf16 fnn conv1 weight, doc-channel half
    w1q_ref,     # (4E, E)       bf16 fnn conv1 weight, query-channel half
    g1_ref, b1_ref,              # (4E, 1) f32 BN params
    w2_ref,      # (4E, 4E)      bf16
    g2_ref, b2_ref,              # (4E, 1) f32
    w3_ref,      # (2E, 4E)      bf16
    g3_ref, b3_ref,              # (2E, 1) f32
    wse_ref,     # (M1, 2, 2E)   bf16 [s_conv ; e_conv] weights per height row
    ninf_ref,    # (1, N)        f32  1.0 where masked (doc padding or lane pad)
    out_ref,     # (2, N)        f32  [s ; e] log-softmax scores (lane-dense)
    *, alpha, doc_len):
    f32, bf16 = jnp.float32, jnp.bfloat16
    E, N = d_ref.shape
    B = a_ref.shape[1]
    M1 = wd_ref.shape[0]
    Ld_pad = N // B
    eps = 1e-5

    def leaky(x):
        return jnp.where(x > 0, x, 0.1 * x)

    # Position of every lane inside its per-doc block of width Ld_pad.
    pos = jax.lax.broadcasted_iota(jnp.int32, (1, N), 1) % Ld_pad

    def block_shift(x, off):
        """out[:, c] = x[:, c + off] within each doc block; zero outside [0, doc_len)."""
        if off == 0:
            return x
        rolled = pltpu.roll(x, (-off) % N, axis=1)          # XLU lane rotate
        src = pos + off
        ok = jnp.logical_and(src >= 0, src < doc_len)       # kills cross-doc wrap too
        return jnp.where(ok, rolled, 0.0)

    # ---- query: FOFE sum + Linear + ReLU; project with w1q BEFORE broadcasting ----
    q_fofe = jnp.dot(q_ref[...], a_ref[...], preferred_element_type=f32)             # (E, B)
    q_code = jnp.maximum(
        jnp.dot(wq_ref[...], q_fofe.astype(bf16), preferred_element_type=f32), 0.0)  # (E, B)
    w1q_q = jnp.dot(w1q_ref[...], q_code.astype(bf16), preferred_element_type=f32)   # (4E, B)
    w1q_bcast = jnp.dot(w1q_q, qsel_ref[...], preferred_element_type=f32)            # (4E, M1*N)

    # ---- doc fofe_conv1d layers: XLU rolls + ONE (E,3E)x(3E,N) matmul per layer ----
    d = d_ref[...]
    doc_codes = []
    for r in range(M1):
        ell = r + 2
        lpad = (ell - 1) // 2
        y = jnp.zeros_like(d)
        for k in range(ell):                    # FOFE filter: alpha-weighted rolls
            y = y + (float(alpha) ** (ell - 1 - k)) * block_shift(d, k - lpad)
        y3 = jnp.concatenate(                   # 3 dilated taps stacked on channels
            [block_shift(y, -ell), y, block_shift(y, ell)], axis=0)                   # (3E, N)
        doc_codes.append(
            leaky(jnp.dot(wd_ref[r], y3.astype(bf16), preferred_element_type=f32)))  # (E, N)
    doc_slab = doc_codes[0] if M1 == 1 else jnp.concatenate(doc_codes, axis=1)        # (E, M1*N)

    # ---- fnn: (1x1 conv -> BN(train, masked 1-pass stats) -> LeakyReLU) x 3 --------
    NL = M1 * N
    bn_valid = (jax.lax.broadcasted_iota(jnp.int32, (1, NL), 1) % Ld_pad
                < doc_len).astype(f32)
    inv_n = 1.0 / float(B * M1 * doc_len)

    def bn(x, g_ref, b_ref):
        s1 = jnp.sum(x * bn_valid, axis=1, keepdims=True)
        s2 = jnp.sum((x * x) * bn_valid, axis=1, keepdims=True)
        mean = s1 * inv_n
        var = jnp.maximum(s2 * inv_n - mean * mean, 0.0)
        scale = g_ref[...] * jax.lax.rsqrt(var + eps)
        offset = b_ref[...] - mean * scale
        return x * scale + offset

    x = jnp.dot(w1d_ref[...], doc_slab.astype(bf16),
                preferred_element_type=f32) + w1q_bcast                               # (4E, M1*N)
    x = leaky(bn(x, g1_ref, b1_ref))
    x = jnp.dot(w2_ref[...], x.astype(bf16), preferred_element_type=f32)
    x = leaky(bn(x, g2_ref, b2_ref))
    x = jnp.dot(w3_ref[...], x.astype(bf16), preferred_element_type=f32)
    x = leaky(bn(x, g3_ref, b3_ref))                                                  # (2E, M1*N)

    # ---- s/e pointer convs: contract channels and the (M1, 1) height rows ----------
    scores = jnp.zeros((2, N), f32)
    for r in range(M1):
        xr = x[:, r * N:(r + 1) * N]                         # lane-aligned slab slice
        scores = scores + jnp.dot(wse_ref[r], xr.astype(bf16),
                                  preferred_element_type=f32)                         # (2, N)

    # ---- masked_fill(-inf) + per-batch log-softmax, fully vectorized ---------------
    sc = jnp.where(ninf_ref[...] > 0, -jnp.inf, scores)
    # Global max is a safe shift here: BN keeps scores O(1), so no batch segment
    # can underflow relative to another batch's maximum.
    z = sc - jnp.max(sc, axis=1, keepdims=True)
    p = jnp.exp(z)                                                                    # masked -> 0
    seg = jnp.dot(p, qselt_ref[...], preferred_element_type=f32)                      # (2, B)
    lse = jnp.dot(jnp.log(seg), qsel_ref[:, :N], preferred_element_type=f32)          # (2, N)
    out_ref[...] = z - lse


# ----------------------------------------------------------------------------
# Forward wrapper (one pallas_call, layout plumbing in XLA)
# ----------------------------------------------------------------------------
def fofe_nn_att_forward(params, query_emb, query_mask, doc_emb, doc_mask,
                        fofe_alpha, fofe_max_length):
    del query_mask                                  # unused by the reference forward()
    B, Ld, E = doc_emb.shape
    Lq = query_emb.shape[1]
    M1 = fofe_max_length - 1
    Ld_pad = ((Ld + 127) // 128) * 128              # lane-dense doc length
    N = B * Ld_pad
    bf16 = jnp.bfloat16

    # Tiny host-side selector / alpha-power constants (O(B*Lq + B*M1*N)).
    A = np.zeros((B * Lq, B), np.float32)
    pw = np.float32(fofe_alpha) ** np.arange(Lq - 1, -1, -1, dtype=np.float32)
    for b in range(B):
        A[b * Lq:(b + 1) * Lq, b] = pw
    cols = np.arange(M1 * N)
    Qsel = np.zeros((B, M1 * N), np.float32)
    Qsel[(cols % N) // Ld_pad, cols] = 1.0
    colsN = np.arange(N)
    QselT = np.zeros((N, B), np.float32)
    QselT[colsN, colsN // Ld_pad] = 1.0

    # Lane-dense, lane-padded (channels, batch*length) layouts.
    d_flat = jnp.pad(jnp.transpose(doc_emb, (2, 0, 1)),
                     ((0, 0), (0, 0), (0, Ld_pad - Ld))).reshape(E, N)
    q_flat = jnp.transpose(query_emb, (2, 0, 1)).reshape(E, B * Lq)
    ninf = jnp.pad(doc_mask.astype(jnp.float32), ((0, 0), (0, Ld_pad - Ld)),
                   constant_values=1.0).reshape(1, N)

    vmem = pl.BlockSpec(memory_space=pltpu.MemorySpace.VMEM)
    kernel = functools.partial(fofe_nn_att_kernel,
                               alpha=float(fofe_alpha), doc_len=Ld)
    out = pl.pallas_call(
        kernel,
        out_shape=jax.ShapeDtypeStruct((2, N), jnp.float32),
        in_specs=[vmem] * 19,
        out_specs=vmem,
    )(d_flat, q_flat, jnp.asarray(A), jnp.asarray(Qsel), jnp.asarray(QselT),
      params["wd_cat"].astype(bf16), params["wq"].astype(bf16),
      params["w1d"].astype(bf16), params["w1q"].astype(bf16),
      params["g1"], params["b1"],
      params["w2"].astype(bf16), params["g2"], params["b2"],
      params["w3"].astype(bf16), params["g3"], params["b3"],
      params["wse"].astype(bf16), ninf)

    out = out.reshape(2, B, Ld_pad)[:, :, :Ld]
    # Reference returns lists (see TODO about the score loop): single valid entry.
    return [out[0]], [out[1]]


# ----------------------------------------------------------------------------
# Deterministic parameter init (plus kernel-friendly layouts)
# ----------------------------------------------------------------------------
def init_params(key, emb_dims, fofe_max_length):
    E = emb_dims
    M1 = fofe_max_length - 1
    ks = jax.random.split(key, 7)

    def kaiming(k, shape, fan_in):
        return jax.random.normal(k, shape, jnp.float32) * np.sqrt(2.0 / fan_in)

    # doc fofe_conv1d dilated-conv weights: layer r (window r+2), tap j at 3*r+j.
    wd = kaiming(ks[0], (M1 * 3, E, E), E * 3)
    # fofe_linear Linear(E, E, bias=False)
    wq = jax.random.normal(ks[1], (E, E), jnp.float32) / np.sqrt(E)
    # fnn 1x1 conv2d weights
    w1 = kaiming(ks[2], (4 * E, 2 * E), 2 * E)
    w2 = kaiming(ks[3], (4 * E, 4 * E), 4 * E)
    w3 = kaiming(ks[4], (2 * E, 4 * E), 4 * E)
    # s/e pointer convs: Conv2d(2E -> 1, kernel (M1, 1)) stored as (2E, M1)
    sw = kaiming(ks[5], (2 * E, M1), 2 * E * M1)
    ew = kaiming(ks[6], (2 * E, M1), 2 * E * M1)
    wse = jnp.transpose(jnp.stack([sw, ew], axis=0), (2, 0, 1))       # (M1, 2, 2E)
    # kernel layout: per-layer tap-concatenated dilated-conv weight (M1, E, 3E)
    wd_cat = jnp.stack(
        [jnp.concatenate([wd[3 * r + j] for j in range(3)], axis=1) for r in range(M1)],
        axis=0)

    def bn(c):
        return (jnp.ones((c, 1), jnp.float32),
                jnp.full((c, 1), 1e-4, jnp.float32))   # weights_init: gamma=1, beta=1e-4

    g1, b1 = bn(4 * E)
    g2, b2 = bn(4 * E)
    g3, b3 = bn(2 * E)
    return dict(wd=wd, wd_cat=wd_cat, wq=wq,
                w1=w1, w1d=w1[:, :E], w1q=w1[:, E:], w2=w2, w3=w3,
                g1=g1, b1=b1, g2=g2, b2=b2, g3=g3, b3=b3,
                wse=wse, sw=sw, ew=ew)


# ----------------------------------------------------------------------------
# Plain-JAX reference (straight port of the PyTorch module) for verification
# ----------------------------------------------------------------------------
def _shift(x, off):
    """result[..., t] = x[..., t + off], out-of-range positions are zero."""
    if off == 0:
        return x
    zeros = jnp.zeros(x.shape[:-1] + (abs(off),), x.dtype)
    if off > 0:
        return jnp.concatenate([x[..., off:], zeros], axis=-1)
    return jnp.concatenate([zeros, x[..., :off]], axis=-1)


def fofe_nn_att_reference(params, query_emb, query_mask, doc_emb, doc_mask,
                          fofe_alpha, fofe_max_length):
    del query_mask
    B, Ld, E = doc_emb.shape
    Lq = query_emb.shape[1]
    M1 = fofe_max_length - 1
    alpha = fofe_alpha

    def leaky(x):
        return jnp.where(x > 0, x, 0.1 * x)

    # fofe_linear
    wvec = alpha ** jnp.arange(Lq - 1, -1, -1, dtype=jnp.float32)
    q_fofe = jnp.einsum("t,bte->be", wvec, query_emb)
    q_code = jax.nn.relu(q_fofe @ params["wq"].T)                       # (B, E)

    # doc fofe_conv1d layers
    d = jnp.transpose(doc_emb, (0, 2, 1))                               # (B, E, Ld)
    doc_codes = []
    for r in range(M1):
        ell = r + 2
        pad = (ell - 1) // 2
        y = jnp.zeros_like(d)
        for k in range(ell):
            y = y + (alpha ** (ell - 1 - k)) * _shift(d, k - pad)
        acc = jnp.zeros_like(d)
        for j in range(3):
            wj = params["wd"][3 * r + j]                                # (E, E)
            acc = acc + jnp.einsum("oc,bct->bot", wj, _shift(y, (j - 1) * ell))
        doc_codes.append(leaky(acc))

    # dq_fofe assembly: (B, 2E, M1, Ld)
    qmat = jnp.broadcast_to(q_code[:, :, None, None], (B, E, M1, Ld))
    doc_stack = jnp.stack(doc_codes, axis=2)                            # (B, E, M1, Ld)
    x = jnp.concatenate([doc_stack, qmat], axis=1)                      # (B, 2E, M1, Ld)

    def conv_bn_lrelu(x, w, g, b):
        y = jnp.einsum("oc,bcrt->bort", w, x)
        mean = jnp.mean(y, axis=(0, 2, 3), keepdims=True)
        var = jnp.mean((y - mean) ** 2, axis=(0, 2, 3), keepdims=True)
        y = (y - mean) * jax.lax.rsqrt(var + 1e-5)
        y = y * g.reshape(1, -1, 1, 1) + b.reshape(1, -1, 1, 1)
        return leaky(y)

    x = conv_bn_lrelu(x, params["w1"], params["g1"], params["b1"])
    x = conv_bn_lrelu(x, params["w2"], params["g2"], params["b2"])
    x = conv_bn_lrelu(x, params["w3"], params["g3"], params["b3"])

    s = jnp.einsum("cr,bcrt->bt", params["sw"], x)
    e = jnp.einsum("cr,bcrt->bt", params["ew"], x)
    s = jnp.where(doc_mask, -jnp.inf, s)
    e = jnp.where(doc_mask, -jnp.inf, e)
    return [jax.nn.log_softmax(s, axis=1)], [jax.nn.log_softmax(e, axis=1)]


# ----------------------------------------------------------------------------
# Main
# ----------------------------------------------------------------------------
if __name__ == "__main__":
    B, E = 2, 16               # batch, emb_dims (E must be a multiple of 8)
    Lq, Ld = 8, 16             # query / doc lengths
    fofe_alpha, fofe_max_length = 0.9, 3

    key = jax.random.PRNGKey(0)
    kp, kq, kd = jax.random.split(key, 3)
    params = init_params(kp, E, fofe_max_length)

    query_emb = jax.random.normal(kq, (B, Lq, E), jnp.float32)
    doc_emb = jax.random.normal(kd, (B, Ld, E), jnp.float32)
    query_mask = jnp.zeros((B, Lq), jnp.bool_)
    doc_lens = jnp.array([12, 16])
    doc_mask = jnp.arange(Ld)[None, :] >= doc_lens[:, None]    # True = padding

    fwd = jax.jit(lambda qe, qm, de, dm: fofe_nn_att_forward(
        params, qe, qm, de, dm, fofe_alpha, fofe_max_length))
    s_list, e_list = fwd(query_emb, query_mask, doc_emb, doc_mask)
    s = jax.block_until_ready(s_list[0])
    e = jax.block_until_ready(e_list[0])
    assert s.shape == (B, Ld) and e.shape == (B, Ld)

    # Verify against the plain-JAX (all-f32) port of the PyTorch module.
    # Tolerance is looser than before because the kernel now runs the MXU in
    # bf16 (f32 accumulation), per the performance review.
    s_ref_l, e_ref_l = fofe_nn_att_reference(
        params, query_emb, query_mask, doc_emb, doc_mask,
        fofe_alpha, fofe_max_length)
    np.testing.assert_allclose(np.asarray(s), np.asarray(s_ref_l[0]),
                               rtol=5e-2, atol=5e-2)
    np.testing.assert_allclose(np.asarray(e), np.asarray(e_ref_l[0]),
                               rtol=5e-2, atol=5e-2)
    print("KERNEL_OK")
</pallas_src>

<mosaic_0001>
module attributes {stable_mosaic.version = 11 : i64} {
  func.func @fofe_nn_att_kernel(%arg0: memref<16x256xf32, #tpu.memory_space<vmem>>, %arg1: memref<16x16xf32, #tpu.memory_space<vmem>>, %arg2: memref<16x2xf32, #tpu.memory_space<vmem>>, %arg3: memref<2x512xf32, #tpu.memory_space<vmem>>, %arg4: memref<256x2xf32, #tpu.memory_space<vmem>>, %arg5: memref<2x16x48xbf16, #tpu.memory_space<vmem>>, %arg6: memref<16x16xbf16, #tpu.memory_space<vmem>>, %arg7: memref<64x16xbf16, #tpu.memory_space<vmem>>, %arg8: memref<64x16xbf16, #tpu.memory_space<vmem>>, %arg9: memref<64x1xf32, #tpu.memory_space<vmem>>, %arg10: memref<64x1xf32, #tpu.memory_space<vmem>>, %arg11: memref<64x64xbf16, #tpu.memory_space<vmem>>, %arg12: memref<64x1xf32, #tpu.memory_space<vmem>>, %arg13: memref<64x1xf32, #tpu.memory_space<vmem>>, %arg14: memref<32x64xbf16, #tpu.memory_space<vmem>>, %arg15: memref<32x1xf32, #tpu.memory_space<vmem>>, %arg16: memref<32x1xf32, #tpu.memory_space<vmem>>, %arg17: memref<2x2x32xbf16, #tpu.memory_space<vmem>>, %arg18: memref<1x256xf32, #tpu.memory_space<vmem>>, %arg19: memref<2x256xf32, #tpu.memory_space<vmem>>) attributes {dimension_semantics = [], scalar_prefetch = 0 : i64, scratch_operands = 0 : i64, tpu.core_type = #tpu.core_type<tc>} {
    %0 = tpu.iota {dimensions = array<i32: 1>} : vector<1x256xi32>
    %c128_i32 = arith.constant 128 : i32
    %c0_i32 = arith.constant 0 : i32
    %1 = arith.cmpi eq, %c128_i32, %c0_i32 : i32
    %c1_i32 = arith.constant 1 : i32
    %2 = arith.select %1, %c1_i32, %c128_i32 : i32
    %3 = vector.broadcast %2 : i32 to vector<1x256xi32>
    %4 = arith.remsi %0, %3 : vector<1x256xi32>
    %c0_i32_0 = arith.constant 0 : i32
    %5 = vector.broadcast %c0_i32_0 : i32 to vector<1x256xi32>
    %6 = arith.cmpi ne, %4, %5 : vector<1x256xi32>
    %c0_i32_1 = arith.constant 0 : i32
    %7 = vector.broadcast %c0_i32_1 : i32 to vector<1x256xi32>
    %8 = arith.cmpi slt, %4, %7 : vector<1x256xi32>
    %c0_i32_2 = arith.constant 0 : i32
    %9 = arith.cmpi slt, %2, %c0_i32_2 : i32
    %10 = vector.broadcast %9 : i1 to vector<1x256xi1>
    %11 = vector.broadcast %10 : vector<1x256xi1> to vector<1x256xi1>
    %12 = arith.xori %8, %11 : vector<1x256xi1>
    %13 = arith.andi %12, %6 : vector<1x256xi1>
    %14 = vector.broadcast %2 : i32 to vector<1x256xi32>
    %15 = arith.addi %4, %14 : vector<1x256xi32>
    %16 = arith.select %13, %15, %4 : vector<1x256xi1>, vector<1x256xi32>
    %c0 = arith.constant 0 : index
    %c0_3 = arith.constant 0 : index
    %17 = vector.load %arg1[%c0, %c0_3] : memref<16x16xf32, #tpu.memory_space<vmem>>, vector<16x16xf32>
    %c0_4 = arith.constant 0 : index
    %c0_5 = arith.constant 0 : index
    %18 = vector.load %arg2[%c0_4, %c0_5] : memref<16x2xf32, #tpu.memory_space<vmem>>, vector<16x2xf32>
    %cst = arith.constant dense<0.000000e+00> : vector<16x2xf32>
    %19 = tpu.matmul %17, %18, %cst {dimension_numbers = #tpu.dot_dimension_numbers<[1], [0], [0], [1], [0, 0, 1, 1], [], []>} : vector<16x16xf32>, vector<16x2xf32>, vector<16x2xf32> -> vector<16x2xf32>
    %c0_6 = arith.constant 0 : index
    %c0_7 = arith.constant 0 : index
    %20 = vector.load %arg6[%c0_6, %c0_7] : memref<16x16xbf16, #tpu.memory_space<vmem>>, vector<16x16xbf16>
    %21 = arith.truncf %19 : vector<16x2xf32> to vector<16x2xbf16>
    %cst_8 = arith.constant dense<0.000000e+00> : vector<16x2xf32>
    %22 = tpu.matmul %20, %21, %cst_8 {dimension_numbers = #tpu.dot_dimension_numbers<[1], [0], [0], [1], [0, 0, 1, 1], [], []>} : vector<16x16xbf16>, vector<16x2xbf16>, vector<16x2xf32> -> vector<16x2xf32>
    %cst_9 = arith.constant 0.000000e+00 : f32
    %23 = vector.broadcast %cst_9 : f32 to vector<16x2xf32>
    %24 = arith.maximumf %22, %23 : vector<16x2xf32>
    %c0_10 = arith.constant 0 : index
    %c0_11 = arith.constant 0 : index
    %25 = vector.load %arg8[%c0_10, %c0_11] : memref<64x16xbf16, #tpu.memory_space<vmem>>, vector<64x16xbf16>
    %26 = arith.truncf %24 : vector<16x2xf32> to vector<16x2xbf16>
    %cst_12 = arith.constant dense<0.000000e+00> : vector<64x2xf32>
    %27 = tpu.matmul %25, %26, %cst_12 {dimension_numbers = #tpu.dot_dimension_numbers<[1], [0], [0], [1], [0, 0, 1, 1], [], []>} : vector<64x16xbf16>, vector<16x2xbf16>, vector<64x2xf32> -> vector<64x2xf32>
    %c0_13 = arith.constant 0 : index
    %c0_14 = arith.constant 0 : index
    %28 = vector.load %arg3[%c0_13, %c0_14] : memref<2x512xf32, #tpu.memory_space<vmem>>, vector<2x512xf32>
    %cst_15 = arith.constant dense<0.000000e+00> : vector<64x512xf32>
    %29 = tpu.matmul %27, %28, %cst_15 {dimension_numbers = #tpu.dot_dimension_numbers<[1], [0], [0], [1], [0, 0, 1, 1], [], []>} : vector<64x2xf32>, vector<2x512xf32>, vector<64x512xf32> -> vector<64x512xf32>
    %c0_16 = arith.constant 0 : index
    %c0_17 = arith.constant 0 : index
    %30 = vector.load %arg0[%c0_16, %c0_17] : memref<16x256xf32, #tpu.memory_space<vmem>>, vector<16x256xf32>
    %cst_18 = arith.constant 0.000000e+00 : f32
    %31 = vector.broadcast %cst_18 : f32 to vector<16x256xf32>
    %cst_19 = arith.constant 0.899999976 : f32
    %32 = vector.broadcast %cst_19 : f32 to vector<16x256xf32>
    %33 = arith.mulf %32, %30 : vector<16x256xf32>
    %34 = arith.addf %31, %33 : vector<16x256xf32>
    %c255_i32 = arith.constant 255 : i32
    %35 = tpu.dynamic_rotate %30 by %c255_i32 dim 1 : vector<16x256xf32>, i32 -> vector<16x256xf32>
    %c1_i32_20 = arith.constant 1 : i32
    %36 = vector.broadcast %c1_i32_20 : i32 to vector<1x256xi32>
    %37 = arith.addi %16, %36 : vector<1x256xi32>
    %c0_i32_21 = arith.constant 0 : i32
    %38 = vector.broadcast %c0_i32_21 : i32 to vector<1x256xi32>
    %39 = arith.cmpi sge, %37, %38 : vector<1x256xi32>
    %c16_i32 = arith.constant 16 : i32
    %40 = vector.broadcast %c16_i32 : i32 to vector<1x256xi32>
    %41 = arith.cmpi slt, %37, %40 : vector<1x256xi32>
    %42 = arith.andi %39, %41 : vector<1x256xi1>
    %cst_22 = arith.constant 0.000000e+00 : f32
    %43 = vector.shape_cast %42 : vector<1x256xi1> to vector<1x256xi1>
    %44 = vector.broadcast %43 : vector<1x256xi1> to vector<16x256xi1>
    %45 = vector.broadcast %cst_22 : f32 to vector<16x256xf32>
    %46 = arith.select %44, %35, %45 : vector<16x256xi1>, vector<16x256xf32>
    %cst_23 = arith.constant 1.000000e+00 : f32
    %47 = vector.broadcast %cst_23 : f32 to vector<16x256xf32>
    %48 = arith.mulf %47, %46 : vector<16x256xf32>
    %49 = arith.addf %34, %48 : vector<16x256xf32>
    %c2_i32 = arith.constant 2 : i32
    %50 = tpu.dynamic_rotate %49 by %c2_i32 dim 1 : vector<16x256xf32>, i32 -> vector<16x256xf32>
    %c-2_i32 = arith.constant -2 : i32
    %51 = vector.broadcast %c-2_i32 : i32 to vector<1x256xi32>
    %52 = arith.addi %16, %51 : vector<1x256xi32>
    %c0_i32_24 = arith.constant 0 : i32
    %53 = vector.broadcast %c0_i32_24 : i32 to vector<1x256xi32>
    %54 = arith.cmpi sge, %52, %53 : vector<1x256xi32>
    %c16_i32_25 = arith.constant 16 : i32
    %55 = vector.broadcast %c16_i32_25 : i32 to vector<1x256xi32>
    %56 = arith.cmpi slt, %52, %55 : vector<1x256xi32>
    %57 = arith.andi %54, %56 : vector<1x256xi1>
    %cst_26 = arith.constant 0.000000e+00 : f32
    %58 = vector.shape_cast %57 : vector<1x256xi1> to vector<1x256xi1>
    %59 = vector.broadcast %58 : vector<1x256xi1> to vector<16x256xi1>
    %60 = vector.broadcast %cst_26 : f32 to vector<16x256xf32>
    %61 = arith.select %59, %50, %60 : vector<16x256xi1>, vector<16x256xf32>
    %c254_i32 = arith.constant 254 : i32
    %62 = tpu.dynamic_rotate %49 by %c254_i32 dim 1 : vector<16x256xf32>, i32 -> vector<16x256xf32>
    %c2_i32_27 = arith.constant 2 : i32
    %63 = vector.broadcast %c2_i32_27 : i32 to vector<1x256xi32>
    %64 = arith.addi %16, %63 : vector<1x256xi32>
    %c0_i32_28 = arith.constant 0 : i32
    %65 = vector.broadcast %c0_i32_28 : i32 to vector<1x256xi32>
    %66 = arith.cmpi sge, %64, %65 : vector<1x256xi32>
    %c16_i32_29 = arith.constant 16 : i32
    %67 = vector.broadcast %c16_i32_29 : i32 to vector<1x256xi32>
    %68 = arith.cmpi slt, %64, %67 : vector<1x256xi32>
    %69 = arith.andi %66, %68 : vector<1x256xi1>
    %cst_30 = arith.constant 0.000000e+00 : f32
    %70 = vector.shape_cast %69 : vector<1x256xi1> to vector<1x256xi1>
    %71 = vector.broadcast %70 : vector<1x256xi1> to vector<16x256xi1>
    %72 = vector.broadcast %cst_30 : f32 to vector<16x256xf32>
    %73 = arith.select %71, %62, %72 : vector<16x256xi1>, vector<16x256xf32>
    %74 = tpu.concatenate %61, %49, %73 in 0 : vector<16x256xf32>, vector<16x256xf32>, vector<16x256xf32> -> vector<48x256xf32>
    %c0_31 = arith.constant 0 : index
    %c0_32 = arith.constant 0 : index
    %c0_33 = arith.constant 0 : index
    %75 = vector.load %arg5[%c0_31, %c0_32, %c0_33] : memref<2x16x48xbf16, #tpu.memory_space<vmem>>, vector<1x16x48xbf16>
    %76 = vector.shape_cast %75 : vector<1x16x48xbf16> to vector<16x48xbf16>
    %77 = arith.truncf %74 : vector<48x256xf32> to vector<48x256xbf16>
    %cst_34 = arith.constant dense<0.000000e+00> : vector<16x256xf32>
    %78 = tpu.matmul %76, %77, %cst_34 {dimension_numbers = #tpu.dot_dimension_numbers<[1], [0], [0], [1], [0, 0, 1, 1], [], []>} : vector<16x48xbf16>, vector<48x256xbf16>, vector<16x256xf32> -> vector<16x256xf32>
    %cst_35 = arith.constant 0.000000e+00 : f32
    %79 = vector.broadcast %cst_35 : f32 to vector<16x256xf32>
    %80 = arith.cmpf ogt, %78, %79 : vector<16x256xf32>
    %cst_36 = arith.constant 1.000000e-01 : f32
    %81 = vector.broadcast %cst_36 : f32 to vector<16x256xf32>
    %82 = arith.mulf %81, %78 : vector<16x256xf32>
    %83 = arith.select %80, %78, %82 : vector<16x256xi1>, vector<16x256xf32>
    %cst_37 = arith.constant 0.000000e+00 : f32
    %84 = vector.broadcast %cst_37 : f32 to vector<16x256xf32>
    %c1_i32_38 = arith.constant 1 : i32
    %85 = tpu.dynamic_rotate %30 by %c1_i32_38 dim 1 : vector<16x256xf32>, i32 -> vector<16x256xf32>
    %c-1_i32 = arith.constant -1 : i32
    %86 = vector.broadcast %c-1_i32 : i32 to vector<1x256xi32>
    %87 = arith.addi %16, %86 : vector<1x256xi32>
    %c0_i32_39 = arith.constant 0 : i32
    %88 = vector.broadcast %c0_i32_39 : i32 to vector<1x256xi32>
    %89 = arith.cmpi sge, %87, %88 : vector<1x256xi32>
    %c16_i32_40 = arith.constant 16 : i32
    %90 = vector.broadcast %c16_i32_40 : i32 to vector<1x256xi32>
    %91 = arith.cmpi slt, %87, %90 : vector<1x256xi32>
    %92 = arith.andi %89, %91 : vector<1x256xi1>
    %cst_41 = arith.constant 0.000000e+00 : f32
    %93 = vector.shape_cast %92 : vector<1x256xi1> to vector<1x256xi1>
    %94 = vector.broadcast %93 : vector<1x256xi1> to vector<16x256xi1>
    %95 = vector.broadcast %cst_41 : f32 to vector<16x256xf32>
    %96 = arith.select %94, %85, %95 : vector<16x256xi1>, vector<16x256xf32>
    %cst_42 = arith.constant 8.100000e-01 : f32
    %97 = vector.broadcast %cst_42 : f32 to vector<16x256xf32>
    %98 = arith.mulf %97, %96 : vector<16x256xf32>
    %99 = arith.addf %84, %98 : vector<16x256xf32>
    %cst_43 = arith.constant 0.899999976 : f32
    %100 = vector.broadcast %cst_43 : f32 to vector<16x256xf32>
    %101 = arith.mulf %100, %30 : vector<16x256xf32>
    %102 = arith.addf %99, %101 : vector<16x256xf32>
    %c255_i32_44 = arith.constant 255 : i32
    %103 = tpu.dynamic_rotate %30 by %c255_i32_44 dim 1 : vector<16x256xf32>, i32 -> vector<16x256xf32>
    %c1_i32_45 = arith.constant 1 : i32
    %104 = vector.broadcast %c1_i32_45 : i32 to vector<1x256xi32>
    %105 = arith.addi %16, %104 : vector<1x256xi32>
    %c0_i32_46 = arith.constant 0 : i32
    %106 = vector.broadcast %c0_i32_46 : i32 to vector<1x256xi32>
    %107 = arith.cmpi sge, %105, %106 : vector<1x256xi32>
    %c16_i32_47 = arith.constant 16 : i32
    %108 = vector.broadcast %c16_i32_47 : i32 to vector<1x256xi32>
    %109 = arith.cmpi slt, %105, %108 : vector<1x256xi32>
    %110 = arith.andi %107, %109 : vector<1x256xi1>
    %cst_48 = arith.constant 0.000000e+00 : f32
    %111 = vector.shape_cast %110 : vector<1x256xi1> to vector<1x256xi1>
    %112 = vector.broadcast %111 : vector<1x256xi1> to vector<16x256xi1>
    %113 = vector.broadcast %cst_48 : f32 to vector<16x256xf32>
    %114 = arith.select %112, %103, %113 : vector<16x256xi1>, vector<16x256xf32>
    %cst_49 = arith.constant 1.000000e+00 : f32
    %115 = vector.broadcast %cst_49 : f32 to vector<16x256xf32>
    %116 = arith.mulf %115, %114 : vector<16x256xf32>
    %117 = arith.addf %102, %116 : vector<16x256xf32>
    %c3_i32 = arith.constant 3 : i32
    %118 = tpu.dynamic_rotate %117 by %c3_i32 dim 1 : vector<16x256xf32>, i32 -> vector<16x256xf32>
    %c-3_i32 = arith.constant -3 : i32
    %119 = vector.broadcast %c-3_i32 : i32 to vector<1x256xi32>
    %120 = arith.addi %16, %119 : vector<1x256xi32>
    %c0_i32_50 = arith.constant 0 : i32
    %121 = vector.broadcast %c0_i32_50 : i32 to vector<1x256xi32>
    %122 = arith.cmpi sge, %120, %121 : vector<1x256xi32>
    %c16_i32_51 = arith.constant 16 : i32
    %123 = vector.broadcast %c16_i32_51 : i32 to vector<1x256xi32>
    %124 = arith.cmpi slt, %120, %123 : vector<1x256xi32>
    %125 = arith.andi %122, %124 : vector<1x256xi1>
    %cst_52 = arith.constant 0.000000e+00 : f32
    %126 = vector.shape_cast %125 : vector<1x256xi1> to vector<1x256xi1>
    %127 = vector.broadcast %126 : vector<1x256xi1> to vector<16x256xi1>
    %128 = vector.broadcast %cst_52 : f32 to vector<16x256xf32>
    %129 = arith.select %127, %118, %128 : vector<16x256xi1>, vector<16x256xf32>
    %c253_i32 = arith.constant 253 : i32
    %130 = tpu.dynamic_rotate %117 by %c253_i32 dim 1 : vector<16x256xf32>, i32 -> vector<16x256xf32>
    %c3_i32_53 = arith.constant 3 : i32
    %131 = vector.broadcast %c3_i32_53 : i32 to vector<1x256xi32>
    %132 = arith.addi %16, %131 : vector<1x256xi32>
    %c0_i32_54 = arith.constant 0 : i32
    %133 = vector.broadcast %c0_i32_54 : i32 to vector<1x256xi32>
    %134 = arith.cmpi sge, %132, %133 : vector<1x256xi32>
    %c16_i32_55 = arith.constant 16 : i32
    %135 = vector.broadcast %c16_i32_55 : i32 to vector<1x256xi32>
    %136 = arith.cmpi slt, %132, %135 : vector<1x256xi32>
    %137 = arith.andi %134, %136 : vector<1x256xi1>
    %cst_56 = arith.constant 0.000000e+00 : f32
    %138 = vector.shape_cast %137 : vector<1x256xi1> to vector<1x256xi1>
    %139 = vector.broadcast %138 : vector<1x256xi1> to vector<16x256xi1>
    %140 = vector.broadcast %cst_56 : f32 to vector<16x256xf32>
    %141 = arith.select %139, %130, %140 : vector<16x256xi1>, vector<16x256xf32>
    %142 = tpu.concatenate %129, %117, %141 in 0 : vector<16x256xf32>, vector<16x256xf32>, vector<16x256xf32> -> vector<48x256xf32>
    %c1 = arith.constant 1 : index
    %c0_57 = arith.constant 0 : index
    %c0_58 = arith.constant 0 : index
    %143 = vector.load %arg5[%c1, %c0_57, %c0_58] : memref<2x16x48xbf16, #tpu.memory_space<vmem>>, vector<1x16x48xbf16>
    %144 = vector.shape_cast %143 : vector<1x16x48xbf16> to vector<16x48xbf16>
    %145 = arith.truncf %142 : vector<48x256xf32> to vector<48x256xbf16>
    %cst_59 = arith.constant dense<0.000000e+00> : vector<16x256xf32>
    %146 = tpu.matmul %144, %145, %cst_59 {dimension_numbers = #tpu.dot_dimension_numbers<[1], [0], [0], [1], [0, 0, 1, 1], [], []>} : vector<16x48xbf16>, vector<48x256xbf16>, vector<16x256xf32> -> vector<16x256xf32>
    %cst_60 = arith.constant 0.000000e+00 : f32
    %147 = vector.broadcast %cst_60 : f32 to vector<16x256xf32>
    %148 = arith.cmpf ogt, %146, %147 : vector<16x256xf32>
    %cst_61 = arith.constant 1.000000e-01 : f32
    %149 = vector.broadcast %cst_61 : f32 to vector<16x256xf32>
    %150 = arith.mulf %149, %146 : vector<16x256xf32>
    %151 = arith.select %148, %146, %150 : vector<16x256xi1>, vector<16x256xf32>
    %152 = tpu.concatenate %83, %151 in 1 : vector<16x256xf32>, vector<16x256xf32> -> vector<16x512xf32>
    %153 = tpu.iota {dimensions = array<i32: 1>} : vector<1x512xi32>
    %c128_i32_62 = arith.constant 128 : i32
    %c0_i32_63 = arith.constant 0 : i32
    %154 = arith.cmpi eq, %c128_i32_62, %c0_i32_63 : i32
    %c1_i32_64 = arith.constant 1 : i32
    %155 = arith.select %154, %c1_i32_64, %c128_i32_62 : i32
    %156 = vector.broadcast %155 : i32 to vector<1x512xi32>
    %157 = arith.remsi %153, %156 : vector<1x512xi32>
    %c0_i32_65 = arith.constant 0 : i32
    %158 = vector.broadcast %c0_i32_65 : i32 to vector<1x512xi32>
    %159 = arith.cmpi ne, %157, %158 : vector<1x512xi32>
    %c0_i32_66 = arith.constant 0 : i32
    %160 = vector.broadcast %c0_i32_66 : i32 to vector<1x512xi32>
    %161 = arith.cmpi slt, %157, %160 : vector<1x512xi32>
    %c0_i32_67 = arith.constant 0 : i32
    %162 = arith.cmpi slt, %155, %c0_i32_67 : i32
    %163 = vector.broadcast %162 : i1 to vector<1x512xi1>
    %164 = vector.broadcast %163 : vector<1x512xi1> to vector<1x512xi1>
    %165 = arith.xori %161, %164 : vector<1x512xi1>
    %166 = arith.andi %165, %159 : vector<1x512xi1>
    %167 = vector.broadcast %155 : i32 to vector<1x512xi32>
    %168 = arith.addi %157, %167 : vector<1x512xi32>
    %169 = arith.select %166, %168, %157 : vector<1x512xi1>, vector<1x512xi32>
    %c16_i32_68 = arith.constant 16 : i32
    %170 = vector.broadcast %c16_i32_68 : i32 to vector<1x512xi32>
    %171 = arith.cmpi slt, %169, %170 : vector<1x512xi32>
    %172 = arith.extui %171 : vector<1x512xi1> to vector<1x512xi32>
    %173 = arith.sitofp %172 : vector<1x512xi32> to vector<1x512xf32>
    %c0_69 = arith.constant 0 : index
    %c0_70 = arith.constant 0 : index
    %174 = vector.load %arg7[%c0_69, %c0_70] : memref<64x16xbf16, #tpu.memory_space<vmem>>, vector<64x16xbf16>
    %175 = arith.truncf %152 : vector<16x512xf32> to vector<16x512xbf16>
    %cst_71 = arith.constant dense<0.000000e+00> : vector<64x512xf32>
    %176 = tpu.matmul %174, %175, %cst_71 {dimension_numbers = #tpu.dot_dimension_numbers<[1], [0], [0], [1], [0, 0, 1, 1], [], []>} : vector<64x16xbf16>, vector<16x512xbf16>, vector<64x512xf32> -> vector<64x512xf32>
    %177 = arith.addf %176, %29 : vector<64x512xf32>
    %178 = vector.broadcast %173 : vector<1x512xf32> to vector<64x512xf32>
    %179 = arith.mulf %177, %178 : vector<64x512xf32>
    %cst_72 = arith.constant dense<0.000000e+00> : vector<64xf32>
    %180 = vector.multi_reduction <add>, %179, %cst_72 [1] : vector<64x512xf32> to vector<64xf32>
    %181 = vector.shape_cast %180 : vector<64xf32> to vector<64x1xf32>
    %182 = arith.mulf %177, %177 : vector<64x512xf32>
    %183 = vector.broadcast %173 : vector<1x512xf32> to vector<64x512xf32>
    %184 = arith.mulf %182, %183 : vector<64x512xf32>
    %cst_73 = arith.constant dense<0.000000e+00> : vector<64xf32>
    %185 = vector.multi_reduction <add>, %184, %cst_73 [1] : vector<64x512xf32> to vector<64xf32>
    %186 = vector.shape_cast %185 : vector<64xf32> to vector<64x1xf32>
    %cst_74 = arith.constant 1.562500e-02 : f32
    %187 = vector.broadcast %cst_74 : f32 to vector<64x1xf32>
    %188 = arith.mulf %181, %187 : vector<64x1xf32>
    %cst_75 = arith.constant 1.562500e-02 : f32
    %189 = vector.broadcast %cst_75 : f32 to vector<64x1xf32>
    %190 = arith.mulf %186, %189 : vector<64x1xf32>
    %191 = arith.mulf %188, %188 : vector<64x1xf32>
    %192 = arith.subf %190, %191 : vector<64x1xf32>
    %cst_76 = arith.constant 0.000000e+00 : f32
    %193 = vector.broadcast %cst_76 : f32 to vector<64x1xf32>
    %194 = arith.maximumf %192, %193 : vector<64x1xf32>
    %c0_77 = arith.constant 0 : index
    %c0_78 = arith.constant 0 : index
    %195 = vector.load %arg9[%c0_77, %c0_78] : memref<64x1xf32, #tpu.memory_space<vmem>>, vector<64x1xf32>
    %cst_79 = arith.constant 9.99999974E-6 : f32
    %196 = vector.broadcast %cst_79 : f32 to vector<64x1xf32>
    %197 = arith.addf %194, %196 : vector<64x1xf32>
    %198 = math.rsqrt %197 : vector<64x1xf32>
    %199 = arith.mulf %195, %198 : vector<64x1xf32>
    %c0_80 = arith.constant 0 : index
    %c0_81 = arith.constant 0 : index
    %200 = vector.load %arg10[%c0_80, %c0_81] : memref<64x1xf32, #tpu.memory_space<vmem>>, vector<64x1xf32>
    %201 = arith.mulf %188, %199 : vector<64x1xf32>
    %202 = arith.subf %200, %201 : vector<64x1xf32>
    %203 = vector.broadcast %199 : vector<64x1xf32> to vector<64x512xf32>
    %204 = arith.mulf %177, %203 : vector<64x512xf32>
    %205 = vector.broadcast %202 : vector<64x1xf32> to vector<64x512xf32>
    %206 = arith.addf %204, %205 : vector<64x512xf32>
    %cst_82 = arith.constant 0.000000e+00 : f32
    %207 = vector.broadcast %cst_82 : f32 to vector<64x512xf32>
    %208 = arith.cmpf ogt, %206, %207 : vector<64x512xf32>
    %cst_83 = arith.constant 1.000000e-01 : f32
    %209 = vector.broadcast %cst_83 : f32 to vector<64x512xf32>
    %210 = arith.mulf %209, %206 : vector<64x512xf32>
    %211 = arith.select %208, %206, %210 : vector<64x512xi1>, vector<64x512xf32>
    %c0_84 = arith.constant 0 : index
    %c0_85 = arith.constant 0 : index
    %212 = vector.load %arg11[%c0_84, %c0_85] : memref<64x64xbf16, #tpu.memory_space<vmem>>, vector<64x64xbf16>
    %213 = arith.truncf %211 : vector<64x512xf32> to vector<64x512xbf16>
    %cst_86 = arith.constant dense<0.000000e+00> : vector<64x512xf32>
    %214 = tpu.matmul %212, %213, %cst_86 {dimension_numbers = #tpu.dot_dimension_numbers<[1], [0], [0], [1], [0, 0, 1, 1], [], []>} : vector<64x64xbf16>, vector<64x512xbf16>, vector<64x512xf32> -> vector<64x512xf32>
    %215 = vector.broadcast %173 : vector<1x512xf32> to vector<64x512xf32>
    %216 = arith.mulf %214, %215 : vector<64x512xf32>
    %cst_87 = arith.constant dense<0.000000e+00> : vector<64xf32>
    %217 = vector.multi_reduction <add>, %216, %cst_87 [1] : vector<64x512xf32> to vector<64xf32>
    %218 = vector.shape_cast %217 : vector<64xf32> to vector<64x1xf32>
    %219 = arith.mulf %214, %214 : vector<64x512xf32>
    %220 = vector.broadcast %173 : vector<1x512xf32> to vector<64x512xf32>
    %221 = arith.mulf %219, %220 : vector<64x512xf32>
    %cst_88 = arith.constant dense<0.000000e+00> : vector<64xf32>
    %222 = vector.multi_reduction <add>, %221, %cst_88 [1] : vector<64x512xf32> to vector<64xf32>
    %223 = vector.shape_cast %222 : vector<64xf32> to vector<64x1xf32>
    %cst_89 = arith.constant 1.562500e-02 : f32
    %224 = vector.broadcast %cst_89 : f32 to vector<64x1xf32>
    %225 = arith.mulf %218, %224 : vector<64x1xf32>
    %cst_90 = arith.constant 1.562500e-02 : f32
    %226 = vector.broadcast %cst_90 : f32 to vector<64x1xf32>
    %227 = arith.mulf %223, %226 : vector<64x1xf32>
    %228 = arith.mulf %225, %225 : vector<64x1xf32>
    %229 = arith.subf %227, %228 : vector<64x1xf32>
    %cst_91 = arith.constant 0.000000e+00 : f32
    %230 = vector.broadcast %cst_91 : f32 to vector<64x1xf32>
    %231 = arith.maximumf %229, %230 : vector<64x1xf32>
    %c0_92 = arith.constant 0 : index
    %c0_93 = arith.constant 0 : index
    %232 = vector.load %arg12[%c0_92, %c0_93] : memref<64x1xf32, #tpu.memory_space<vmem>>, vector<64x1xf32>
    %cst_94 = arith.constant 9.99999974E-6 : f32
    %233 = vector.broadcast %cst_94 : f32 to vector<64x1xf32>
    %234 = arith.addf %231, %233 : vector<64x1xf32>
    %235 = math.rsqrt %234 : vector<64x1xf32>
    %236 = arith.mulf %232, %235 : vector<64x1xf32>
    %c0_95 = arith.constant 0 : index
    %c0_96 = arith.constant 0 : index
    %237 = vector.load %arg13[%c0_95, %c0_96] : memref<64x1xf32, #tpu.memory_space<vmem>>, vector<64x1xf32>
    %238 = arith.mulf %225, %236 : vector<64x1xf32>
    %239 = arith.subf %237, %238 : vector<64x1xf32>
    %240 = vector.broadcast %236 : vector<64x1xf32> to vector<64x512xf32>
    %241 = arith.mulf %214, %240 : vector<64x512xf32>
    %242 = vector.broadcast %239 : vector<64x1xf32> to vector<64x512xf32>
    %243 = arith.addf %241, %242 : vector<64x512xf32>
    %cst_97 = arith.constant 0.000000e+00 : f32
    %244 = vector.broadcast %cst_97 : f32 to vector<64x512xf32>
    %245 = arith.cmpf ogt, %243, %244 : vector<64x512xf32>
    %cst_98 = arith.constant 1.000000e-01 : f32
    %246 = vector.broadcast %cst_98 : f32 to vector<64x512xf32>
    %247 = arith.mulf %246, %243 : vector<64x512xf32>
    %248 = arith.select %245, %243, %247 : vector<64x512xi1>, vector<64x512xf32>
    %c0_99 = arith.constant 0 : index
    %c0_100 = arith.constant 0 : index
    %249 = vector.load %arg14[%c0_99, %c0_100] : memref<32x64xbf16, #tpu.memory_space<vmem>>, vector<32x64xbf16>
    %250 = arith.truncf %248 : vector<64x512xf32> to vector<64x512xbf16>
    %cst_101 = arith.constant dense<0.000000e+00> : vector<32x512xf32>
    %251 = tpu.matmul %249, %250, %cst_101 {dimension_numbers = #tpu.dot_dimension_numbers<[1], [0], [0], [1], [0, 0, 1, 1], [], []>} : vector<32x64xbf16>, vector<64x512xbf16>, vector<32x512xf32> -> vector<32x512xf32>
    %252 = vector.broadcast %173 : vector<1x512xf32> to vector<32x512xf32>
    %253 = arith.mulf %251, %252 : vector<32x512xf32>
    %cst_102 = arith.constant dense<0.000000e+00> : vector<32xf32>
    %254 = vector.multi_reduction <add>, %253, %cst_102 [1] : vector<32x512xf32> to vector<32xf32>
    %255 = vector.shape_cast %254 : vector<32xf32> to vector<32x1xf32>
    %256 = arith.mulf %251, %251 : vector<32x512xf32>
    %257 = vector.broadcast %173 : vector<1x512xf32> to vector<32x512xf32>
    %258 = arith.mulf %256, %257 : vector<32x512xf32>
    %cst_103 = arith.constant dense<0.000000e+00> : vector<32xf32>
    %259 = vector.multi_reduction <add>, %258, %cst_103 [1] : vector<32x512xf32> to vector<32xf32>
    %260 = vector.shape_cast %259 : vector<32xf32> to vector<32x1xf32>
    %cst_104 = arith.constant 1.562500e-02 : f32
    %261 = vector.broadcast %cst_104 : f32 to vector<32x1xf32>
    %262 = arith.mulf %255, %261 : vector<32x1xf32>
    %cst_105 = arith.constant 1.562500e-02 : f32
    %263 = vector.broadcast %cst_105 : f32 to vector<32x1xf32>
    %264 = arith.mulf %260, %263 : vector<32x1xf32>
    %265 = arith.mulf %262, %262 : vector<32x1xf32>
    %266 = arith.subf %264, %265 : vector<32x1xf32>
    %cst_106 = arith.constant 0.000000e+00 : f32
    %267 = vector.broadcast %cst_106 : f32 to vector<32x1xf32>
    %268 = arith.maximumf %266, %267 : vector<32x1xf32>
    %c0_107 = arith.constant 0 : index
    %c0_108 = arith.constant 0 : index
    %269 = vector.load %arg15[%c0_107, %c0_108] : memref<32x1xf32, #tpu.memory_space<vmem>>, vector<32x1xf32>
    %cst_109 = arith.constant 9.99999974E-6 : f32
    %270 = vector.broadcast %cst_109 : f32 to vector<32x1xf32>
    %271 = arith.addf %268, %270 : vector<32x1xf32>
    %272 = math.rsqrt %271 : vector<32x1xf32>
    %273 = arith.mulf %269, %272 : vector<32x1xf32>
    %c0_110 = arith.constant 0 : index
    %c0_111 = arith.constant 0 : index
    %274 = vector.load %arg16[%c0_110, %c0_111] : memref<32x1xf32, #tpu.memory_space<vmem>>, vector<32x1xf32>
    %275 = arith.mulf %262, %273 : vector<32x1xf32>
    %276 = arith.subf %274, %275 : vector<32x1xf32>
    %277 = vector.broadcast %273 : vector<32x1xf32> to vector<32x512xf32>
    %278 = arith.mulf %251, %277 : vector<32x512xf32>
    %279 = vector.broadcast %276 : vector<32x1xf32> to vector<32x512xf32>
    %280 = arith.addf %278, %279 : vector<32x512xf32>
    %cst_112 = arith.constant 0.000000e+00 : f32
    %281 = vector.broadcast %cst_112 : f32 to vector<32x512xf32>
    %282 = arith.cmpf ogt, %280, %281 : vector<32x512xf32>
    %cst_113 = arith.constant 1.000000e-01 : f32
    %283 = vector.broadcast %cst_113 : f32 to vector<32x512xf32>
    %284 = arith.mulf %283, %280 : vector<32x512xf32>
    %285 = arith.select %282, %280, %284 : vector<32x512xi1>, vector<32x512xf32>
    %cst_114 = arith.constant 0.000000e+00 : f32
    %286 = vector.broadcast %cst_114 : f32 to vector<2x256xf32>
    %287 = vector.extract_strided_slice %285 {offsets = [0, 0], sizes = [32, 256], strides = [1, 1]} : vector<32x512xf32> to vector<32x256xf32>
    %c0_115 = arith.constant 0 : index
    %c0_116 = arith.constant 0 : index
    %c0_117 = arith.constant 0 : index
    %288 = vector.load %arg17[%c0_115, %c0_116, %c0_117] : memref<2x2x32xbf16, #tpu.memory_space<vmem>>, vector<1x2x32xbf16>
    %289 = vector.shape_cast %288 : vector<1x2x32xbf16> to vector<2x32xbf16>
    %290 = arith.truncf %287 : vector<32x256xf32> to vector<32x256xbf16>
    %cst_118 = arith.constant dense<0.000000e+00> : vector<2x256xf32>
    %291 = tpu.matmul %289, %290, %cst_118 {dimension_numbers = #tpu.dot_dimension_numbers<[1], [0], [0], [1], [0, 0, 1, 1], [], []>} : vector<2x32xbf16>, vector<32x256xbf16>, vector<2x256xf32> -> vector<2x256xf32>
    %292 = arith.addf %286, %291 : vector<2x256xf32>
    %293 = vector.extract_strided_slice %285 {offsets = [0, 256], sizes = [32, 256], strides = [1, 1]} : vector<32x512xf32> to vector<32x256xf32>
    %c1_119 = arith.constant 1 : index
    %c0_120 = arith.constant 0 : index
    %c0_121 = arith.constant 0 : index
    %294 = vector.load %arg17[%c1_119, %c0_120, %c0_121] : memref<2x2x32xbf16, #tpu.memory_space<vmem>>, vector<1x2x32xbf16>
    %295 = vector.shape_cast %294 : vector<1x2x32xbf16> to vector<2x32xbf16>
    %296 = arith.truncf %293 : vector<32x256xf32> to vector<32x256xbf16>
    %cst_122 = arith.constant dense<0.000000e+00> : vector<2x256xf32>
    %297 = tpu.matmul %295, %296, %cst_122 {dimension_numbers = #tpu.dot_dimension_numbers<[1], [0], [0], [1], [0, 0, 1, 1], [], []>} : vector<2x32xbf16>, vector<32x256xbf16>, vector<2x256xf32> -> vector<2x256xf32>
    %298 = arith.addf %292, %297 : vector<2x256xf32>
    %c0_123 = arith.constant 0 : index
    %c0_124 = arith.constant 0 : index
    %299 = vector.load %arg18[%c0_123, %c0_124] : memref<1x256xf32, #tpu.memory_space<vmem>>, vector<1x256xf32>
    %cst_125 = arith.constant 0.000000e+00 : f32
    %300 = vector.broadcast %cst_125 : f32 to vector<1x256xf32>
    %301 = arith.cmpf ogt, %299, %300 : vector<1x256xf32>
    %cst_126 = arith.constant 0xFF800000 : f32
    %302 = vector.shape_cast %301 : vector<1x256xi1> to vector<1x256xi1>
    %303 = vector.broadcast %302 : vector<1x256xi1> to vector<2x256xi1>
    %304 = vector.broadcast %cst_126 : f32 to vector<2x256xf32>
    %305 = arith.select %303, %304, %298 : vector<2x256xi1>, vector<2x256xf32>
    %cst_127 = arith.constant dense<0xFF800000> : vector<2xf32>
    %306 = vector.multi_reduction <maximumf>, %305, %cst_127 [1] : vector<2x256xf32> to vector<2xf32>
    %307 = vector.shape_cast %306 : vector<2xf32> to vector<2x1xf32>
    %308 = vector.broadcast %307 : vector<2x1xf32> to vector<2x256xf32>
    %309 = arith.subf %305, %308 : vector<2x256xf32>
    %310 = math.exp %309 : vector<2x256xf32>
    %c0_128 = arith.constant 0 : index
    %c0_129 = arith.constant 0 : index
    %311 = vector.load %arg4[%c0_128, %c0_129] : memref<256x2xf32, #tpu.memory_space<vmem>>, vector<256x2xf32>
    %cst_130 = arith.constant dense<0.000000e+00> : vector<2x2xf32>
    %312 = tpu.matmul %310, %311, %cst_130 {dimension_numbers = #tpu.dot_dimension_numbers<[1], [0], [0], [1], [0, 0, 1, 1], [], []>} : vector<2x256xf32>, vector<256x2xf32>, vector<2x2xf32> -> vector<2x2xf32>
    %313 = math.log %312 : vector<2x2xf32>
    %c0_131 = arith.constant 0 : index
    %c0_132 = arith.constant 0 : index
    %314 = vector.load %arg3[%c0_131, %c0_132] : memref<2x512xf32, #tpu.memory_space<vmem>>, vector<2x256xf32>
    %cst_133 = arith.constant dense<0.000000e+00> : vector<2x256xf32>
    %315 = tpu.matmul %313, %314, %cst_133 {dimension_numbers = #tpu.dot_dimension_numbers<[1], [0], [0], [1], [0, 0, 1, 1], [], []>} : vector<2x2xf32>, vector<2x256xf32>, vector<2x256xf32> -> vector<2x256xf32>
    %316 = arith.subf %309, %315 : vector<2x256xf32>
    %c0_134 = arith.constant 0 : index
    %c0_135 = arith.constant 0 : index
    %317 = vector.load %arg19[%c0_134, %c0_135] : memref<2x256xf32, #tpu.memory_space<vmem>>, vector<2x256xf32>
    tpu.vector_store %arg19[%c0_134, %c0_135], %316 {strides = array<i32>} : memref<2x256xf32, #tpu.memory_space<vmem>>, vector<2x256xf32>,
    return
  }
}

</mosaic_0001>

<bundles_post_ra>
// kernel: _lambda_.1
= control target key start
LH: loop header
LB: loop body
LE: loop exit
PB: predicated region body
PF: predicated region fallthrough
CT: control target
= control target key end

     0   :  { %vm94_vm0 = vcmask 130048   ;;  %v5185_v5 = vmov 0.0   ;;  %vm3484_vm1 = vmmov 0   ;;  %s3486_s22 = smov 127   ;;  %v63_v16 = vlaneseq  ;;  %s3487_s26 = smov 2   ;;  %s5162_s2 = inlined_call_operand.vmem [shape: f32[16,2], index: 2, kind: input, shape index: {}]   ;;  %s5163_s1 = inlined_call_operand.vmem [shape: f32[16,16], index: 1, kind: input, shape index: {}]   ;;  %s5164_s6 = inlined_call_operand.vmem [shape: bf16[16,16], index: 6, kind: input, shape index: {}]   ;;  %s5165_s0 = inlined_call_operand.vmem [shape: f32[16,256], index: 0, kind: input, shape index: {}]   ;;  %s5166_s8 = inlined_call_operand.vmem [shape: bf16[64,16], index: 8, kind: input, shape index: {}]   ;;  %s5167_s3 = inlined_call_operand.vmem [shape: f32[2,512], index: 3, kind: input, shape index: {}]   ;;  %s5168_s5 = inlined_call_operand.vmem [shape: bf16[2,16,48], index: 5, kind: input, shape index: {}]   ;;  %s5169_s7 = inlined_call_operand.vmem [shape: bf16[64,16], index: 7, kind: input, shape index: {}]   ;;  %s5170_s9 = inlined_call_operand.vmem [shape: f32[64,1], index: 9, kind: input, shape index: {}, may-alias: {9,12}]   ;;  %s5171_s10 = inlined_call_operand.vmem [shape: f32[64,1], index: 10, kind: input, shape index: {}, may-alias: {10,13}]   ;;  %s5172_s11 = inlined_call_operand.vmem [shape: bf16[64,64], index: 11, kind: input, shape index: {}]   ;;  %s5173_s12 = inlined_call_operand.vmem [shape: f32[64,1], index: 12, kind: input, shape index: {}, may-alias: {9,12}]   ;;  %s5174_s13 = inlined_call_operand.vmem [shape: f32[64,1], index: 13, kind: input, shape index: {}, may-alias: {10,13}]   ;;  %s5175_s14 = inlined_call_operand.vmem [shape: bf16[32,64], index: 14, kind: input, shape index: {}]   ;;  %s5176_s15 = inlined_call_operand.vmem [shape: f32[32,1], index: 15, kind: input, shape index: {}]   ;;  %s5177_s16 = inlined_call_operand.vmem [shape: f32[32,1], index: 16, kind: input, shape index: {}]   ;;  %s5178_s17 = inlined_call_operand.vmem [shape: bf16[2,2,32], index: 17, kind: input, shape index: {}]   ;;  %s5179_s4 = inlined_call_operand.vmem [shape: f32[256,2], index: 4, kind: input, shape index: {}]   ;;  %s5180_s18 = inlined_call_operand.vmem [shape: f32[1,256], index: 18, kind: input, shape index: {}]   ;;  %s5181_s19 = inlined_call_operand.vmem [shape: f32[2,256], index: 19, kind: output, shape index: {}]  }
   0x1   :  { %5212 = sst [smem:[#allocation15_spill]] %s5162_s2  ;;  %s3485_s2 = smov 1   ;;  %v3420_v14 = vld [vmem:[%s5166_s8] sm:$0xff]   ;;  %vm380_vm12 = vcmask 1041408  }
   0x2   :  { %5213 = sst [smem:[#allocation16_spill]] %s5163_s1  ;;  %s5216_s20 = sld [smem:[#allocation15_spill]]  ;;  %3319 = vmatprep.mubr.msk.bf16.mxu0 %vm94_vm0, %v3420_v14  ;;  %v3631_v18 = vand.u32 127, %v63_v16 }
   0x3   :  { %5214 = sst [smem:[#allocation17_spill]] %s5164_s6  ;;  %s5217_s23 = sld [smem:[#allocation16_spill]] }
   0x4   :  { %5215 = sst [smem:[#allocation18_spill]] %s5165_s0  ;;  %s5219_s24 = sld [smem:[#allocation17_spill]]  ;;  %v65_v19 = vadd.s32 128, %v3631_v18  ;;  %vm798_vm2 = vcmp.lt.s32.totalorder %v3631_v18, 1  ;;  %v803_v20 = vadd.s32 4294967295, %v3631_v18  ;;  %vm635_vm9 = vcmp.lt.s32.totalorder %v3631_v18, 127 }
   0x5   :  { %s5218_s27 = sld [smem:[#allocation18_spill]]  ;;  %v640_v40 = vadd.s32 1, %v3631_v18  ;;  %s3489_s29 = smov 3   ;;  %vm668_vm13 = vcmp.lt.s32.totalorder %v3631_v18, 2 }
   0x6   :  { %v3638_v24 = vand.u32 127, %v65_v19  ;;  %vm805_vm3 = vcmp.ge.s32.totalorder %v803_v20, 0  ;;  %vm807_vm4 = vcmp.lt.s32.totalorder %v803_v20, 16  ;;  %s3491_s30 = smov 125  }
   0x7   :  { %vm3640_vm5 = vmand %vm805_vm3, %vm807_vm4  ;;  %vm644_vm10 = vcmp.lt.s32.totalorder %v640_v40, 16 }
   0x8   :  { %v92_v0 = vld [vmem:[%s5216_s20] sm:$0xff]  ;;  %v93_v1 = vld [vmem:[%s5216_s20 + $0x8] sm:$0xff]  ;;  %v804_v28 = vadd.s32 4294967295, %v3638_v24  ;;  %v641_v44 = vadd.s32 1, %v3638_v24 }
   0x9   :  { %v90_v2 = vld [vmem:[%s5217_s23] sm:$0xff]  ;;  %v3327_v3 = vpack.c.bf16 %v93_v1, %v92_v0  ;;  %v91_v4 = vld [vmem:[%s5217_s23 + $0x8] sm:$0xff] }
   0xa   :  { %3308 = vmatprep.mubr.msk.f32.mxu1 %vm94_vm0, %v90_v2  ;;  %v3419_v13 = vld [vmem:[%s5219_s24] sm:$0xff]   ;;  %vm806_vm6 = vcmp.ge.s32.totalorder %v804_v28, 0  ;;  %vm808_vm7 = vcmp.lt.s32.totalorder %v804_v28, 16  ;;  %vm645_vm11 = vcmp.lt.s32.totalorder %v641_v44, 16 }
   0xb   :  { %3328 = vmatprep.subr.bf16.mxu1 %v3327_v3  ;;  %v616_v6 = vld [vmem:[%s5218_s27 + $0x8] sm:$0xff]  ;;  %v615_v7 = vld [vmem:[%s5218_s27] sm:$0xff]  ;;  %v618_v8 = vld [vmem:[%s5218_s27 + $0x18] sm:$0xff] }
   0xc   :  { %3330 = vmatpush3.bf16.msra.mxu1 %v3327_v3  ;;  %794 = vrot.lane.b32.xlu1 %v616_v6, %s3485_s2  ;;  %v617_v9 = vld [vmem:[%s5218_s27 + $0x10] sm:$0xff]  ;;  %v620_v27 = vmul.f32 0.9, %v616_v6  ;;  %v619_v32 = vmul.f32 0.9, %v615_v7  ;;  %vm810_vm8 = vmand %vm806_vm6, %vm808_vm7 }
   0xd   :  { %3311 = vmatprep.subr.bf16.mxu1 %v5185_v5  ;;  %790 = vrot.lane.b32.xlu0 %v615_v7, %s3485_s2  ;;  %v622_v36 = vmul.f32 0.9, %v618_v8  ;;  %v621_v38 = vmul.f32 0.9, %v617_v9 }
   0xf   :  { %3309 = vmatmul.mubr.msk.f32.vlgmr.msra.gmra.mrb[0].mxu1 %vm94_vm0, %v91_v4 }
  0x10   :  { %3313 = vmatprep.mubr.msk.bf16.mxu1 %vm3484_vm1, %v5185_v5  ;;  %796 = vrot.lane.b32.xlu1 %v618_v8, %s3485_s2  ;;  %vm843_vm1 = vcmp.lt.s32.totalorder %v3631_v18, 3 }
  0x11   :  { %792 = vrot.lane.b32.xlu0 %v617_v9, %s3485_s2  ;;  %s3490_s2 = smov 126  }
  0x14   :  { %629 = vrot.lane.b32.xlu1 %v617_v9, %s3486_s22  ;;  %v336_v9 = vld [vmem:[%s5167_s3] sm:$0xff] }
  0x15   :  { %627 = vrot.lane.b32.xlu0 %v615_v7, %s3486_s22 }
  0x18   :  { %633 = vrot.lane.b32.xlu1 %v618_v8, %s3486_s22 }
  0x19   :  { %631 = vrot.lane.b32.xlu0 %v616_v6, %s3486_s22 }
  0x7e   :  { %v795_v15 = vpop.permute.xlu1 %794 }
  0x7f   :  { %v791_v17 = vpop.permute.xlu0 %790 }
  0x80   :  { %v801_v23 = vsel %vm798_vm2, %v795_v15, %v791_v17  ;;  %v799_v33 = vsel %vm798_vm2, %v791_v17, %v795_v15 }
  0x81   :  { %v815_v29 = vsel %vm3640_vm5, %v801_v23, 0.0  ;;  %v816_v41 = vsel %vm810_vm8, %v799_v33, 0.0 }
  0x82   :  { %v797_v21 = vpop.permute.xlu1 %796  ;;  %v819_v34 = vmul.f32 0.81, %v815_v29  ;;  %v820_v47 = vmul.f32 0.81, %v816_v41  ;;  %v3421_v29 = vld [vmem:[%s5166_s8 + $0x8] sm:$0xff]  }
  0x83   :  { %v793_v22 = vpop.permute.xlu0 %792 }
  0x84   :  { %v802_v26 = vsel %vm798_vm2, %v797_v21, %v793_v22  ;;  %v800_v35 = vsel %vm798_vm2, %v793_v22, %v797_v21  ;;  %v827_v42 = vadd.f32 %v819_v34, %v619_v32  ;;  %v828_v53 = vadd.f32 %v820_v47, %v620_v27 }
  0x85   :  { %v817_v37 = vsel %vm3640_vm5, %v802_v26, 0.0  ;;  %v818_v43 = vsel %vm810_vm8, %v800_v35, 0.0 }
  0x86   :  { %v630_v30 = vpop.permute.xlu1 %629  ;;  %v821_v39 = vmul.f32 0.81, %v817_v37  ;;  %v822_v48 = vmul.f32 0.81, %v818_v43 }
  0x87   :  { %v628_v31 = vpop.permute.xlu0 %627 }
  0x88   :  { %v829_v49 = vadd.f32 %v821_v39, %v621_v38  ;;  %v830_v54 = vadd.f32 %v822_v48, %v622_v36 }
  0x8a   :  { %v634_v45 = vpop.permute.xlu1 %633 }
  0x8b   :  { %v632_v46 = vpop.permute.xlu0 %631  ;;  %v637_v50 = vsel %vm635_vm9, %v630_v30, %v634_v45  ;;  %v639_v51 = vsel %vm635_vm9, %v634_v45, %v630_v30  ;;  %v3422_v30 = vld [vmem:[%s5166_s8 + $0x10] sm:$0xff]  }
  0x8c   :  { %v636_v52 = vsel %vm635_vm9, %v628_v31, %v632_v46  ;;  %v654_v55 = vsel %vm644_vm10, %v637_v50, 0.0  ;;  %v655_v56 = vsel %vm645_vm11, %v639_v51, 0.0  ;;  %v638_v59 = vsel %vm635_vm9, %v632_v46, %v628_v31  ;;  %v3423_v31 = vld [vmem:[%s5166_s8 + $0x18] sm:$0xff]  }
  0x8d   :  { %v3664_v57 = vadd.f32 %v654_v55, %v621_v38  ;;  %v3666_v58 = vadd.f32 %v655_v56, %v622_v36  ;;  %v3670_v60 = vadd.f32 %v829_v49, %v654_v55  ;;  %v3672_v61 = vadd.f32 %v830_v54, %v655_v56 }
  0x8e   :  { %v652_v62 = vsel %vm644_vm10, %v636_v52, 0.0  ;;  %v653_v63 = vsel %vm645_vm11, %v638_v59, 0.0  ;;  %v674_v56 = vadd.s32 4294967294, %v3638_v24 }
  0x8f   :  { %v3674_v0 = vadd.f32 %v652_v62, %v619_v32  ;;  %v3676_v1 = vadd.f32 %v653_v63, %v620_v27  ;;  %v3678_v2 = vadd.f32 %v827_v42, %v652_v62  ;;  %v3680_v3 = vadd.f32 %v828_v53, %v653_v63 }
  0x90   :  { %v849_v32 = vadd.s32 4294967293, %v3638_v24  ;;  %vm676_vm4 = vcmp.ge.s32.totalorder %v674_v56, 0  ;;  %vm678_vm5 = vcmp.lt.s32.totalorder %v674_v56, 16  ;;  %v5186_v62 = vmov 0  }
  0x91   :  { %v3382_v4 = vpack.i.bf16 %v3666_v58, %v3676_v1  ;;  %v3377_v6 = vpack.i.bf16 %v3664_v57, %v3674_v0  ;;  %v3397_v7 = vpack.i.bf16 %v3672_v61, %v3680_v3  ;;  %v3387_v8 = vpack.i.bf16 %v3670_v60, %v3678_v2  ;;  %vm680_vm6 = vmand %vm676_vm4, %vm678_vm5  ;;  %3417 = vset.pattern.permute.xlu1 %v5186_v62 }
  0x92   :  { %vm851_vm14 = vcmp.ge.s32.totalorder %v849_v32, 0  ;;  %vm853_vm15 = vcmp.lt.s32.totalorder %v849_v32, 16  ;;  %vm3187_vm7 = vmpackc.low %vm680_vm6, %vm680_vm6  ;;  %3418 = vset.pattern.permute.xlu0 %v5186_v62  ;;  %v877_v32 = vadd.s32 3, %v3631_v18 }
  0x93   :  { %3383 = vrot.lane.b32.xlu1 %v3382_v4, %s3487_s26  ;;  %3378 = vrot.lane.b32.xlu0 %v3377_v6, %s3487_s26  ;;  %vm855_vm2 = vmand %vm851_vm14, %vm853_vm15 }
  0x94   :  { %vm3203_vm3 = vmpackc.low %vm855_vm2, %vm855_vm2  ;;  %vm355_vm2 = vcmask 15360  }
  0x97   :  { %3398 = vrot.lane.b32.xlu1 %v3397_v7, %s3489_s29  ;;  %3388 = vrot.lane.b32.xlu0 %v3387_v8, %s3489_s29 }
  0x9b   :  { %3403 = vrot.lane.b32.xlu1 %v3382_v4, %s3490_s2  ;;  %3393 = vrot.lane.b32.xlu0 %v3377_v6, %s3490_s2  ;;  %v673_v6 = vadd.s32 4294967294, %v3631_v18 }
  0x9d   :  { %vm675_vm8 = vcmp.ge.s32.totalorder %v673_v6, 0  ;;  %vm677_vm9 = vcmp.lt.s32.totalorder %v673_v6, 16 }
  0x9e   :  { %vm3743_vm14 = vmand %vm675_vm8, %vm677_vm9 }
  0x9f   :  { %3413 = vrot.lane.b32.xlu1 %v3397_v7, %s3491_s30  ;;  %3408 = vrot.lane.b32.xlu0 %v3387_v8, %s3491_s30  ;;  %v848_v7 = vadd.s32 4294967293, %v3631_v18 }
  0xa1   :  { %vm850_vm10 = vcmp.ge.s32.totalorder %v848_v7, 0  ;;  %vm852_vm11 = vcmp.lt.s32.totalorder %v848_v7, 16 }
  0xa2   :  { %vm3747_vm15 = vmand %vm850_vm10, %vm852_vm11  ;;  %vm881_vm10 = vcmp.lt.s32.totalorder %v877_v32, 16 }
  0xa3   :  { %vm3206_vm4 = vmpackc.low %vm3747_vm15, %vm3747_vm15 }
  0xe2   :  { %v3310_v10 = vpop.f32.mrb[0].mxu1 }
  0xe3   :  { %v167_v11 = vpop.f32.mrb[1].mxu1 }
  0xe4   :  { %v178_v12 = vpack.c.bf16 %v3310_v10, %v167_v11  ;;  %v3488_v10 = vmov 1983009808  }
  0xe5   :  { %v340_v11 = vunpack.c.l.s4 %v3488_v10 }
  0xe6   :  { %3312 = vmatpush3.bf16.msra.mxu1 %v178_v12  ;;  %v3694_v12 = vshrl.u32 %v63_v16, 7 }
  0xe7   :  { %v341_v14 = vunpack.c.0.s8 %v340_v11 }
  0xe8   :  { %5222 = vst [vmem:[#allocation2_spill] sm:$0xff] %v3694_v12 }
  0xe9   :  { %3314 = vmatmul.mubr.msk.bf16.vlgmr.msra.gmra.mrb[4].mxu1 %vm94_vm0, %v3419_v13  ;;  %v338_v13 = vcombine.high %v336_v9, %v336_v9  ;;  %v344_v15 = vsub.s32 %v341_v14, %v3694_v12 }
  0xea   :  { %453 = vmatprep.mubr.f32.mxu1 %v5185_v5 }
  0xeb   :  { %v352_v17 = vrot.slane %v338_v13, %v344_v15  ;;  %v345_v19 = vrot.slane %v336_v9, %v344_v15 }
  0xed   :  { %v353_v20 = vcombine.high %v345_v19, %v345_v19  ;;  %v354_v28 = vcombine.high %v352_v17, %v352_v17 }
  0xef   :  { %3166 = vmatprep.subr.msk.mxu1 %vm380_vm12, %v353_v20 }
  0xf0   :  { %3167 = vmatpush1.msk.msra.mxu1 %vm380_vm12, %v345_v19 }
 0x105   :  { %v3384_v33 = vpop.permute.xlu1 %3383  ;;  %v3379_v34 = vpop.permute.xlu0 %3378 }
 0x106   :  { %v3386_v35 = vunpack.i.h.bf16 %v3384_v33  ;;  %v3385_v36 = vunpack.i.l.bf16 %v3384_v33  ;;  %v3381_v37 = vunpack.i.h.bf16 %v3379_v34  ;;  %v3380_v38 = vunpack.i.l.bf16 %v3379_v34 }
 0x107   :  { %v723_v34 = vpack.c.bf16 %v3666_v58, %v3676_v1 }
 0x108   :  { %v3718_v39 = vsel %vm668_vm13, %v3386_v35, %v3381_v37  ;;  %v3722_v40 = vsel %vm668_vm13, %v3385_v36, %v3380_v38  ;;  %v670_v54 = vsel %vm668_vm13, %v3381_v37, %v3386_v35  ;;  %v669_v55 = vsel %vm668_vm13, %v3380_v38, %v3385_v36 }
 0x109   :  { %v3191_v41 = vpack.c.bf16 %v3718_v39, %v3722_v40  ;;  %v3399_v42 = vpop.permute.xlu1 %3398  ;;  %v3389_v43 = vpop.permute.xlu0 %3388  ;;  %v3188_v59 = vpack.c.bf16 %v670_v54, %v669_v55  ;;  %vm697_vm13 = vcmp.lt.s32.totalorder %v3631_v18, 126  ;;  %v899_v35 = vpack.c.bf16 %v3672_v61, %v3680_v3 }
 0x10a   :  { %v3401_v44 = vunpack.i.h.bf16 %v3399_v42  ;;  %v3400_v45 = vunpack.i.l.bf16 %v3399_v42  ;;  %v3391_v46 = vunpack.i.h.bf16 %v3389_v43  ;;  %v3390_v47 = vunpack.i.l.bf16 %v3389_v43 }
 0x10b   :  { %3189 = vmatprep.subr.msk.bf16.mxu1 %vm3187_vm7, %v3188_v59  ;;  %v722_v40 = vpack.c.bf16 %v3664_v57, %v3674_v0 }
 0x10c   :  { %v845_v48 = vsel %vm843_vm1, %v3391_v46, %v3401_v44  ;;  %v3727_v49 = vsel %vm843_vm1, %v3401_v44, %v3391_v46  ;;  %v844_v50 = vsel %vm843_vm1, %v3390_v47, %v3400_v45  ;;  %v3729_v51 = vsel %vm843_vm1, %v3400_v45, %v3390_v47  ;;  %v3425_v44 = vld [vmem:[%s5168_s5] sm:$0xff]   ;;  %v3426_v45 = vld [vmem:[%s5168_s5 + $0x8] sm:$0xff]  }
 0x10d   :  { %v3204_v52 = vpack.c.bf16 %v845_v48, %v844_v50  ;;  %v3207_v53 = vpack.c.bf16 %v3727_v49, %v3729_v51  ;;  %v3404_v63 = vpop.permute.xlu1 %3403  ;;  %v3394_v4 = vpop.permute.xlu0 %3393  ;;  %vm872_vm1 = vcmp.lt.s32.totalorder %v3631_v18, 125 }
 0x10e   :  { %v3406_v10 = vunpack.i.h.bf16 %v3404_v63  ;;  %v3405_v11 = vunpack.i.l.bf16 %v3404_v63  ;;  %v3396_v13 = vunpack.i.h.bf16 %v3394_v4  ;;  %v3395_v14 = vunpack.i.l.bf16 %v3394_v4 }
 0x110   :  { %v699_v36 = vsel %vm697_vm13, %v3396_v13, %v3406_v10  ;;  %v698_v37 = vsel %vm697_vm13, %v3395_v14, %v3405_v11 }
 0x111   :  { %v3414_v8 = vpop.permute.xlu1 %3413  ;;  %v3409_v9 = vpop.permute.xlu0 %3408  ;;  %v3197_v42 = vpack.c.bf16 %v699_v36, %v698_v37 }
 0x112   :  { %v3416_v15 = vunpack.i.h.bf16 %v3414_v8  ;;  %v3415_v19 = vunpack.i.l.bf16 %v3414_v8  ;;  %v3411_v20 = vunpack.i.h.bf16 %v3409_v9 }
 0x114   :  { %v874_v61 = vsel %vm872_vm1, %v3411_v20, %v3416_v15 }
 0x1bc   :  { %v221_v16 = vpop.f32.mrb[4].mxu1 }
 0x1bd   :  { %v3315_v21 = vpop.f32.mrb[5].mxu1  ;;  %v228_v23 = vmax.f32 %v221_v16, 0.0  ;;  %v3410_v16 = vunpack.i.l.bf16 %v3409_v9 }
 0x1be   :  { %v224_v22 = vpop.f32.mrb[6].mxu1 }
 0x1bf   :  { %v229_v25 = vmax.f32 %v224_v22, 0.0  ;;  %v3316_v26 = vpop.f32.mrb[7].mxu1  ;;  %v703_v22 = vadd.s32 2, %v3638_v24  ;;  %v873_v1 = vsel %vm872_vm1, %v3410_v16, %v3415_v19 }
 0x1c0   :  { %v700_v26 = vsel %vm697_vm13, %v3405_v11, %v3395_v14  ;;  %v3213_v43 = vpack.c.bf16 %v874_v61, %v873_v1 }
 0x1c1   :  { %v238_v27 = vpack.c.bf16 %v229_v25, %v228_v23  ;;  %v878_v23 = vadd.s32 3, %v3638_v24  ;;  %v701_v25 = vsel %vm697_vm13, %v3406_v10, %v3396_v13  ;;  %vm707_vm5 = vcmp.lt.s32.totalorder %v703_v22, 16  ;;  %vm3212_vm13 = vmpackc.low %vm881_vm10, %vm881_vm10 }
 0x1c2   :  { %v3194_v38 = vpack.c.bf16 %v701_v25, %v700_v26  ;;  %vm3799_vm7 = vmpackc.low %vm707_vm5, %vm707_vm5  ;;  %vm992_vm10 = vcmp.lt.s32.totalorder %v3638_v24, 16 }
 0x1c3   :  { %3317 = vmatprep.subr.bf16.mxu0 %v238_v27  ;;  %vm882_vm6 = vcmp.lt.s32.totalorder %v878_v23, 16 }
 0x1c4   :  { %3318 = vmatpush3.bf16.msra.mxu0 %v238_v27  ;;  %vm3209_vm9 = vmpackc.low %vm882_vm6, %vm882_vm6 }
 0x1c5   :  { %3176 = vmatprep.subr.msk.mxu0 %vm380_vm12, %v354_v28  ;;  %v702_v28 = vadd.s32 2, %v3631_v18 }
 0x1c7   :  { %3320 = vmatmul.mubr.msk.bf16.vlgmr.msra.gmra.mrb[0].mxu0 %vm94_vm0, %v3421_v29  ;;  %v876_v29 = vsel %vm872_vm1, %v3416_v15, %v3411_v20  ;;  %vm706_vm8 = vcmp.lt.s32.totalorder %v702_v28, 16 }
 0x1c8   :  { %3323 = vmatprep.mubr.msk.bf16.mxu0 %vm94_vm0, %v3422_v30  ;;  %3177 = vmatpush1.msk.msra.mxu0 %vm380_vm12, %v352_v17  ;;  %v875_v30 = vsel %vm872_vm1, %v3415_v19, %v3410_v16  ;;  %vm3196_vm11 = vmpackc.low %vm706_vm8, %vm706_vm8 }
 0x1c9   :  { %3205 = vmatprep.subr.msk.bf16.mxu0 %vm3203_vm3, %v3204_v52  ;;  %vm3190_vm3 = vmpackc.low %vm3743_vm14, %vm3743_vm14  ;;  %v3210_v3 = vpack.c.bf16 %v876_v29, %v875_v30  ;;  %vm731_vm14 = vcmask 392192  }
 0x1cf   :  { %3324 = vmatmul.mubr.msk.bf16.gmra.mrb[4].mxu0 %vm94_vm0, %v3423_v31 }
 0x1d0   :  { %566 = vmatprep.mubr.f32.mxu0 %v5185_v5 }
 0x29a   :  { %v3321_v27 = vpop.f32.mrb[0].mxu0 }
 0x29b   :  { %v305_v31 = vpop.f32.mrb[1].mxu0 }
 0x29c   :  { %v3322_v33 = vpop.f32.mrb[2].mxu0  ;;  %3168 = vmatmul.mubr.msk.f32.vlgmr.msra.gmra.mrb[2].mxu1 %vm355_vm2, %v305_v31  ;;  %3178 = vmatmul.mubr.msk.f32.vlgmr.msra.gmra.mrb[8].mxu0 %vm355_vm2, %v305_v31 }
 0x29d   :  { %3192 = vmatpush1.bf16.msk.msra.mxu1 %vm3190_vm3, %v3191_v41  ;;  %3208 = vmatpush1.bf16.msk.msra.mxu0 %vm3206_vm4, %v3207_v53  ;;  %v308_v58 = vpop.f32.mrb[3].mxu0  ;;  %v898_v41 = vpack.c.bf16 %v3670_v60, %v3678_v2 }
 0x29e   :  { %737 = vmatprep.subr.bf16.mxu1 %v723_v34  ;;  %912 = vmatprep.subr.bf16.mxu0 %v899_v35 }
 0x29f   :  { %459 = vmatprep.mubr.f32.mxu1 %v5185_v5  ;;  %572 = vmatprep.mubr.f32.mxu0 %v5185_v5 }
 0x2a0   :  { %3169 = vmatmul.mubr.msk.f32.gmra.mrb[8].mxu1 %vm355_vm2, %v308_v58  ;;  %3179 = vmatmul.mubr.msk.f32.gmra.mrb[10].mxu0 %vm355_vm2, %v308_v58 }
 0x2a1   :  { %738 = vmatpush1.bf16.msra.mxu1 %v722_v40  ;;  %913 = vmatpush1.bf16.msra.mxu0 %v898_v41 }
 0x2a2   :  { %3195 = vmatprep.subr.msk.bf16.mxu1 %vm3799_vm7, %v3194_v38  ;;  %3211 = vmatprep.subr.msk.bf16.mxu0 %vm3209_vm9, %v3210_v3  ;;  %v3325_v57 = vpop.f32.mrb[4].mxu0  ;;  %vm991_vm9 = vcmp.lt.s32.totalorder %v3631_v18, 16 }
 0x2a3   :  { %465 = vmatprep.mubr.f32.mxu1 %v5185_v5  ;;  %578 = vmatprep.mubr.f32.mxu0 %v5185_v5  ;;  %v321_v60 = vpop.f32.mrb[5].mxu0 }
 0x2a4   :  { %3170 = vmatmul.mubr.msk.f32.gmra.mrb[10].mxu1 %vm355_vm2, %v3321_v27  ;;  %3180 = vmatmul.mubr.msk.f32.gmra.mrb[12].mxu0 %vm355_vm2, %v3321_v27  ;;  %v3326_v0 = vpop.f32.mrb[6].mxu0 }
 0x2a5   :  { %3198 = vmatpush1.bf16.msk.msra.mxu1 %vm3196_vm11, %v3197_v42  ;;  %3214 = vmatpush1.bf16.msk.msra.mxu0 %vm3212_vm13, %v3213_v43  ;;  %v324_v2 = vpop.f32.mrb[7].mxu0 }
 0x2a6   :  { %471 = vmatprep.mubr.f32.mxu1 %v5185_v5  ;;  %584 = vmatprep.mubr.f32.mxu0 %v5185_v5 }
 0x2a8   :  { %3171 = vmatmul.mubr.msk.f32.gmra.mrb[12].mxu1 %vm355_vm2, %v3322_v33  ;;  %3181 = vmatmul.mubr.msk.f32.gmra.mrb[14].mxu0 %vm355_vm2, %v3322_v33 }
 0x2a9   :  { %477 = vmatprep.mubr.f32.mxu1 %v5185_v5  ;;  %590 = vmatprep.mubr.f32.mxu0 %v5185_v5 }
 0x2ac   :  { %3172 = vmatmul.mubr.msk.f32.gmra.mrb[14].mxu1 %vm355_vm2, %v321_v60  ;;  %3182 = vmatmul.mubr.msk.f32.gmra.mrb[16].mxu0 %vm355_vm2, %v321_v60 }
 0x2ad   :  { %483 = vmatprep.mubr.f32.mxu1 %v5185_v5  ;;  %596 = vmatprep.mubr.f32.mxu0 %v5185_v5 }
 0x2b0   :  { %3173 = vmatmul.mubr.msk.f32.gmra.mrb[16].mxu1 %vm355_vm2, %v324_v2  ;;  %3183 = vmatmul.mubr.msk.f32.gmra.mrb[18].mxu0 %vm355_vm2, %v324_v2 }
 0x2b1   :  { %489 = vmatprep.mubr.f32.mxu1 %v5185_v5  ;;  %602 = vmatprep.mubr.f32.mxu0 %v5185_v5 }
 0x2b4   :  { %3174 = vmatmul.mubr.msk.f32.gmra.mrb[18].mxu1 %vm355_vm2, %v3325_v57  ;;  %3184 = vmatmul.mubr.msk.f32.gmra.mrb[20].mxu0 %vm355_vm2, %v3325_v57 }
 0x2b5   :  { %495 = vmatprep.mubr.f32.mxu1 %v5185_v5  ;;  %608 = vmatprep.mubr.f32.mxu0 %v5185_v5 }
 0x2b8   :  { %3175 = vmatmul.mubr.msk.f32.gmra.mrb[20].mxu1 %vm355_vm2, %v3326_v0  ;;  %3185 = vmatmul.mubr.msk.f32.gmra.mrb[22].mxu0 %vm355_vm2, %v3326_v0 }
 0x2b9   :  { %767 = vmatprep.mubr.bf16.mxu1 %v5186_v62  ;;  %942 = vmatprep.mubr.bf16.mxu0 %v5186_v62 }
 0x2bc   :  { %3199 = vmatmul.mubr.msk.bf16.vlgmr.msra.gmra.mrb[24].mxu1 %vm731_vm14, %v3425_v44  ;;  %3215 = vmatmul.mubr.msk.bf16.vlgmr.msra.gmra.mrb[24].mxu0 %vm731_vm14, %v3426_v45 }
 0x2bd   :  { %1079 = vmatprep.mubr.bf16.mxu1 %v5186_v62  ;;  %1152 = vmatprep.mubr.bf16.mxu0 %v5186_v62 }
 0x36f   :  { %v3849_v46 = vpop.f32.mrb[2].mxu1  ;;  %v3851_v47 = vpop.f32.mrb[8].mxu0 }
 0x370   :  { %v3853_v48 = vpop.f32.mrb[3].mxu1  ;;  %v3855_v49 = vpop.f32.mrb[9].mxu0 }
 0x373   :  { %v3857_v50 = vpop.f32.mrb[8].mxu1  ;;  %v3859_v51 = vpop.f32.mrb[10].mxu0 }
 0x374   :  { %v3861_v52 = vpop.f32.mrb[9].mxu1  ;;  %v3863_v53 = vpop.f32.mrb[11].mxu0 }
 0x377   :  { %v3865_v54 = vpop.f32.mrb[10].mxu1  ;;  %v3867_v55 = vpop.f32.mrb[12].mxu0 }
 0x378   :  { %v3869_v56 = vpop.f32.mrb[11].mxu1  ;;  %v3871_v59 = vpop.f32.mrb[13].mxu0 }
 0x37b   :  { %v3873_v63 = vpop.f32.mrb[12].mxu1  ;;  %v3875_v4 = vpop.f32.mrb[14].mxu0 }
 0x37c   :  { %v3877_v6 = vpop.f32.mrb[13].mxu1  ;;  %v3879_v7 = vpop.f32.mrb[15].mxu0 }
 0x37f   :  { %v3881_v8 = vpop.f32.mrb[14].mxu1  ;;  %v3883_v9 = vpop.f32.mrb[16].mxu0 }
 0x380   :  { %v3885_v10 = vpop.f32.mrb[15].mxu1  ;;  %v3887_v11 = vpop.f32.mrb[17].mxu0 }
 0x383   :  { %v3889_v13 = vpop.f32.mrb[16].mxu1  ;;  %v3891_v14 = vpop.f32.mrb[18].mxu0 }
 0x384   :  { %v3893_v15 = vpop.f32.mrb[17].mxu1  ;;  %v3895_v17 = vpop.f32.mrb[19].mxu0 }
 0x387   :  { %v3897_v19 = vpop.f32.mrb[18].mxu1  ;;  %v3899_v20 = vpop.f32.mrb[20].mxu0 }
 0x388   :  { %v3901_v16 = vpop.f32.mrb[19].mxu1  ;;  %v3903_v21 = vpop.f32.mrb[21].mxu0 }
 0x38b   :  { %v3905_v22 = vpop.f32.mrb[20].mxu1  ;;  %v3907_v23 = vpop.f32.mrb[22].mxu0 }
 0x38c   :  { %v3909_v25 = vpop.f32.mrb[21].mxu1  ;;  %v3911_v26 = vpop.f32.mrb[23].mxu0 }
 0x38f   :  { %v769_v27 = vpop.f32.mrb[24].mxu1  ;;  %v944_v28 = vpop.f32.mrb[24].mxu0 }
 0x390   :  { %vm778_vm15 = vcmp.gt.f32.partialorder %v769_v27, 0.0  ;;  %v782_v29 = vmul.f32 0.1, %v769_v27  ;;  %v957_v30 = vmul.f32 0.1, %v944_v28  ;;  %vm953_vm1 = vcmp.gt.f32.partialorder %v944_v28, 0.0 }
 0x391   :  { %v771_v31 = vpop.f32.mrb[25].mxu1  ;;  %v946_v32 = vpop.f32.mrb[25].mxu0 }
 0x392   :  { %v783_v33 = vmul.f32 0.1, %v771_v31  ;;  %v773_v34 = vpop.f32.mrb[26].mxu1  ;;  %v948_v35 = vpop.f32.mrb[26].mxu0  ;;  %v786_v36 = vsel %vm778_vm15, %v769_v27, %v782_v29  ;;  %v958_v37 = vmul.f32 0.1, %v946_v32  ;;  %v961_v58 = vsel %vm953_vm1, %v944_v28, %v957_v30 }
 0x393   :  { %vm780_vm3 = vcmp.gt.f32.partialorder %v773_v34, 0.0  ;;  %v784_v38 = vmul.f32 0.1, %v773_v34  ;;  %vm779_vm4 = vcmp.gt.f32.partialorder %v771_v31, 0.0  ;;  %vm955_vm5 = vcmp.gt.f32.partialorder %v948_v35, 0.0  ;;  %v775_v1 = vpop.f32.mrb[27].mxu1 }
 0x394   :  { %v959_v61 = vmul.f32 0.1, %v948_v35  ;;  %v950_v3 = vpop.f32.mrb[27].mxu0  ;;  %vm954_vm6 = vcmp.gt.f32.partialorder %v946_v32, 0.0  ;;  %vm781_vm7 = vcmp.gt.f32.partialorder %v775_v1, 0.0  ;;  %v787_v57 = vsel %vm779_vm4, %v771_v31, %v783_v33  ;;  %v3427_v28 = vld [vmem:[%s5169_s7] sm:$0xff]  }
 0x395   :  { %v788_v39 = vsel %vm780_vm3, %v773_v34, %v784_v38  ;;  %v785_v40 = vmul.f32 0.1, %v775_v1  ;;  %vm956_vm8 = vcmp.gt.f32.partialorder %v950_v3, 0.0  ;;  %v960_v43 = vmul.f32 0.1, %v950_v3  ;;  %v3428_v29 = vld [vmem:[%s5169_s7 + $0x8] sm:$0xff]  }
 0x396   :  { %v1011_v41 = vpack.c.bf16 %v788_v39, %v786_v36  ;;  %v963_v42 = vsel %vm955_vm5, %v948_v35, %v959_v61  ;;  %v962_v2 = vsel %vm954_vm6, %v946_v32, %v958_v37  ;;  %v3429_v30 = vld [vmem:[%s5169_s7 + $0x10] sm:$0xff]   ;;  %v3430_v31 = vld [vmem:[%s5169_s7 + $0x18] sm:$0xff]   ;;  %v965_v32 = vadd.s32 256, %v3631_v18 }
 0x397   :  { %v1013_v60 = vpack.c.bf16 %v963_v42, %v961_v58  ;;  %v789_v0 = vsel %vm781_vm7, %v775_v1, %v785_v40  ;;  %v964_v44 = vsel %vm956_vm8, %v950_v3, %v960_v43  ;;  %v966_v34 = vadd.s32 384, %v3631_v18 }
 0x398   :  { %v1012_v45 = vpack.c.bf16 %v789_v0, %v787_v57  ;;  %v1014_v27 = vpack.c.bf16 %v964_v44, %v962_v2  ;;  %v971_v33 = vand.u32 127, %v965_v32  ;;  %v3946_v35 = vsel %vm991_vm9, 1.0, %v5185_v5 }
 0x399   :  { %5229 = vst [vmem:[#allocation3_spill] sm:$0xff] %v3946_v35  ;;  %v3949_v37 = vsel %vm992_vm10, 1.0, %v5185_v5  ;;  %v978_v39 = vand.u32 127, %v966_v34 }
 0x39a   :  { %1047 = vmatprep.subr.bf16.mxu1 %v1012_v45  ;;  %1120 = vmatprep.subr.bf16.mxu0 %v1014_v27  ;;  %5230 = vst [vmem:[#allocation4_spill] sm:$0xff] %v3949_v37 }
 0x39b   :  { %1048 = vmatpush1.bf16.msra.mxu1 %v1011_v41  ;;  %1121 = vmatpush1.bf16.msra.mxu0 %v1013_v60  ;;  %vm994_vm11 = vcmp.lt.s32.totalorder %v978_v39, 16 }
 0x39c   :  { %v4000_v32 = vsel %vm994_vm11, 1.0, %v5185_v5 }
 0x39e   :  { %3224 = vmatmul.mubr.msk.bf16.vlgmr.msra.gmra.mrb[28].mxu1 %vm94_vm0, %v3427_v28  ;;  %3228 = vmatmul.mubr.msk.bf16.vlgmr.msra.gmra.mrb[28].mxu0 %vm94_vm0, %v3427_v28 }
 0x39f   :  { %1089 = vmatprep.mubr.bf16.mxu1 %v5186_v62  ;;  %1162 = vmatprep.mubr.bf16.mxu0 %v5186_v62 }
 0x3a6   :  { %3225 = vmatmul.mubr.msk.bf16.gmra.mrb[32].mxu1 %vm94_vm0, %v3428_v29  ;;  %3229 = vmatmul.mubr.msk.bf16.gmra.mrb[32].mxu0 %vm94_vm0, %v3428_v29 }
 0x3a7   :  { %1099 = vmatprep.mubr.bf16.mxu1 %v5186_v62  ;;  %1172 = vmatprep.mubr.bf16.mxu0 %v5186_v62 }
 0x3ae   :  { %3226 = vmatmul.mubr.msk.bf16.gmra.mrb[36].mxu1 %vm94_vm0, %v3429_v30  ;;  %3230 = vmatmul.mubr.msk.bf16.gmra.mrb[36].mxu0 %vm94_vm0, %v3429_v30 }
 0x3af   :  { %1109 = vmatprep.mubr.bf16.mxu1 %v5186_v62  ;;  %1182 = vmatprep.mubr.bf16.mxu0 %v5186_v62 }
 0x3b6   :  { %3227 = vmatmul.mubr.msk.bf16.gmra.mrb[40].mxu1 %vm94_vm0, %v3430_v31  ;;  %3231 = vmatmul.mubr.msk.bf16.gmra.mrb[40].mxu0 %vm94_vm0, %v3430_v31  ;;  %vm993_vm0 = vcmp.lt.s32.totalorder %v971_v33, 16 }
 0x3b7   :  { %1794 = vmatprep.mubr.bf16.mxu1 %v5186_v62  ;;  %1867 = vmatprep.mubr.bf16.mxu0 %v5186_v62 }
 0x471   :  { %v1081_v36 = vpop.f32.mrb[28].mxu1  ;;  %v1154_v58 = vpop.f32.mrb[28].mxu0 }
 0x472   :  { %v3952_v38 = vadd.f32 %v1081_v36, %v3849_v46  ;;  %v1083_v61 = vpop.f32.mrb[29].mxu1  ;;  %v3955_v1 = vadd.f32 %v1154_v58, %v3851_v47  ;;  %v1156_v18 = vpop.f32.mrb[29].mxu0 }
 0x473   :  { %v3958_v24 = vadd.f32 %v1083_v61, %v3853_v48  ;;  %v1085_v3 = vpop.f32.mrb[30].mxu1  ;;  %v3963_v41 = vadd.f32 %v1156_v18, %v3855_v49  ;;  %v1158_v42 = vpop.f32.mrb[30].mxu0  ;;  %v3971_v48 = vsel %vm993_vm0, 1.0, %v5185_v5 }
 0x474   :  { %v1193_v40 = vmul.f32 %v3946_v35, %v3952_v38  ;;  %v3966_v46 = vadd.f32 %v1085_v3, %v3857_v50  ;;  %v1087_v43 = vpop.f32.mrb[31].mxu1  ;;  %v1160_v57 = vpop.f32.mrb[31].mxu0  ;;  %v1265_v60 = vmul.f32 %v3952_v38, %v3952_v38  ;;  %v3976_v0 = vadd.f32 %v1158_v42, %v3859_v51 }
 0x475   :  { %v1194_v47 = vmul.f32 %v3949_v37, %v3958_v24  ;;  %v3979_v49 = vadd.f32 %v1087_v43, %v3861_v52  ;;  %v3982_v50 = vadd.f32 %v1160_v57, %v3863_v53  ;;  %v1266_v45 = vmul.f32 %v3958_v24, %v3958_v24 }
 0x476   :  { %v1197_v2 = vmul.f32 %v3946_v35, %v3966_v46  ;;  %v1269_v27 = vmul.f32 %v3966_v46, %v3966_v46  ;;  %v1195_v52 = vmul.f32 %v3971_v48, %v3955_v1  ;;  %v1267_v53 = vmul.f32 %v3955_v1, %v3955_v1 }
 0x477   :  { %v1225_v44 = vadd.f32 %v1194_v47, %v1193_v40  ;;  %v1198_v51 = vmul.f32 %v3949_v37, %v3979_v49  ;;  %v1297_v33 = vmul.f32 %v3946_v35, %v1265_v60  ;;  %v1298_v43 = vmul.f32 %v3949_v37, %v1266_v45 }
 0x478   :  { %v1270_v47 = vmul.f32 %v3979_v49, %v3979_v49  ;;  %v4027_v57 = vmul.f32 %v3976_v0, %v3976_v0  ;;  %v1196_v60 = vmul.f32 %v4000_v32, %v3963_v41 }
 0x479   :  { %v1091_v28 = vpop.f32.mrb[32].mxu1  ;;  %v1164_v30 = vpop.f32.mrb[32].mxu0  ;;  %v1226_v40 = vadd.f32 %v1225_v44, %v1195_v52  ;;  %v1230_v42 = vadd.f32 %v1198_v51, %v1197_v2  ;;  %v1299_v2 = vmul.f32 %v3971_v48, %v1267_v53  ;;  %v4034_v44 = vmul.f32 %v3982_v50, %v3982_v50 }
 0x47a   :  { %v3997_v29 = vadd.f32 %v1091_v28, %v3865_v54  ;;  %v1093_v31 = vpop.f32.mrb[33].mxu1  ;;  %v4004_v34 = vadd.f32 %v1164_v30, %v3867_v55  ;;  %v1166_v58 = vpop.f32.mrb[33].mxu0  ;;  %v1268_v55 = vmul.f32 %v3963_v41, %v3963_v41  ;;  %v1200_v53 = vmul.f32 %v4000_v32, %v3982_v50 }
 0x47b   :  { %v4007_v36 = vadd.f32 %v1093_v31, %v3869_v56  ;;  %v1095_v61 = vpop.f32.mrb[34].mxu1  ;;  %v4010_v18 = vadd.f32 %v1166_v58, %v3871_v59  ;;  %v1168_v3 = vpop.f32.mrb[34].mxu0  ;;  %v4019_v56 = vmul.f32 %v3946_v35, %v1269_v27  ;;  %v1227_v52 = vadd.f32 %v1226_v40, %v1196_v60 }
 0x47c   :  { %5231 = vst [vmem:[#allocation5_spill] sm:$0xff] %v3997_v29  ;;  %5232 = vst [vmem:[#allocation6_spill] sm:$0xff] %v4004_v34  ;;  %v4013_v54 = vadd.f32 %v1095_v61, %v3873_v63  ;;  %v1097_v39 = vpop.f32.mrb[35].mxu1  ;;  %v1170_v59 = vpop.f32.mrb[35].mxu0  ;;  %v1199_v63 = vmul.f32 %v3971_v48, %v3976_v0  ;;  %v4037_v45 = vadd.f32 %v1168_v3, %v3875_v4 }
 0x47d   :  { %5233 = vst [vmem:[#allocation7_spill] sm:$0xff] %v4007_v36  ;;  %5234 = vst [vmem:[#allocation8_spill] sm:$0xff] %v4010_v18  ;;  %v4040_v27 = vadd.f32 %v1097_v39, %v3877_v6  ;;  %v4043_v51 = vadd.f32 %v1170_v59, %v3879_v7  ;;  %v1273_v28 = vmul.f32 %v3997_v29, %v3997_v29  ;;  %1228 = vadd.xlane.f32.xlu0 %v1227_v52 }
 0x47e   :  { %5235 = vst [vmem:[#allocation9_spill] sm:$0xff] %v4013_v54  ;;  %5236 = vst [vmem:[#allocation10_spill] sm:$0xff] %v4037_v45  ;;  %v1231_v30 = vadd.f32 %v1230_v42, %v1199_v63  ;;  %v1302_v31 = vmul.f32 %v3949_v37, %v1270_v47  ;;  %v1201_v4 = vmul.f32 %v3946_v35, %v3997_v29 }
 0x47f   :  { %5237 = vst [vmem:[#allocation11_spill] sm:$0xff] %v4040_v27  ;;  %v1203_v6 = vmul.f32 %v3971_v48, %v4004_v34  ;;  %v1274_v7 = vmul.f32 %v4007_v36, %v4007_v36  ;;  %v1277_v61 = vmul.f32 %v4013_v54, %v4013_v54  ;;  %v1329_v42 = vadd.f32 %v1298_v43, %v1297_v33 }
 0x480   :  { %v1232_v3 = vadd.f32 %v1231_v30, %v1200_v53  ;;  %v1275_v59 = vmul.f32 %v4004_v34, %v4004_v34  ;;  %v1202_v63 = vmul.f32 %v3949_v37, %v4007_v36  ;;  %v1300_v33 = vmul.f32 %v4000_v32, %v1268_v55 }
 0x481   :  { %v1101_v58 = vpop.f32.mrb[36].mxu1  ;;  %v1174_v40 = vpop.f32.mrb[36].mxu0  ;;  %v1330_v43 = vadd.f32 %v1329_v42, %v1299_v2  ;;  %v1306_v12 = vmul.f32 %v3949_v37, %v1274_v7  ;;  %v4084_v55 = vmul.f32 %v3946_v35, %v1277_v61  ;;  %v4093_v7 = vmul.f32 %v4037_v45, %v4037_v45 }
 0x482   :  { %v4059_v39 = vadd.f32 %v1101_v58, %v3881_v8  ;;  %v1103_v47 = vpop.f32.mrb[37].mxu1  ;;  %v4066_v60 = vadd.f32 %v1174_v40, %v3883_v9  ;;  %v1176_v52 = vpop.f32.mrb[37].mxu0  ;;  %v1305_v8 = vmul.f32 %v3946_v35, %v1273_v28  ;;  %1233 = vadd.xlane.f32.xlu1 %v1232_v3  ;;  %v1276_v9 = vmul.f32 %v4010_v18, %v4010_v18 }
 0x483   :  { %v4069_v5 = vadd.f32 %v1103_v47, %v3885_v10  ;;  %v1105_v53 = vpop.f32.mrb[38].mxu1  ;;  %v4074_v30 = vadd.f32 %v1176_v52, %v3887_v11  ;;  %v1178_v58 = vpop.f32.mrb[38].mxu0  ;;  %v1205_v10 = vmul.f32 %v3946_v35, %v4013_v54  ;;  %v1278_v28 = vmul.f32 %v4040_v27, %v4040_v27 }
 0x484   :  { %5238 = vst [vmem:[#allocation12_spill] sm:$0xff] %v4059_v39  ;;  %5239 = vst [vmem:[#allocation13_spill] sm:$0xff] %v4066_v60  ;;  %v1107_v62 = vpop.f32.mrb[39].mxu1  ;;  %v1180_v3 = vpop.f32.mrb[39].mxu0  ;;  %v1207_v11 = vmul.f32 %v3971_v48, %v4037_v45  ;;  %v1331_v2 = vadd.f32 %v1330_v43, %v1300_v33  ;;  %v4089_v40 = vadd.f32 %v1105_v53, %v3889_v13 }
 0x485   :  { %5240 = vst [vmem:[#allocation14_spill] sm:$0xff] %v4069_v5  ;;  %v4096_v42 = vadd.f32 %v1178_v58, %v3891_v14  ;;  %v4099_v47 = vadd.f32 %v1107_v62, %v3893_v15  ;;  %v4102_v61 = vadd.f32 %v1180_v3, %v3895_v17  ;;  %v1206_v52 = vmul.f32 %v3949_v37, %v4040_v27 }
 0x486   :  { %v4108_v13 = vmul.f32 %v4043_v51, %v4043_v51  ;;  %v1281_v53 = vmul.f32 %v4059_v39, %v4059_v39  ;;  %1332 = vadd.xlane.f32.xlu0 %v1331_v2  ;;  %v1235_v33 = vadd.f32 %v1202_v63, %v1201_v4  ;;  %v4113_v14 = vmul.f32 %v3949_v37, %v1278_v28 }
 0x487   :  { %v1209_v62 = vmul.f32 %v3946_v35, %v4059_v39  ;;  %v1282_v15 = vmul.f32 %v4069_v5, %v4069_v5  ;;  %v1204_v17 = vmul.f32 %v4000_v32, %v4010_v18  ;;  %v1211_v58 = vmul.f32 %v3971_v48, %v4066_v60 }
 0x488   :  { %v4125_v3 = vmul.f32 %v4066_v60, %v4066_v60  ;;  %v1210_v4 = vmul.f32 %v3949_v37, %v4069_v5  ;;  %v1236_v63 = vadd.f32 %v1235_v33, %v1203_v6  ;;  %v1303_v39 = vmul.f32 %v3971_v48, %v4027_v57 }
 0x489   :  { %v1111_v43 = vpop.f32.mrb[40].mxu1  ;;  %v1184_v28 = vpop.f32.mrb[40].mxu0  ;;  %v1334_v45 = vadd.f32 %v1302_v31, %v4019_v56  ;;  %v1313_v34 = vmul.f32 %v3946_v35, %v1281_v53  ;;  %v1307_v6 = vmul.f32 %v3971_v48, %v1275_v59  ;;  %v1339_v33 = vadd.f32 %v1306_v12, %v1305_v8 }
 0x48a   :  { %v1113_v2 = vpop.f32.mrb[41].mxu1  ;;  %v4133_v27 = vadd.f32 %v1111_v43, %v3897_v19  ;;  %v4136_v54 = vadd.f32 %v1184_v28, %v3899_v20  ;;  %v1186_v18 = vpop.f32.mrb[41].mxu0  ;;  %v1237_v36 = vadd.f32 %v1236_v63, %v1204_v17  ;;  %v1314_v57 = vmul.f32 %v3949_v37, %v1282_v15 }
 0x48b   :  { %v1115_v60 = vpop.f32.mrb[42].mxu1  ;;  %v1188_v5 = vpop.f32.mrb[42].mxu0  ;;  %v1284_v56 = vmul.f32 %v4074_v30, %v4074_v30  ;;  %v1304_v19 = vmul.f32 %v4000_v32, %v4034_v44  ;;  %v1335_v20 = vadd.f32 %v1334_v45, %v1303_v39  ;;  %v1285_v43 = vmul.f32 %v4089_v40, %v4089_v40 }
 0x48c   :  { %v1117_v29 = vpop.f32.mrb[43].mxu1  ;;  %v1190_v31 = vpop.f32.mrb[43].mxu0  ;;  %1238 = vadd.xlane.f32.xlu1 %v1237_v36  ;;  %v1308_v53 = vmul.f32 %v4000_v32, %v1276_v9  ;;  %v1340_v59 = vadd.f32 %v1339_v33, %v1307_v6  ;;  %v1240_v12 = vadd.f32 %v1206_v52, %v1205_v10  ;;  %v1286_v8 = vmul.f32 %v4099_v47, %v4099_v47 }
 0x48d   :  { %v1336_v15 = vadd.f32 %v1335_v20, %v1304_v19  ;;  %v4151_v17 = vadd.f32 %v1113_v2, %v3901_v16  ;;  %v4154_v63 = vadd.f32 %v1186_v18, %v3903_v21  ;;  %v4157_v39 = vadd.f32 %v1115_v60, %v3905_v22 }
 0x48e   :  { %v1341_v44 = vadd.f32 %v1340_v59, %v1308_v53  ;;  %v1241_v45 = vadd.f32 %v1240_v12, %v1207_v11  ;;  %v4160_v36 = vadd.f32 %v1188_v5, %v3907_v23  ;;  %v1213_v9 = vmul.f32 %v3946_v35, %v4089_v40 }
 0x48f   :  { %1337 = vadd.xlane.f32.xlu0 %v1336_v15  ;;  %v1289_v10 = vmul.f32 %v4133_v27, %v4133_v27  ;;  %v1208_v16 = vmul.f32 %v4000_v32, %v4043_v51  ;;  %v4169_v21 = vadd.f32 %v1117_v29, %v3909_v25  ;;  %v1317_v18 = vmul.f32 %v3946_v35, %v1285_v43 }
 0x490   :  { %v1215_v22 = vmul.f32 %v3971_v48, %v4096_v42  ;;  %v1287_v5 = vmul.f32 %v4096_v42, %v4096_v42  ;;  %v1214_v23 = vmul.f32 %v3949_v37, %v4099_v47  ;;  %1342 = vadd.xlane.f32.xlu1 %v1341_v44  ;;  %v1318_v60 = vmul.f32 %v3949_v37, %v1286_v8 }
 0x491   :  { %v1217_v11 = vmul.f32 %v3946_v35, %v4133_v27  ;;  %v1219_v25 = vmul.f32 %v3971_v48, %v4136_v54  ;;  %v1242_v29 = vadd.f32 %v1241_v45, %v1208_v16  ;;  %v1218_v52 = vmul.f32 %v3949_v37, %v4151_v17 }
 0x492   :  { %v1290_v28 = vmul.f32 %v4151_v17, %v4151_v17  ;;  %v4188_v2 = vadd.f32 %v1190_v31, %v3911_v26  ;;  %v1245_v6 = vadd.f32 %v1210_v4, %v1209_v62  ;;  %v1321_v33 = vmul.f32 %v3946_v35, %v1289_v10 }
 0x493   :  { %1243 = vadd.xlane.f32.xlu0 %v1242_v29  ;;  %v1221_v19 = vmul.f32 %v3946_v35, %v4157_v39  ;;  %v1311_v20 = vmul.f32 %v3971_v48, %v4093_v7  ;;  %v1344_v43 = vadd.f32 %v4113_v14, %v4084_v55  ;;  %v1293_v53 = vmul.f32 %v4157_v39, %v4157_v39 }
 0x494   :  { %v1212_v26 = vmul.f32 %v4000_v32, %v4074_v30  ;;  %v1246_v31 = vadd.f32 %v1245_v6, %v1211_v58  ;;  %v1312_v62 = vmul.f32 %v4000_v32, %v4108_v13  ;;  %v1315_v59 = vmul.f32 %v3971_v48, %v4125_v3 }
 0x495   :  { %v1345_v4 = vadd.f32 %v1344_v43, %v1311_v20  ;;  %v1349_v12 = vadd.f32 %v1314_v57, %v1313_v34  ;;  %v1250_v8 = vadd.f32 %v1214_v23, %v1213_v9  ;;  %v1322_v7 = vmul.f32 %v3949_v37, %v1290_v28 }
 0x496   :  { %v1222_v55 = vmul.f32 %v3949_v37, %v4169_v21  ;;  %v1247_v14 = vadd.f32 %v1246_v31, %v1212_v26  ;;  %v1255_v15 = vadd.f32 %v1218_v52, %v1217_v11  ;;  %v1294_v44 = vmul.f32 %v4169_v21, %v4169_v21 }
 0x497   :  { %v1346_v58 = vadd.f32 %v1345_v4, %v1312_v62  ;;  %v1350_v45 = vadd.f32 %v1349_v12, %v1315_v59  ;;  %v1251_v10 = vadd.f32 %v1250_v8, %v1215_v22  ;;  %v1291_v13 = vmul.f32 %v4136_v54, %v4136_v54 }
 0x498   :  { %1248 = vadd.xlane.f32.xlu1 %v1247_v14  ;;  %v1316_v34 = vmul.f32 %v4000_v32, %v1284_v56  ;;  %v1256_v3 = vadd.f32 %v1255_v15, %v1219_v25  ;;  %v1354_v57 = vadd.f32 %v1318_v60, %v1317_v18  ;;  %v1288_v9 = vmul.f32 %v4102_v61, %v4102_v61 }
 0x499   :  { %1347 = vadd.xlane.f32.xlu0 %v1346_v58  ;;  %v1216_v16 = vmul.f32 %v4000_v32, %v4102_v61  ;;  %v1319_v23 = vmul.f32 %v3971_v48, %v1287_v5  ;;  %v1325_v11 = vmul.f32 %v3946_v35, %v1293_v53  ;;  %v1220_v29 = vmul.f32 %v4000_v32, %v4154_v63 }
 0x49a   :  { %v1351_v22 = vadd.f32 %v1350_v45, %v1316_v34  ;;  %v1359_v52 = vadd.f32 %v1322_v7, %v1321_v33  ;;  %v1326_v56 = vmul.f32 %v3949_v37, %v1294_v44  ;;  %v1260_v60 = vadd.f32 %v1222_v55, %v1221_v19 }
 0x49b   :  { %v1252_v25 = vadd.f32 %v1251_v10, %v1216_v16  ;;  %v1355_v18 = vadd.f32 %v1354_v57, %v1319_v23  ;;  %v1292_v28 = vmul.f32 %v4154_v63, %v4154_v63  ;;  %v1257_v6 = vadd.f32 %v1256_v3, %v1220_v29 }
 0x49c   :  { %1352 = vadd.xlane.f32.xlu1 %v1351_v22  ;;  %v1323_v20 = vmul.f32 %v3971_v48, %v1291_v13  ;;  %v1223_v5 = vmul.f32 %v3971_v48, %v4160_v36  ;;  %v1295_v43 = vmul.f32 %v4160_v36, %v4160_v36  ;;  %v1320_v33 = vmul.f32 %v4000_v32, %v1288_v9 }
 0x49d   :  { %1253 = vadd.xlane.f32.xlu0 %v1252_v25  ;;  %v1364_v19 = vadd.f32 %v1326_v56, %v1325_v11  ;;  %v1324_v62 = vmul.f32 %v4000_v32, %v1292_v28  ;;  %v1296_v4 = vmul.f32 %v4188_v2, %v4188_v2  ;;  %v1224_v59 = vmul.f32 %v4000_v32, %v4188_v2 }
 0x49e   :  { %v1360_v53 = vadd.f32 %v1359_v52, %v1323_v20  ;;  %v1356_v26 = vadd.f32 %v1355_v18, %v1320_v33  ;;  %v1261_v31 = vadd.f32 %v1260_v60, %v1223_v5  ;;  %v1327_v12 = vmul.f32 %v3971_v48, %v1295_v43 }
 0x49f   :  { %v1328_v14 = vmul.f32 %v4000_v32, %v1296_v4 }
 0x4a0   :  { %1258 = vadd.xlane.f32.xlu1 %v1257_v6  ;;  %v1361_v8 = vadd.f32 %v1360_v53, %v1324_v62  ;;  %v1262_v7 = vadd.f32 %v1261_v31, %v1224_v59  ;;  %v1365_v55 = vadd.f32 %v1364_v19, %v1327_v12  ;;  %v1409_v53 = vld [vmem:[%s5170_s9] sm:$0xff] }
 0x4a1   :  { %1357 = vadd.xlane.f32.xlu0 %v1356_v26 }
 0x4a2   :  { %v1366_v15 = vadd.f32 %v1365_v55, %v1328_v14 }
 0x4a4   :  { %1362 = vadd.xlane.f32.xlu1 %v1361_v8 }
 0x4a5   :  { %1263 = vadd.xlane.f32.xlu0 %v1262_v7  ;;  %v1441_v7 = vld [vmem:[%s5171_s10] sm:$0xff] }
 0x4a9   :  { %1367 = vadd.xlane.f32.xlu0 %v1366_v15 }
 0x50a   :  { %v1229_v44 = vpop.xlane.xlu0 %1228 }
 0x50b   :  { %v1369_v58 = vmul.f32 0.015625, %v1229_v44 }
 0x50d   :  { %v1385_v10 = vmul.f32 %v1369_v58, %v1369_v58 }
 0x50f   :  { %v1234_v34 = vpop.xlane.xlu1 %1233 }
 0x510   :  { %v4237_v9 = vmul.f32 0.015625, %v1234_v34 }
 0x512   :  { %v1386_v29 = vmul.f32 %v4237_v9, %v4237_v9 }
 0x513   :  { %v1333_v45 = vpop.xlane.xlu0 %1332 }
 0x514   :  { %v1377_v13 = vmul.f32 0.015625, %v1333_v45 }
 0x516   :  { %v1393_v3 = vsub.f32 %v1377_v13, %v1385_v10 }
 0x518   :  { %v1401_v57 = vmax.f32 %v1393_v3, 0.0 }
 0x519   :  { %v1239_v16 = vpop.xlane.xlu1 %1238 }
 0x51a   :  { %v1417_v23 = vadd.f32 1e-05, %v1401_v57  ;;  %v4239_v11 = vmul.f32 0.015625, %v1239_v16 }
 0x51c   :  { %3437 = vrsqrt.f32 %v1417_v23  ;;  %v1338_v22 = vpop.xlane.xlu0 %1337  ;;  %v1387_v25 = vmul.f32 %v4239_v11, %v4239_v11 }
 0x51d   :  { %v1378_v52 = vmul.f32 0.015625, %v1338_v22  ;;  %v1343_v56 = vpop.xlane.xlu1 %1342  ;;  %v1410_v22 = vld [vmem:[%s5170_s9 + $0x8] sm:$0xff] }
 0x51e   :  { %v1379_v18 = vmul.f32 0.015625, %v1343_v56 }
 0x51f   :  { %v1394_v60 = vsub.f32 %v1378_v52, %v1386_v29 }
 0x520   :  { %v1395_v28 = vsub.f32 %v1379_v18, %v1387_v25  ;;  %v1244_v6 = vpop.xlane.xlu0 %1243 }
 0x521   :  { %v1402_v20 = vmax.f32 %v1394_v60, 0.0  ;;  %v4245_v33 = vmul.f32 0.015625, %v1244_v6 }
 0x522   :  { %v1403_v43 = vmax.f32 %v1395_v28, 0.0 }
 0x523   :  { %v1418_v5 = vadd.f32 1e-05, %v1402_v20  ;;  %v1388_v59 = vmul.f32 %v4245_v33, %v4245_v33 }
 0x524   :  { %v1419_v4 = vadd.f32 1e-05, %v1403_v43 }
 0x525   :  { %3439 = vrsqrt.f32 %v1418_v5  ;;  %v1249_v26 = vpop.xlane.xlu1 %1248  ;;  %v1442_v5 = vld [vmem:[%s5171_s10 + $0x8] sm:$0xff] }
 0x526   :  { %v3438_v31 = vpop.eup %3437  ;;  %v4250_v19 = vmul.f32 0.015625, %v1249_v26  ;;  %v1348_v62 = vpop.xlane.xlu0 %1347  ;;  %3441 = vrsqrt.f32 %v1419_v4 }
 0x527   :  { %v1380_v12 = vmul.f32 0.015625, %v1348_v62  ;;  %v1433_v8 = vmul.f32 %v3438_v31, %v1409_v53 }
 0x528   :  { %v1389_v44 = vmul.f32 %v4250_v19, %v4250_v19 }
 0x529   :  { %v1396_v55 = vsub.f32 %v1380_v12, %v1388_v59  ;;  %v1353_v14 = vpop.xlane.xlu1 %1352  ;;  %1467 = vperm.xlu1 %3417, %v1433_v8   ;;  %v1449_v15 = vmul.f32 %v1433_v8, %v1369_v58 }
 0x52a   :  { %v1381_v45 = vmul.f32 0.015625, %v1353_v14  ;;  %v1254_v10 = vpop.xlane.xlu0 %1253 }
 0x52b   :  { %v1404_v13 = vmax.f32 %v1396_v55, 0.0  ;;  %v4259_v34 = vmul.f32 0.015625, %v1254_v10  ;;  %v1457_v3 = vsub.f32 %v1441_v7, %v1449_v15  ;;  %v1411_v7 = vld [vmem:[%s5170_s9 + $0x10] sm:$0xff] }
 0x52c   :  { %v1397_v57 = vsub.f32 %v1381_v45, %v1389_v44 }
 0x52d   :  { %v1420_v16 = vadd.f32 1e-05, %v1404_v13  ;;  %v1259_v23 = vpop.xlane.xlu1 %1258  ;;  %1539 = vperm.xlu1 %3417, %v1457_v3   ;;  %v1390_v25 = vmul.f32 %v4259_v34, %v4259_v34 }
 0x52e   :  { %v1405_v29 = vmax.f32 %v1397_v57, 0.0  ;;  %v4264_v58 = vmul.f32 0.015625, %v1259_v23  ;;  %v1358_v52 = vpop.xlane.xlu0 %1357 }
 0x52f   :  { %v3440_v56 = vpop.eup %3439  ;;  %3443 = vrsqrt.f32 %v1420_v16  ;;  %v1382_v18 = vmul.f32 0.015625, %v1358_v52  ;;  %v1413_v16 = vld [vmem:[%s5170_s9 + $0x20] sm:$0xff] }
 0x530   :  { %v1421_v60 = vadd.f32 1e-05, %v1405_v29  ;;  %v1434_v28 = vmul.f32 %v3440_v56, %v1410_v22  ;;  %v1391_v43 = vmul.f32 %v4264_v58, %v4264_v58  ;;  %v3442_v8 = vpop.eup %3441 }
 0x531   :  { %v1398_v6 = vsub.f32 %v1382_v18, %v1390_v25  ;;  %v1363_v20 = vpop.xlane.xlu1 %1362  ;;  %v1435_v13 = vmul.f32 %v3442_v8, %v1411_v7  ;;  %v1443_v25 = vld [vmem:[%s5171_s10 + $0x10] sm:$0xff]  ;;  %v1445_v18 = vld [vmem:[%s5171_s10 + $0x20] sm:$0xff] }
 0x532   :  { %3445 = vrsqrt.f32 %v1421_v60  ;;  %v1383_v53 = vmul.f32 0.015625, %v1363_v20  ;;  %v1264_v26 = vpop.xlane.xlu0 %1263  ;;  %1472 = vperm.xlu0 %3418, %v1434_v28   ;;  %v1450_v31 = vmul.f32 %v1434_v28, %v4237_v9  ;;  %v1412_v9 = vld [vmem:[%s5170_s9 + $0x18] sm:$0xff] }
 0x533   :  { %v1406_v62 = vmax.f32 %v1398_v6, 0.0  ;;  %v1376_v4 = vmul.f32 0.015625, %v1264_v26  ;;  %v1451_v52 = vmul.f32 %v1435_v13, %v4239_v11  ;;  %v1444_v11 = vld [vmem:[%s5171_s10 + $0x18] sm:$0xff] }
 0x534   :  { %v1399_v59 = vsub.f32 %v1383_v53, %v1391_v43  ;;  %v1458_v12 = vsub.f32 %v1442_v5, %v1450_v31  ;;  %v1415_v43 = vld [vmem:[%s5170_s9 + $0x30] sm:$0xff] }
 0x535   :  { %v1422_v15 = vadd.f32 1e-05, %v1406_v62  ;;  %v1392_v44 = vmul.f32 %v1376_v4, %v1376_v4  ;;  %v1459_v6 = vsub.f32 %v1443_v25, %v1451_v52 }
 0x536   :  { %v1407_v55 = vmax.f32 %v1399_v59, 0.0  ;;  %v1368_v14 = vpop.xlane.xlu0 %1367  ;;  %1544 = vperm.xlu1 %3417, %v1458_v12  }
 0x537   :  { %v1384_v45 = vmul.f32 0.015625, %v1368_v14  ;;  %v1446_v14 = vld [vmem:[%s5171_s10 + $0x28] sm:$0xff] }
 0x538   :  { %v1423_v10 = vadd.f32 1e-05, %v1407_v55 }
 0x539   :  { %v3444_v3 = vpop.eup %3443  ;;  %v1400_v57 = vsub.f32 %v1384_v45, %v1392_v44 }
 0x53a   :  { %3447 = vrsqrt.f32 %v1423_v10  ;;  %1477 = vperm.xlu1 %3417, %v1435_v13   ;;  %v1436_v29 = vmul.f32 %v3444_v3, %v1412_v9  ;;  %v1448_v10 = vld [vmem:[%s5171_s10 + $0x38] sm:$0xff] }
 0x53b   :  { %3449 = vrsqrt.f32 %v1422_v15  ;;  %v1408_v23 = vmax.f32 %v1400_v57, 0.0  ;;  %v1416_v15 = vld [vmem:[%s5170_s9 + $0x38] sm:$0xff] }
 0x53c   :  { %v3446_v22 = vpop.eup %3445  ;;  %v1452_v20 = vmul.f32 %v1436_v29, %v4245_v33  ;;  %v1414_v33 = vld [vmem:[%s5170_s9 + $0x28] sm:$0xff] }
 0x53d   :  { %v1437_v56 = vmul.f32 %v3446_v22, %v1413_v16  ;;  %v1424_v60 = vadd.f32 1e-05, %v1408_v23 }
 0x53e   :  { %1482 = vperm.xlu1 %3417, %v1436_v29   ;;  %v1460_v26 = vsub.f32 %v1444_v11, %v1452_v20 }
 0x53f   :  { %v1453_v28 = vmul.f32 %v1437_v56, %v4250_v19  ;;  %3451 = vrsqrt.f32 %v1424_v60  ;;  %v1447_v19 = vld [vmem:[%s5171_s10 + $0x30] sm:$0xff] }
 0x541   :  { %v1461_v5 = vsub.f32 %v1445_v18, %v1453_v28 }
 0x542   :  { %1549 = vperm.xlu1 %3417, %v1459_v6  }
 0x543   :  { %1559 = vperm.xlu0 %3418, %v1461_v5  }
 0x544   :  { %v3448_v53 = vpop.eup %3447 }
 0x545   :  { %v3450_v31 = vpop.eup %3449  ;;  %v1439_v62 = vmul.f32 %v3448_v53, %v1415_v43 }
 0x546   :  { %1554 = vperm.xlu1 %3417, %v1460_v26   ;;  %v1438_v12 = vmul.f32 %v3450_v31, %v1414_v33 }
 0x547   :  { %1497 = vperm.xlu0 %3418, %v1439_v62   ;;  %v1455_v59 = vmul.f32 %v1439_v62, %v4264_v58 }
 0x548   :  { %v1454_v7 = vmul.f32 %v1438_v12, %v4259_v34 }
 0x549   :  { %v1463_v8 = vsub.f32 %v1447_v19, %v1455_v59  ;;  %v3452_v55 = vpop.eup %3451 }
 0x54a   :  { %1487 = vperm.xlu1 %3417, %v1437_v56   ;;  %v1462_v44 = vsub.f32 %v1446_v14, %v1454_v7  ;;  %v1440_v45 = vmul.f32 %v3452_v55, %v1416_v15 }
 0x54b   :  { %1569 = vperm.xlu0 %3418, %v1463_v8  }
 0x54c   :  { %v1456_v58 = vmul.f32 %v1440_v45, %v1376_v4 }
 0x54e   :  { %1492 = vperm.xlu1 %3417, %v1438_v12   ;;  %v1464_v34 = vsub.f32 %v1448_v10, %v1456_v58  ;;  %v5242_v10 = vld [vmem:[#allocation7_spill] sm:$0xff] }
 0x552   :  { %1564 = vperm.xlu1 %3417, %v1462_v44  }
 0x556   :  { %1502 = vperm.xlu1 %3417, %v1440_v45   ;;  %v5241_v45 = vld [vmem:[#allocation5_spill] sm:$0xff] }
 0x55a   :  { %1574 = vperm.xlu1 %3417, %v1464_v34  }
 0x5a8   :  { %v1468_v13 = vpop.permute.xlu1 %1467 }
 0x5a9   :  { %v1505_v57 = vmul.f32 %v1468_v13, %v3952_v38  ;;  %v1506_v9 = vmul.f32 %v1468_v13, %v3958_v24  ;;  %v1507_v16 = vmul.f32 %v1468_v13, %v3955_v1  ;;  %v1508_v23 = vmul.f32 %v1468_v13, %v3963_v41  ;;  %v5243_v13 = vld [vmem:[#allocation6_spill] sm:$0xff] }
 0x5ac   :  { %v1540_v3 = vpop.permute.xlu1 %1539 }
 0x5ad   :  { %v1577_v22 = vadd.f32 %v1540_v3, %v1505_v57  ;;  %v1578_v29 = vadd.f32 %v1540_v3, %v1506_v9  ;;  %v1579_v4 = vadd.f32 %v1540_v3, %v1507_v16  ;;  %v1580_v52 = vadd.f32 %v1540_v3, %v1508_v23  ;;  %v5244_v57 = vld [vmem:[#allocation8_spill] sm:$0xff] }
 0x5af   :  { %v1641_v25 = vmul.f32 0.1, %v1577_v22  ;;  %v1643_v6 = vmul.f32 0.1, %v1579_v4  ;;  %v1642_v20 = vmul.f32 0.1, %v1578_v29 }
 0x5b0   :  { %v1644_v1 = vmul.f32 0.1, %v1580_v52  ;;  %vm1609_vm13 = vcmp.gt.f32.partialorder %v1577_v22, 0.0  ;;  %vm1611_vm14 = vcmp.gt.f32.partialorder %v1579_v4, 0.0  ;;  %vm1610_vm15 = vcmp.gt.f32.partialorder %v1578_v29, 0.0 }
 0x5b1   :  { %v1473_v56 = vpop.permute.xlu0 %1472  ;;  %vm1612_vm1 = vcmp.gt.f32.partialorder %v1580_v52, 0.0  ;;  %v1674_v26 = vsel %vm1610_vm15, %v1578_v29, %v1642_v20  ;;  %v1673_v62 = vsel %vm1609_vm13, %v1577_v22, %v1641_v25  ;;  %v1675_v33 = vsel %vm1611_vm14, %v1579_v4, %v1643_v6 }
 0x5b2   :  { %v1509_v18 = vmul.f32 %v1473_v56, %v3966_v46  ;;  %v1510_v60 = vmul.f32 %v1473_v56, %v3979_v49  ;;  %v1511_v28 = vmul.f32 %v1473_v56, %v3976_v0  ;;  %v1512_v38 = vmul.f32 %v1473_v56, %v3982_v50  ;;  %v5245_v56 = vld [vmem:[#allocation9_spill] sm:$0xff] }
 0x5b3   :  { %v1676_v31 = vsel %vm1612_vm1, %v1580_v52, %v1644_v1 }
 0x5b5   :  { %v1545_v24 = vpop.permute.xlu1 %1544 }
 0x5b6   :  { %v1581_v5 = vadd.f32 %v1545_v24, %v1509_v18  ;;  %v1582_v41 = vadd.f32 %v1545_v24, %v1510_v60  ;;  %v1583_v11 = vadd.f32 %v1545_v24, %v1511_v28  ;;  %v1584_v43 = vadd.f32 %v1545_v24, %v1512_v38  ;;  %v5246_v18 = vld [vmem:[#allocation11_spill] sm:$0xff]  ;;  %v5247_v28 = vld [vmem:[#allocation10_spill] sm:$0xff] }
 0x5b8   :  { %vm1613_vm3 = vcmp.gt.f32.partialorder %v1581_v5, 0.0  ;;  %vm1615_vm4 = vcmp.gt.f32.partialorder %v1583_v11, 0.0  ;;  %v1645_v46 = vmul.f32 0.1, %v1581_v5  ;;  %v1647_v49 = vmul.f32 0.1, %v1583_v11 }
 0x5b9   :  { %v1478_v53 = vpop.permute.xlu1 %1477  ;;  %vm1614_vm5 = vcmp.gt.f32.partialorder %v1582_v41, 0.0  ;;  %v1646_v0 = vmul.f32 0.1, %v1582_v41  ;;  %vm1616_vm6 = vcmp.gt.f32.partialorder %v1584_v43, 0.0  ;;  %v1648_v50 = vmul.f32 0.1, %v1584_v43 }
 0x5ba   :  { %v1677_v12 = vsel %vm1613_vm3, %v1581_v5, %v1645_v46  ;;  %v1679_v8 = vsel %vm1615_vm4, %v1583_v11, %v1647_v49  ;;  %v1513_v58 = vmul.f32 %v1478_v53, %v5241_v45  ;;  %v1514_v34 = vmul.f32 %v1478_v53, %v5242_v10 }
 0x5bb   :  { %v1678_v19 = vsel %vm1614_vm5, %v1582_v41, %v1646_v0  ;;  %v1680_v59 = vsel %vm1616_vm6, %v1584_v43, %v1648_v50  ;;  %v1713_v14 = vpack.c.bf16 %v1677_v12, %v1673_v62  ;;  %v1715_v15 = vpack.c.bf16 %v1679_v8, %v1675_v33  ;;  %v5249_v8 = vld [vmem:[#allocation14_spill] sm:$0xff] }
 0x5bc   :  { %v1714_v7 = vpack.c.bf16 %v1678_v19, %v1674_v26  ;;  %v1716_v55 = vpack.c.bf16 %v1680_v59, %v1676_v31  ;;  %v1515_v3 = vmul.f32 %v1478_v53, %v5243_v13  ;;  %v1516_v9 = vmul.f32 %v1478_v53, %v5244_v57  ;;  %v5248_v59 = vld [vmem:[#allocation12_spill] sm:$0xff] }
 0x5bd   :  { %v1483_v44 = vpop.permute.xlu1 %1482 }
 0x5be   :  { %1762 = vmatprep.subr.bf16.mxu1 %v1714_v7  ;;  %1835 = vmatprep.subr.bf16.mxu0 %v1716_v55  ;;  %v1517_v25 = vmul.f32 %v1483_v44, %v5245_v56  ;;  %v1518_v60 = vmul.f32 %v1483_v44, %v5246_v18  ;;  %v1519_v38 = vmul.f32 %v1483_v44, %v5247_v28  ;;  %v5250_v55 = vld [vmem:[#allocation13_spill] sm:$0xff] }
 0x5bf   :  { %1763 = vmatpush1.bf16.msra.mxu1 %v1713_v14  ;;  %1836 = vmatpush1.bf16.msra.mxu0 %v1715_v15  ;;  %v1520_v6 = vmul.f32 %v1483_v44, %v4043_v51 }
 0x5c1   :  { %v1550_v16 = vpop.permute.xlu1 %1549 }
 0x5c2   :  { %v4327_v23 = vadd.f32 %v1550_v16, %v1513_v58  ;;  %v1586_v22 = vadd.f32 %v1550_v16, %v1514_v34  ;;  %v4329_v29 = vadd.f32 %v1550_v16, %v1515_v3  ;;  %v1588_v4 = vadd.f32 %v1550_v16, %v1516_v9  ;;  %v1560_v52 = vpop.permute.xlu0 %1559 }
 0x5c4   :  { %v1649_v24 = vmul.f32 0.1, %v4327_v23  ;;  %vm1617_vm7 = vcmp.gt.f32.partialorder %v4327_v23, 0.0  ;;  %v1651_v20 = vmul.f32 0.1, %v4329_v29  ;;  %vm1618_vm8 = vcmp.gt.f32.partialorder %v1586_v22, 0.0 }
 0x5c5   :  { %v1555_v1 = vpop.permute.xlu1 %1554  ;;  %v1650_v5 = vmul.f32 0.1, %v1586_v22  ;;  %vm1619_vm9 = vcmp.gt.f32.partialorder %v4329_v29, 0.0  ;;  %vm1620_vm10 = vcmp.gt.f32.partialorder %v1588_v4, 0.0  ;;  %v1652_v0 = vmul.f32 0.1, %v1588_v4 }
 0x5c6   :  { %v1589_v41 = vadd.f32 %v1555_v1, %v1517_v25  ;;  %v1590_v11 = vadd.f32 %v1555_v1, %v1518_v60  ;;  %v1591_v43 = vadd.f32 %v1555_v1, %v1519_v38  ;;  %v1498_v46 = vpop.permute.xlu0 %1497  ;;  %v1592_v49 = vadd.f32 %v1555_v1, %v1520_v6 }
 0x5c7   :  { %v1529_v53 = vmul.f32 %v1498_v46, %v4133_v27  ;;  %v1530_v51 = vmul.f32 %v1498_v46, %v4151_v17  ;;  %v1531_v26 = vmul.f32 %v1498_v46, %v4136_v54  ;;  %v1532_v31 = vmul.f32 %v1498_v46, %v4154_v63 }
 0x5c8   :  { %vm1621_vm0 = vcmp.gt.f32.partialorder %v1589_v41, 0.0  ;;  %v1653_v50 = vmul.f32 0.1, %v1589_v41  ;;  %vm1623_vm11 = vcmp.gt.f32.partialorder %v1591_v43, 0.0  ;;  %v1655_v62 = vmul.f32 0.1, %v1591_v43 }
 0x5c9   :  { %v1488_v33 = vpop.permute.xlu1 %1487  ;;  %vm1622_vm13 = vcmp.gt.f32.partialorder %v1590_v11, 0.0  ;;  %v1654_v19 = vmul.f32 0.1, %v1590_v11  ;;  %v1682_v54 = vsel %vm1618_vm8, %v1586_v22, %v1650_v5  ;;  %vm1624_vm14 = vcmp.gt.f32.partialorder %v1592_v49, 0.0 }
 0x5ca   :  { %v1521_v12 = vmul.f32 %v1488_v33, %v5248_v59  ;;  %v1522_v7 = vmul.f32 %v1488_v33, %v5249_v8  ;;  %v1523_v27 = vmul.f32 %v1488_v33, %v5250_v55  ;;  %v1524_v17 = vmul.f32 %v1488_v33, %v4074_v30  ;;  %v1570_v14 = vpop.permute.xlu0 %1569 }
 0x5cb   :  { %v4347_v15 = vadd.f32 %v1570_v14, %v1529_v53  ;;  %v4349_v44 = vadd.f32 %v1570_v14, %v1531_v26  ;;  %v4356_v58 = vadd.f32 %v1570_v14, %v1530_v51  ;;  %v4358_v10 = vadd.f32 %v1570_v14, %v1532_v31 }
 0x5cc   :  { %v4352_v63 = vadd.f32 %v1560_v52, %v1521_v12  ;;  %v4354_v45 = vadd.f32 %v1560_v52, %v1523_v27  ;;  %v1594_v34 = vadd.f32 %v1560_v52, %v1522_v7  ;;  %v1596_v13 = vadd.f32 %v1560_v52, %v1524_v17 }
 0x5cd   :  { %v4361_v30 = vmul.f32 0.1, %v4347_v15  ;;  %v4364_v3 = vmul.f32 0.1, %v4349_v44  ;;  %v1493_v57 = vpop.permute.xlu1 %1492  ;;  %v1686_v52 = vsel %vm1622_vm13, %v1590_v11, %v1654_v19  ;;  %v1656_v60 = vmul.f32 0.1, %v1592_v49 }
 0x5ce   :  { %v1657_v9 = vmul.f32 0.1, %v4352_v63  ;;  %v1659_v16 = vmul.f32 0.1, %v4354_v45  ;;  %v1525_v22 = vmul.f32 %v1493_v57, %v4089_v40  ;;  %v1526_v56 = vmul.f32 %v1493_v57, %v4099_v47 }
 0x5cf   :  { %v1527_v25 = vmul.f32 %v1493_v57, %v4096_v42  ;;  %v1528_v18 = vmul.f32 %v1493_v57, %v4102_v61  ;;  %v1718_v28 = vpack.c.bf16 %v1686_v52, %v1682_v54  ;;  %v1684_v38 = vsel %vm1620_vm10, %v1588_v4, %v1652_v0 }
 0x5d0   :  { %v1681_v6 = vsel %vm1617_vm7, %v4327_v23, %v1649_v24  ;;  %v1685_v1 = vsel %vm1621_vm0, %v1589_v41, %v1653_v50  ;;  %v1688_v40 = vsel %vm1624_vm14, %v1592_v49, %v1656_v60  ;;  %v1683_v42 = vsel %vm1619_vm9, %v4329_v29, %v1651_v20 }
 0x5d1   :  { %v1717_v5 = vpack.c.bf16 %v1685_v1, %v1681_v6  ;;  %v1687_v47 = vsel %vm1623_vm11, %v1591_v43, %v1655_v62  ;;  %v1565_v61 = vpop.permute.xlu1 %1564  ;;  %1764 = vmatprep.subr.bf16.mxu1 %v1718_v28  ;;  %v1720_v11 = vpack.c.bf16 %v1688_v40, %v1684_v38  ;;  %vm1626_vm15 = vcmp.gt.f32.partialorder %v1594_v34, 0.0 }
 0x5d2   :  { %v1719_v46 = vpack.c.bf16 %v1687_v47, %v1683_v42  ;;  %v1597_v4 = vadd.f32 %v1565_v61, %v1525_v22  ;;  %v1598_v53 = vadd.f32 %v1565_v61, %v1526_v56  ;;  %v1599_v51 = vadd.f32 %v1565_v61, %v1527_v25 }
 0x5d3   :  { %1765 = vmatpush1.bf16.msra.mxu1 %v1717_v5  ;;  %v1600_v23 = vadd.f32 %v1565_v61, %v1528_v18  ;;  %v1658_v24 = vmul.f32 0.1, %v1594_v34  ;;  %vm1633_vm1 = vcmp.gt.f32.partialorder %v4347_v15, 0.0  ;;  %1837 = vmatprep.subr.bf16.mxu0 %v1720_v11  ;;  %vm1628_vm6 = vcmp.gt.f32.partialorder %v1596_v13, 0.0 }
 0x5d4   :  { %vm1629_vm3 = vcmp.gt.f32.partialorder %v1597_v4, 0.0  ;;  %v1661_v41 = vmul.f32 0.1, %v1597_v4  ;;  %vm1630_vm4 = vcmp.gt.f32.partialorder %v1598_v53, 0.0  ;;  %v1662_v29 = vmul.f32 0.1, %v1598_v53  ;;  %1838 = vmatpush1.bf16.msra.mxu0 %v1719_v46 }
 0x5d5   :  { %vm1631_vm5 = vcmp.gt.f32.partialorder %v1599_v51, 0.0  ;;  %v1663_v20 = vmul.f32 0.1, %v1599_v51  ;;  %v1503_v43 = vpop.permute.xlu1 %1502  ;;  %v1690_v49 = vsel %vm1626_vm15, %v1594_v34, %v1658_v24  ;;  %vm1635_vm7 = vcmp.gt.f32.partialorder %v4349_v44, 0.0 }
 0x5d6   :  { %v1533_v0 = vmul.f32 %v1503_v43, %v4157_v39  ;;  %v1534_v50 = vmul.f32 %v1503_v43, %v4169_v21  ;;  %v1535_v26 = vmul.f32 %v1503_v43, %v4160_v36  ;;  %v1536_v31 = vmul.f32 %v1503_v43, %v4188_v2 }
 0x5d7   :  { %v1694_v62 = vsel %vm1630_vm4, %v1598_v53, %v1662_v29  ;;  %vm1632_vm8 = vcmp.gt.f32.partialorder %v1600_v23, 0.0  ;;  %v1660_v33 = vmul.f32 0.1, %v1596_v13  ;;  %v1664_v19 = vmul.f32 0.1, %v1600_v23 }
 0x5d8   :  { %v1722_v59 = vpack.c.bf16 %v1694_v62, %v1690_v49  ;;  %vm1625_vm9 = vcmp.gt.f32.partialorder %v4352_v63, 0.0  ;;  %v1693_v12 = vsel %vm1629_vm3, %v1597_v4, %v1661_v41  ;;  %vm1627_vm10 = vcmp.gt.f32.partialorder %v4354_v45, 0.0 }
 0x5d9   :  { %v1575_v8 = vpop.permute.xlu1 %1574  ;;  %v1692_v7 = vsel %vm1628_vm6, %v1596_v13, %v1660_v33  ;;  %v1696_v39 = vsel %vm1632_vm8, %v1600_v23, %v1664_v19  ;;  %v1689_v21 = vsel %vm1625_vm9, %v4352_v63, %v1657_v9  ;;  %v1691_v36 = vsel %vm1627_vm10, %v4354_v45, %v1659_v16 }
 0x5da   :  { %v1605_v55 = vadd.f32 %v1575_v8, %v1533_v0  ;;  %v1606_v2 = vadd.f32 %v1575_v8, %v1534_v50  ;;  %v1607_v27 = vadd.f32 %v1575_v8, %v1535_v26  ;;  %v1608_v17 = vadd.f32 %v1575_v8, %v1536_v31  ;;  %1766 = vmatprep.subr.bf16.mxu1 %v1722_v59 }
 0x5db   :  { %v1724_v14 = vpack.c.bf16 %v1696_v39, %v1692_v7  ;;  %v1721_v54 = vpack.c.bf16 %v1693_v12, %v1689_v21  ;;  %v1695_v34 = vsel %vm1631_vm5, %v1599_v51, %v1663_v20  ;;  %vm1634_vm0 = vcmp.gt.f32.partialorder %v4356_v58, 0.0 }
 0x5dc   :  { %vm1637_vm11 = vcmp.gt.f32.partialorder %v1605_v55, 0.0  ;;  %vm1639_vm13 = vcmp.gt.f32.partialorder %v1607_v27, 0.0  ;;  %v1669_v57 = vmul.f32 0.1, %v1605_v55  ;;  %v1671_v13 = vmul.f32 0.1, %v1607_v27 }
 0x5dd   :  { %1839 = vmatprep.subr.bf16.mxu0 %v1724_v14  ;;  %1767 = vmatpush1.bf16.msra.mxu1 %v1721_v54  ;;  %v1723_v63 = vpack.c.bf16 %v1695_v34, %v1691_v36  ;;  %vm1638_vm14 = vcmp.gt.f32.partialorder %v1606_v2, 0.0  ;;  %v1666_v45 = vmul.f32 0.1, %v4356_v58  ;;  %v1670_v9 = vmul.f32 0.1, %v1606_v2 }
 0x5de   :  { %vm1636_vm15 = vcmp.gt.f32.partialorder %v4358_v10, 0.0  ;;  %vm1640_vm3 = vcmp.gt.f32.partialorder %v1608_v17, 0.0  ;;  %v1668_v16 = vmul.f32 0.1, %v4358_v10  ;;  %v1672_v22 = vmul.f32 0.1, %v1608_v17 }
 0x5df   :  { %1840 = vmatpush1.bf16.msra.mxu0 %v1723_v63  ;;  %v1698_v56 = vsel %vm1634_vm0, %v4356_v58, %v1666_v45  ;;  %v1702_v25 = vsel %vm1638_vm14, %v1606_v2, %v1670_v9  ;;  %v1697_v18 = vsel %vm1633_vm1, %v4347_v15, %v4361_v30  ;;  %v1701_v52 = vsel %vm1637_vm11, %v1605_v55, %v1669_v57  ;;  %v3431_v15 = vld [vmem:[%s5172_s11] sm:$0xff]   ;;  %v3433_v30 = vld [vmem:[%s5172_s11 + $0x10] sm:$0xff]  }
 0x5e0   :  { %v1726_v60 = vpack.c.bf16 %v1702_v25, %v1698_v56  ;;  %v1700_v28 = vsel %vm1636_vm15, %v4358_v10, %v1668_v16  ;;  %v1704_v38 = vsel %vm1640_vm3, %v1608_v17, %v1672_v22  ;;  %v1725_v6 = vpack.c.bf16 %v1701_v52, %v1697_v18 }
 0x5e1   :  { %v1728_v1 = vpack.c.bf16 %v1704_v38, %v1700_v28  ;;  %v1699_v40 = vsel %vm1635_vm7, %v4349_v44, %v4364_v3  ;;  %v1703_v58 = vsel %vm1639_vm13, %v1607_v27, %v1671_v13  ;;  %vm1749_vm1 = vcmask 523264   ;;  %v3432_v44 = vld [vmem:[%s5172_s11 + $0x8] sm:$0xff]   ;;  %v3434_v3 = vld [vmem:[%s5172_s11 + $0x18] sm:$0xff]  }
 0x5e2   :  { %1768 = vmatprep.subr.bf16.mxu1 %v1726_v60  ;;  %v1727_v5 = vpack.c.bf16 %v1703_v58, %v1699_v40  ;;  %v5251_v10 = vmov 0  }
 0x5e3   :  { %1841 = vmatprep.subr.bf16.mxu0 %v1728_v1  ;;  %1769 = vmatpush1.bf16.msra.mxu1 %v1725_v6 }
 0x5e4   :  { %1842 = vmatpush1.bf16.msra.mxu0 %v1727_v5 }
 0x5e6   :  { %3236 = vmatmul.mubr.msk.bf16.vlgmr.msra.gmra.mrb[44].mxu1 %vm1749_vm1, %v3431_v15 }
 0x5e7   :  { %3240 = vmatmul.mubr.msk.bf16.vlgmr.msra.gmra.mrb[44].mxu0 %vm1749_vm1, %v3431_v15  ;;  %1804 = vmatprep.mubr.bf16.mxu1 %v5251_v10 }
 0x5e8   :  { %1877 = vmatprep.mubr.bf16.mxu0 %v5251_v10 }
 0x5ee   :  { %3237 = vmatmul.mubr.msk.bf16.gmra.mrb[48].mxu1 %vm1749_vm1, %v3432_v44 }
 0x5ef   :  { %3241 = vmatmul.mubr.msk.bf16.gmra.mrb[48].mxu0 %vm1749_vm1, %v3432_v44  ;;  %1814 = vmatprep.mubr.bf16.mxu1 %v5251_v10 }
 0x5f0   :  { %1887 = vmatprep.mubr.bf16.mxu0 %v5251_v10 }
 0x5f6   :  { %3238 = vmatmul.mubr.msk.bf16.gmra.mrb[52].mxu1 %vm1749_vm1, %v3433_v30 }
 0x5f7   :  { %3242 = vmatmul.mubr.msk.bf16.gmra.mrb[52].mxu0 %vm1749_vm1, %v3433_v30  ;;  %1824 = vmatprep.mubr.bf16.mxu1 %v5251_v10 }
 0x5f8   :  { %1897 = vmatprep.mubr.bf16.mxu0 %v5251_v10 }
 0x5fe   :  { %3239 = vmatmul.mubr.msk.bf16.gmra.mrb[56].mxu1 %vm1749_vm1, %v3434_v3 }
 0x5ff   :  { %3243 = vmatmul.mubr.msk.bf16.gmra.mrb[56].mxu0 %vm1749_vm1, %v3434_v3  ;;  %2488 = vmatprep.mubr.bf16.mxu1 %v5251_v10 }
 0x600   :  { %2541 = vmatprep.mubr.bf16.mxu0 %v5251_v10 }
 0x6b9   :  { %v4441_v42 = vpop.f32.mrb[44].mxu1 }
 0x6ba   :  { %v1980_v47 = vmul.f32 %v4441_v42, %v4441_v42  ;;  %v4445_v61 = vpop.f32.mrb[44].mxu0  ;;  %v4447_v11 = vpop.f32.mrb[45].mxu1  ;;  %v1908_v46 = vmul.f32 %v3946_v35, %v4441_v42 }
 0x6bb   :  { %v1982_v4 = vmul.f32 %v4445_v61, %v4445_v61  ;;  %v1909_v53 = vmul.f32 %v3949_v37, %v4447_v11  ;;  %v1981_v51 = vmul.f32 %v4447_v11, %v4447_v11  ;;  %v4457_v23 = vpop.f32.mrb[45].mxu0  ;;  %v4459_v24 = vpop.f32.mrb[46].mxu1  ;;  %v1910_v29 = vmul.f32 %v3971_v48, %v4445_v61 }
 0x6bc   :  { %v2012_v41 = vmul.f32 %v3946_v35, %v1980_v47  ;;  %v1912_v20 = vmul.f32 %v3946_v35, %v4459_v24  ;;  %v1984_v43 = vmul.f32 %v4459_v24, %v4459_v24  ;;  %v4468_v49 = vpop.f32.mrb[46].mxu0  ;;  %v4470_v0 = vpop.f32.mrb[47].mxu1  ;;  %v1983_v26 = vmul.f32 %v4457_v23, %v4457_v23 }
 0x6bd   :  { %v2013_v50 = vmul.f32 %v3949_v37, %v1981_v51  ;;  %v1986_v31 = vmul.f32 %v4468_v49, %v4468_v49  ;;  %v1913_v62 = vmul.f32 %v3949_v37, %v4470_v0  ;;  %v4479_v33 = vpop.f32.mrb[47].mxu0  ;;  %v1985_v59 = vmul.f32 %v4470_v0, %v4470_v0 }
 0x6be   :  { %v2016_v19 = vmul.f32 %v3946_v35, %v1984_v43  ;;  %v1987_v12 = vmul.f32 %v4479_v33, %v4479_v33  ;;  %v1914_v8 = vmul.f32 %v3971_v48, %v4468_v49  ;;  %v1940_v7 = vadd.f32 %v1909_v53, %v1908_v46 }
 0x6bf   :  { %v1945_v39 = vadd.f32 %v1913_v62, %v1912_v20  ;;  %v2014_v21 = vmul.f32 %v3971_v48, %v1982_v4  ;;  %v2017_v36 = vmul.f32 %v3949_v37, %v1985_v59  ;;  %v1911_v55 = vmul.f32 %v4000_v32, %v4457_v23 }
 0x6c0   :  { %v1915_v2 = vmul.f32 %v4000_v32, %v4479_v33  ;;  %v2044_v27 = vadd.f32 %v2013_v50, %v2012_v41  ;;  %v1941_v14 = vadd.f32 %v1940_v7, %v1910_v29  ;;  %v2015_v34 = vmul.f32 %v4000_v32, %v1983_v26 }
 0x6c1   :  { %v4494_v17 = vpop.f32.mrb[48].mxu1  ;;  %v1946_v54 = vadd.f32 %v1945_v39, %v1914_v8  ;;  %v2018_v57 = vmul.f32 %v3971_v48, %v1986_v31  ;;  %v2019_v16 = vmul.f32 %v4000_v32, %v1987_v12  ;;  %v2049_v22 = vadd.f32 %v2017_v36, %v2016_v19 }
 0x6c2   :  { %v1988_v13 = vmul.f32 %v4494_v17, %v4494_v17  ;;  %v4500_v63 = vpop.f32.mrb[49].mxu1  ;;  %v4502_v45 = vpop.f32.mrb[48].mxu0  ;;  %v2045_v9 = vadd.f32 %v2044_v27, %v2014_v21  ;;  %v1916_v56 = vmul.f32 %v3946_v35, %v4494_v17  ;;  %v1942_v6 = vadd.f32 %v1941_v14, %v1911_v55 }
 0x6c3   :  { %v1917_v25 = vmul.f32 %v3949_v37, %v4500_v63  ;;  %v1989_v18 = vmul.f32 %v4500_v63, %v4500_v63  ;;  %v1990_v52 = vmul.f32 %v4502_v45, %v4502_v45  ;;  %v4513_v60 = vpop.f32.mrb[50].mxu1  ;;  %v4515_v28 = vpop.f32.mrb[49].mxu0  ;;  %v1918_v46 = vmul.f32 %v3971_v48, %v4502_v45 }
 0x6c4   :  { %v2020_v38 = vmul.f32 %v3946_v35, %v1988_v13  ;;  %v1920_v1 = vmul.f32 %v3946_v35, %v4513_v60  ;;  %v1992_v40 = vmul.f32 %v4513_v60, %v4513_v60  ;;  %v4522_v58 = vpop.f32.mrb[51].mxu1  ;;  %v4524_v5 = vpop.f32.mrb[50].mxu0  ;;  %v1991_v3 = vmul.f32 %v4515_v28, %v4515_v28  ;;  %1943 = vadd.xlane.f32.xlu0 %v1942_v6 }
 0x6c5   :  { %v2021_v15 = vmul.f32 %v3949_v37, %v1989_v18  ;;  %v1921_v44 = vmul.f32 %v3949_v37, %v4522_v58  ;;  %v1993_v30 = vmul.f32 %v4522_v58, %v4522_v58  ;;  %v4533_v47 = vpop.f32.mrb[51].mxu0  ;;  %v1922_v53 = vmul.f32 %v3971_v48, %v4524_v5 }
 0x6c6   :  { %v2024_v4 = vmul.f32 %v3946_v35, %v1992_v40  ;;  %v1947_v51 = vadd.f32 %v1946_v54, %v1915_v2  ;;  %v1994_v29 = vmul.f32 %v4524_v5, %v4524_v5  ;;  %v2046_v20 = vadd.f32 %v2045_v9, %v2015_v34 }
 0x6c7   :  { %v2025_v41 = vmul.f32 %v3949_v37, %v1993_v30  ;;  %v2050_v43 = vadd.f32 %v2049_v22, %v2018_v57  ;;  %v1995_v50 = vmul.f32 %v4533_v47, %v4533_v47  ;;  %v1919_v26 = vmul.f32 %v4000_v32, %v4515_v28 }
 0x6c8   :  { %1948 = vadd.xlane.f32.xlu1 %v1947_v51  ;;  %v1950_v31 = vadd.f32 %v1917_v25, %v1916_v56  ;;  %v2022_v62 = vmul.f32 %v3971_v48, %v1990_v52  ;;  %v2023_v12 = vmul.f32 %v4000_v32, %v1991_v3  ;;  %v2054_v8 = vadd.f32 %v2021_v15, %v2020_v38 }
 0x6c9   :  { %v4548_v19 = vpop.f32.mrb[52].mxu1  ;;  %v2051_v59 = vadd.f32 %v2050_v43, %v2019_v16  ;;  %v1955_v7 = vadd.f32 %v1921_v44, %v1920_v1  ;;  %2047 = vadd.xlane.f32.xlu0 %v2046_v20  ;;  %v1923_v27 = vmul.f32 %v4000_v32, %v4533_v47  ;;  %v2026_v9 = vmul.f32 %v3971_v48, %v1994_v29 }
 0x6ca   :  { %v1924_v39 = vmul.f32 %v3946_v35, %v4548_v19  ;;  %v1996_v21 = vmul.f32 %v4548_v19, %v4548_v19  ;;  %v4555_v36 = vpop.f32.mrb[53].mxu1  ;;  %v4557_v55 = vpop.f32.mrb[52].mxu0  ;;  %v1951_v2 = vadd.f32 %v1950_v31, %v1918_v46  ;;  %v2055_v29 = vadd.f32 %v2054_v8, %v2022_v62 }
 0x6cb   :  { %v1925_v14 = vmul.f32 %v3949_v37, %v4555_v36  ;;  %v1997_v54 = vmul.f32 %v4555_v36, %v4555_v36  ;;  %v1926_v34 = vmul.f32 %v3971_v48, %v4557_v55  ;;  %v4567_v57 = vpop.f32.mrb[54].mxu1  ;;  %v4569_v13 = vpop.f32.mrb[53].mxu0  ;;  %v1998_v22 = vmul.f32 %v4557_v55, %v4557_v55 }
 0x6cc   :  { %v2028_v16 = vmul.f32 %v3946_v35, %v1996_v21  ;;  %v1952_v56 = vadd.f32 %v1951_v2, %v1919_v26  ;;  %v2000_v25 = vmul.f32 %v4567_v57, %v4567_v57  ;;  %v4577_v18 = vpop.f32.mrb[55].mxu1  ;;  %v4579_v52 = vpop.f32.mrb[54].mxu0  ;;  %v1928_v6 = vmul.f32 %v3946_v35, %v4567_v57 }
 0x6cd   :  { %5252 = vst [vmem:[#allocation5_spill] sm:$0xff] %v4579_v52  ;;  %v2029_v38 = vmul.f32 %v3949_v37, %v1997_v54  ;;  %v1929_v1 = vmul.f32 %v3949_v37, %v4577_v18  ;;  %v2001_v40 = vmul.f32 %v4577_v18, %v4577_v18  ;;  %v4588_v15 = vpop.f32.mrb[55].mxu0  ;;  %2052 = vadd.xlane.f32.xlu0 %v2051_v59 }
 0x6ce   :  { %1953 = vadd.xlane.f32.xlu1 %v1952_v56  ;;  %v2032_v44 = vmul.f32 %v3946_v35, %v2000_v25  ;;  %v1999_v30 = vmul.f32 %v4569_v13, %v4569_v13  ;;  %v1930_v3 = vmul.f32 %v3971_v48, %v4579_v52  ;;  %v2002_v51 = vmul.f32 %v4579_v52, %v4579_v52 }
 0x6cf   :  { %v2033_v46 = vmul.f32 %v3949_v37, %v2001_v40  ;;  %v1956_v20 = vadd.f32 %v1955_v7, %v1922_v53  ;;  %v2003_v43 = vmul.f32 %v4588_v15, %v4588_v15  ;;  %v2059_v26 = vadd.f32 %v2025_v41, %v2024_v4 }
 0x6d0   :  { %v1927_v31 = vmul.f32 %v4000_v32, %v4569_v13  ;;  %v1960_v59 = vadd.f32 %v1925_v14, %v1924_v39  ;;  %v2056_v21 = vadd.f32 %v2055_v29, %v2023_v12  ;;  %v2027_v56 = vmul.f32 %v4000_v32, %v1995_v50 }
 0x6d1   :  { %v1957_v2 = vadd.f32 %v1956_v20, %v1923_v27  ;;  %v4602_v54 = vpop.f32.mrb[56].mxu1  ;;  %v2030_v25 = vmul.f32 %v3971_v48, %v1998_v22  ;;  %v2060_v4 = vadd.f32 %v2059_v26, %v2026_v9  ;;  %v2031_v7 = vmul.f32 %v4000_v32, %v1999_v30 }
 0x6d2   :  { %5253 = vst [vmem:[#allocation7_spill] sm:$0xff] %v4602_v54  ;;  %v2004_v62 = vmul.f32 %v4602_v54, %v4602_v54  ;;  %v4608_v53 = vpop.f32.mrb[57].mxu1  ;;  %v4610_v8 = vpop.f32.mrb[56].mxu0  ;;  %v1961_v41 = vadd.f32 %v1960_v59, %v1926_v34  ;;  %2057 = vadd.xlane.f32.xlu1 %v2056_v21  ;;  %v1932_v12 = vmul.f32 %v3946_v35, %v4602_v54 }
 0x6d3   :  { %5254 = vst [vmem:[#allocation6_spill] sm:$0xff] %v4608_v53  ;;  %5255 = vst [vmem:[#allocation8_spill] sm:$0xff] %v4610_v8  ;;  %1958 = vadd.xlane.f32.xlu0 %v1957_v2  ;;  %v1933_v50 = vmul.f32 %v3949_v37, %v4608_v53  ;;  %v2005_v39 = vmul.f32 %v4608_v53, %v4608_v53  ;;  %v4619_v27 = vpop.f32.mrb[58].mxu1  ;;  %v4621_v14 = vpop.f32.mrb[57].mxu0  ;;  %v1934_v34 = vmul.f32 %v3971_v48, %v4610_v8 }
 0x6d4   :  { %5256 = vst [vmem:[#allocation9_spill] sm:$0xff] %v4619_v27  ;;  %v2036_v9 = vmul.f32 %v3946_v35, %v2004_v62  ;;  %v2061_v22 = vadd.f32 %v2060_v4, %v2027_v56  ;;  %v1962_v40 = vadd.f32 %v1961_v41, %v1927_v31  ;;  %v4626_v30 = vpop.f32.mrb[59].mxu1  ;;  %v4628_v29 = vpop.f32.mrb[58].mxu0  ;;  %v2006_v26 = vmul.f32 %v4610_v8, %v4610_v8 }
 0x6d5   :  { %5257 = vst [vmem:[#allocation11_spill] sm:$0xff] %v4626_v30  ;;  %5258 = vst [vmem:[#allocation10_spill] sm:$0xff] %v4628_v29  ;;  %v2037_v20 = vmul.f32 %v3949_v37, %v2005_v39  ;;  %v1936_v59 = vmul.f32 %v3946_v35, %v4619_v27  ;;  %v2008_v21 = vmul.f32 %v4619_v27, %v4619_v27  ;;  %v4637_v2 = vpop.f32.mrb[59].mxu0 }
 0x6d6   :  { %v1937_v31 = vmul.f32 %v3949_v37, %v4626_v30  ;;  %v2009_v56 = vmul.f32 %v4626_v30, %v4626_v30  ;;  %v2007_v62 = vmul.f32 %v4621_v14, %v4621_v14  ;;  %v1938_v4 = vmul.f32 %v3971_v48, %v4628_v29  ;;  %1963 = vadd.xlane.f32.xlu1 %v1962_v40 }
 0x6d7   :  { %2062 = vadd.xlane.f32.xlu0 %v2061_v22  ;;  %v2040_v41 = vmul.f32 %v3946_v35, %v2008_v21  ;;  %v2010_v39 = vmul.f32 %v4628_v29, %v4628_v29  ;;  %v2064_v10 = vadd.f32 %v2029_v38, %v2028_v16  ;;  %v2011_v8 = vmul.f32 %v4637_v2, %v4637_v2 }
 0x6d8   :  { %v2041_v27 = vmul.f32 %v3949_v37, %v2009_v56  ;;  %v1965_v30 = vadd.f32 %v1929_v1, %v1928_v6  ;;  %v2034_v53 = vmul.f32 %v3971_v48, %v2002_v51  ;;  %v1931_v52 = vmul.f32 %v4000_v32, %v4588_v15 }
 0x6d9   :  { %v2065_v54 = vadd.f32 %v2064_v10, %v2030_v25  ;;  %v2035_v22 = vmul.f32 %v4000_v32, %v2003_v43  ;;  %v2069_v40 = vadd.f32 %v2033_v46, %v2032_v44  ;;  %v1935_v35 = vmul.f32 %v4000_v32, %v4621_v14 }
 0x6da   :  { %v1966_v21 = vadd.f32 %v1965_v30, %v1930_v3  ;;  %v1970_v16 = vadd.f32 %v1933_v50, %v1932_v12  ;;  %v2038_v38 = vmul.f32 %v3971_v48, %v2006_v26  ;;  %v2039_v6 = vmul.f32 %v4000_v32, %v2007_v62 }
 0x6db   :  { %v2066_v56 = vadd.f32 %v2065_v54, %v2031_v7  ;;  %v2070_v37 = vadd.f32 %v2069_v40, %v2034_v53  ;;  %v2074_v1 = vadd.f32 %v2037_v20, %v2036_v9  ;;  %v1975_v25 = vadd.f32 %v1937_v31, %v1936_v59 }
 0x6dc   :  { %v1967_v51 = vadd.f32 %v1966_v21, %v1931_v52  ;;  %v1971_v10 = vadd.f32 %v1970_v16, %v1934_v34  ;;  %v2042_v29 = vmul.f32 %v3971_v48, %v2010_v39  ;;  %v2079_v3 = vadd.f32 %v2041_v27, %v2040_v41 }
 0x6dd   :  { %2067 = vadd.xlane.f32.xlu1 %v2066_v56  ;;  %v2071_v43 = vadd.f32 %v2070_v37, %v2035_v22  ;;  %v2075_v44 = vadd.f32 %v2074_v1, %v2038_v38  ;;  %v1939_v12 = vmul.f32 %v4000_v32, %v4637_v2  ;;  %v1976_v50 = vadd.f32 %v1975_v25, %v1938_v4 }
 0x6de   :  { %1968 = vadd.xlane.f32.xlu0 %v1967_v51  ;;  %v1972_v46 = vadd.f32 %v1971_v10, %v1935_v35  ;;  %v2043_v53 = vmul.f32 %v4000_v32, %v2011_v8  ;;  %v2080_v7 = vadd.f32 %v2079_v3, %v2042_v29 }
 0x6df   :  { %v2076_v54 = vadd.f32 %v2075_v44, %v2039_v6  ;;  %v1977_v9 = vadd.f32 %v1976_v50, %v1939_v12 }
 0x6e0   :  { %v2081_v52 = vadd.f32 %v2080_v7, %v2043_v53 }
 0x6e1   :  { %1973 = vadd.xlane.f32.xlu1 %v1972_v46 }
 0x6e2   :  { %2072 = vadd.xlane.f32.xlu0 %v2071_v43 }
 0x6e5   :  { %2077 = vadd.xlane.f32.xlu1 %v2076_v54  ;;  %v2124_v54 = vld [vmem:[%s5173_s12] sm:$0xff] }
 0x6e6   :  { %1978 = vadd.xlane.f32.xlu0 %v1977_v9 }
 0x6ea   :  { %2082 = vadd.xlane.f32.xlu0 %v2081_v52 }
 0x751   :  { %v1944_v37 = vpop.xlane.xlu0 %1943 }
 0x752   :  { %v2084_v34 = vmul.f32 0.015625, %v1944_v37 }
 0x754   :  { %v2100_v35 = vmul.f32 %v2084_v34, %v2084_v34 }
 0x755   :  { %v1949_v27 = vpop.xlane.xlu1 %1948 }
 0x756   :  { %v2048_v30 = vpop.xlane.xlu0 %2047  ;;  %v2085_v20 = vmul.f32 0.015625, %v1949_v27 }
 0x757   :  { %v2092_v26 = vmul.f32 0.015625, %v2048_v30 }
 0x758   :  { %v2101_v4 = vmul.f32 %v2085_v20, %v2085_v20 }
 0x759   :  { %v2108_v59 = vsub.f32 %v2092_v26, %v2100_v35 }
 0x75a   :  { %v2053_v31 = vpop.xlane.xlu0 %2052 }
 0x75b   :  { %v1954_v62 = vpop.xlane.xlu1 %1953  ;;  %v2116_v8 = vmax.f32 %v2108_v59, 0.0  ;;  %v2093_v29 = vmul.f32 0.015625, %v2053_v31  ;;  %v2156_v59 = vld [vmem:[%s5174_s13] sm:$0xff]  ;;  %v2125_v31 = vld [vmem:[%s5173_s12 + $0x8] sm:$0xff] }
 0x75c   :  { %v4665_v41 = vmul.f32 0.015625, %v1954_v62 }
 0x75d   :  { %v2132_v39 = vadd.f32 1e-05, %v2116_v8  ;;  %v2109_v22 = vsub.f32 %v2093_v29, %v2101_v4 }
 0x75e   :  { %v2102_v38 = vmul.f32 %v4665_v41, %v4665_v41 }
 0x75f   :  { %3453 = vrsqrt.f32 %v2132_v39  ;;  %v2117_v40 = vmax.f32 %v2109_v22, 0.0  ;;  %v2058_v21 = vpop.xlane.xlu1 %2057 }
 0x760   :  { %v1959_v16 = vpop.xlane.xlu0 %1958  ;;  %v2094_v56 = vmul.f32 0.015625, %v2058_v21 }
 0x761   :  { %v4669_v6 = vmul.f32 0.015625, %v1959_v16  ;;  %v2133_v1 = vadd.f32 1e-05, %v2117_v40 }
 0x762   :  { %v2110_v51 = vsub.f32 %v2094_v56, %v2102_v38 }
 0x763   :  { %3455 = vrsqrt.f32 %v2133_v1  ;;  %v1964_v25 = vpop.xlane.xlu1 %1963  ;;  %v2103_v44 = vmul.f32 %v4669_v6, %v4669_v6  ;;  %v2157_v1 = vld [vmem:[%s5174_s13 + $0x8] sm:$0xff] }
 0x764   :  { %v2063_v10 = vpop.xlane.xlu0 %2062  ;;  %v2118_v43 = vmax.f32 %v2110_v51, 0.0  ;;  %v4673_v50 = vmul.f32 0.015625, %v1964_v25 }
 0x765   :  { %v2095_v3 = vmul.f32 0.015625, %v2063_v10  ;;  %v2126_v10 = vld [vmem:[%s5173_s12 + $0x10] sm:$0xff] }
 0x766   :  { %v2134_v46 = vadd.f32 1e-05, %v2118_v43  ;;  %v2104_v37 = vmul.f32 %v4673_v50, %v4673_v50 }
 0x767   :  { %v2111_v12 = vsub.f32 %v2095_v3, %v2103_v44 }
 0x768   :  { %3457 = vrsqrt.f32 %v2134_v46 }
 0x769   :  { %v2119_v53 = vmax.f32 %v2111_v12, 0.0  ;;  %v3454_v7 = vpop.eup %3453 }
 0x76a   :  { %v2068_v9 = vpop.xlane.xlu1 %2067  ;;  %v2148_v35 = vmul.f32 %v3454_v7, %v2124_v54 }
 0x76b   :  { %v2135_v52 = vadd.f32 1e-05, %v2119_v53  ;;  %v2096_v27 = vmul.f32 0.015625, %v2068_v9  ;;  %v1969_v30 = vpop.xlane.xlu0 %1968 }
 0x76c   :  { %v4680_v26 = vmul.f32 0.015625, %v1969_v30  ;;  %2182 = vperm.xlu1 %3417, %v2148_v35   ;;  %v2164_v4 = vmul.f32 %v2148_v35, %v2084_v34 }
 0x76d   :  { %3459 = vrsqrt.f32 %v2135_v52  ;;  %v2112_v62 = vsub.f32 %v2096_v27, %v2104_v37  ;;  %v3456_v8 = vpop.eup %3455  ;;  %v2158_v37 = vld [vmem:[%s5174_s13 + $0x10] sm:$0xff] }
 0x76e   :  { %v1974_v29 = vpop.xlane.xlu1 %1973  ;;  %v2172_v21 = vsub.f32 %v2156_v59, %v2164_v4  ;;  %v2149_v16 = vmul.f32 %v3456_v8, %v2125_v31  ;;  %v2105_v38 = vmul.f32 %v4680_v26, %v4680_v26 }
 0x76f   :  { %v2120_v39 = vmax.f32 %v2112_v62, 0.0  ;;  %v2073_v22 = vpop.xlane.xlu0 %2072  ;;  %v4688_v40 = vmul.f32 0.015625, %v1974_v29 }
 0x770   :  { %v2097_v56 = vmul.f32 0.015625, %v2073_v22  ;;  %2254 = vperm.xlu1 %3417, %v2172_v21   ;;  %2187 = vperm.xlu0 %3418, %v2149_v16   ;;  %v2165_v34 = vmul.f32 %v2149_v16, %v2085_v20  ;;  %v2127_v20 = vld [vmem:[%s5173_s12 + $0x18] sm:$0xff] }
 0x771   :  { %v2136_v51 = vadd.f32 1e-05, %v2120_v39  ;;  %v2106_v3 = vmul.f32 %v4688_v40, %v4688_v40  ;;  %v2159_v22 = vld [vmem:[%s5174_s13 + $0x18] sm:$0xff] }
 0x772   :  { %v2113_v25 = vsub.f32 %v2097_v56, %v2105_v38  ;;  %v2078_v43 = vpop.xlane.xlu1 %2077  ;;  %v3458_v44 = vpop.eup %3457  ;;  %v2173_v54 = vsub.f32 %v2157_v1, %v2165_v34 }
 0x773   :  { %3461 = vrsqrt.f32 %v2136_v51  ;;  %v2098_v46 = vmul.f32 0.015625, %v2078_v43  ;;  %v1979_v12 = vpop.xlane.xlu0 %1978  ;;  %v2150_v9 = vmul.f32 %v3458_v44, %v2126_v10  ;;  %v2160_v10 = vld [vmem:[%s5174_s13 + $0x20] sm:$0xff] }
 0x774   :  { %v2121_v53 = vmax.f32 %v2113_v25, 0.0  ;;  %v2091_v7 = vmul.f32 0.015625, %v1979_v12  ;;  %2259 = vperm.xlu1 %3417, %v2173_v54   ;;  %v2161_v12 = vld [vmem:[%s5174_s13 + $0x28] sm:$0xff] }
 0x775   :  { %v2114_v52 = vsub.f32 %v2098_v46, %v2106_v3  ;;  %2192 = vperm.xlu0 %3418, %v2150_v9   ;;  %v2166_v30 = vmul.f32 %v2150_v9, %v4665_v41  ;;  %v2128_v41 = vld [vmem:[%s5173_s12 + $0x20] sm:$0xff]  ;;  %v2130_v46 = vld [vmem:[%s5173_s12 + $0x30] sm:$0xff] }
 0x776   :  { %v2137_v27 = vadd.f32 1e-05, %v2121_v53  ;;  %v2107_v31 = vmul.f32 %v2091_v7, %v2091_v7 }
 0x777   :  { %v3460_v35 = vpop.eup %3459  ;;  %v2122_v59 = vmax.f32 %v2114_v52, 0.0  ;;  %v2083_v62 = vpop.xlane.xlu0 %2082  ;;  %v2174_v29 = vsub.f32 %v2158_v37, %v2166_v30  ;;  %v2131_v37 = vld [vmem:[%s5173_s12 + $0x38] sm:$0xff] }
 0x778   :  { %3463 = vrsqrt.f32 %v2137_v27  ;;  %v2099_v4 = vmul.f32 0.015625, %v2083_v62  ;;  %v2151_v8 = vmul.f32 %v3460_v35, %v2127_v20 }
 0x779   :  { %v2138_v39 = vadd.f32 1e-05, %v2122_v59  ;;  %2264 = vperm.xlu0 %3418, %v2174_v29  }
 0x77a   :  { %v2115_v21 = vsub.f32 %v2099_v4, %v2107_v31  ;;  %2197 = vperm.xlu1 %3417, %v2151_v8   ;;  %v2167_v16 = vmul.f32 %v2151_v8, %v4669_v6  ;;  %v2129_v6 = vld [vmem:[%s5173_s12 + $0x28] sm:$0xff] }
 0x77b   :  { %3465 = vrsqrt.f32 %v2138_v39 }
 0x77c   :  { %v2123_v38 = vmax.f32 %v2115_v21, 0.0  ;;  %v2175_v56 = vsub.f32 %v2159_v22, %v2167_v16 }
 0x77d   :  { %v3462_v1 = vpop.eup %3461 }
 0x77e   :  { %v2139_v51 = vadd.f32 1e-05, %v2123_v38  ;;  %2269 = vperm.xlu1 %3417, %v2175_v56   ;;  %v2152_v34 = vmul.f32 %v3462_v1, %v2128_v41 }
 0x780   :  { %3467 = vrsqrt.f32 %v2139_v51  ;;  %2202 = vperm.xlu0 %3418, %v2152_v34   ;;  %v2168_v25 = vmul.f32 %v2152_v34, %v4673_v50  ;;  %v2162_v50 = vld [vmem:[%s5174_s13 + $0x30] sm:$0xff] }
 0x782   :  { %v3464_v43 = vpop.eup %3463  ;;  %v2176_v44 = vsub.f32 %v2160_v10, %v2168_v25 }
 0x783   :  { %v2153_v3 = vmul.f32 %v3464_v43, %v2129_v6 }
 0x784   :  { %2274 = vperm.xlu0 %3418, %v2176_v44  }
 0x785   :  { %v3466_v54 = vpop.eup %3465  ;;  %2207 = vperm.xlu1 %3417, %v2153_v3   ;;  %v2169_v53 = vmul.f32 %v2153_v3, %v4680_v26  ;;  %v2163_v26 = vld [vmem:[%s5174_s13 + $0x38] sm:$0xff] }
 0x786   :  { %v2154_v9 = vmul.f32 %v3466_v54, %v2130_v46 }
 0x787   :  { %v2177_v52 = vsub.f32 %v2161_v12, %v2169_v53 }
 0x788   :  { %2212 = vperm.xlu0 %3418, %v2154_v9   ;;  %v2170_v20 = vmul.f32 %v2154_v9, %v4688_v40 }
 0x789   :  { %2279 = vperm.xlu1 %3417, %v2177_v52  }
 0x78a   :  { %v3468_v27 = vpop.eup %3467  ;;  %v2178_v30 = vsub.f32 %v2162_v50, %v2170_v20 }
 0x78b   :  { %v2155_v35 = vmul.f32 %v3468_v27, %v2131_v37 }
 0x78c   :  { %2284 = vperm.xlu0 %3418, %v2178_v30  }
 0x78d   :  { %2217 = vperm.xlu1 %3417, %v2155_v35   ;;  %v2171_v59 = vmul.f32 %v2155_v35, %v2091_v7 }
 0x78f   :  { %v2179_v31 = vsub.f32 %v2163_v26, %v2171_v59 }
 0x791   :  { %2289 = vperm.xlu1 %3417, %v2179_v31  }
 0x7eb   :  { %v2183_v62 = vpop.permute.xlu1 %2182 }
 0x7ec   :  { %v2220_v40 = vmul.f32 %v2183_v62, %v4441_v42  ;;  %v2222_v4 = vmul.f32 %v2183_v62, %v4445_v61  ;;  %v2221_v8 = vmul.f32 %v2183_v62, %v4447_v11  ;;  %v2223_v29 = vmul.f32 %v2183_v62, %v4457_v23 }
 0x7ef   :  { %v2255_v39 = vpop.permute.xlu1 %2254  ;;  %v2188_v22 = vpop.permute.xlu0 %2187 }
 0x7f0   :  { %v2292_v21 = vadd.f32 %v2255_v39, %v2220_v40  ;;  %v2294_v16 = vadd.f32 %v2255_v39, %v2222_v4  ;;  %v2293_v41 = vadd.f32 %v2255_v39, %v2221_v8  ;;  %v2295_v38 = vadd.f32 %v2255_v39, %v2223_v29 }
 0x7f1   :  { %v2224_v56 = vmul.f32 %v2188_v22, %v4459_v24  ;;  %v2225_v7 = vmul.f32 %v2188_v22, %v4470_v0  ;;  %v2227_v1 = vmul.f32 %v2188_v22, %v4479_v33  ;;  %v2226_v61 = vmul.f32 %v2188_v22, %v4468_v49 }
 0x7f2   :  { %vm2324_vm4 = vcmp.gt.f32.partialorder %v2292_v21, 0.0  ;;  %vm2326_vm5 = vcmp.gt.f32.partialorder %v2294_v16, 0.0  ;;  %v2356_v42 = vmul.f32 0.1, %v2292_v21  ;;  %v2358_v51 = vmul.f32 0.1, %v2294_v16 }
 0x7f3   :  { %v2260_v11 = vpop.permute.xlu1 %2259  ;;  %vm2325_vm6 = vcmp.gt.f32.partialorder %v2293_v41, 0.0  ;;  %v2357_v43 = vmul.f32 0.1, %v2293_v41  ;;  %vm2327_vm7 = vcmp.gt.f32.partialorder %v2295_v38, 0.0  ;;  %v2359_v33 = vmul.f32 0.1, %v2295_v38 }
 0x7f4   :  { %v2296_v23 = vadd.f32 %v2260_v11, %v2224_v56  ;;  %v2297_v34 = vadd.f32 %v2260_v11, %v2225_v7  ;;  %v2299_v10 = vadd.f32 %v2260_v11, %v2227_v1  ;;  %v2193_v6 = vpop.permute.xlu0 %2192  ;;  %v2298_v25 = vadd.f32 %v2260_v11, %v2226_v61 }
 0x7f5   :  { %v2228_v0 = vmul.f32 %v2193_v6, %v4494_v17  ;;  %v2229_v44 = vmul.f32 %v2193_v6, %v4500_v63  ;;  %v2230_v3 = vmul.f32 %v2193_v6, %v4502_v45  ;;  %v2231_v49 = vmul.f32 %v2193_v6, %v4515_v28 }
 0x7f6   :  { %vm2328_vm8 = vcmp.gt.f32.partialorder %v2296_v23, 0.0  ;;  %v2360_v24 = vmul.f32 0.1, %v2296_v23  ;;  %v2361_v46 = vmul.f32 0.1, %v2297_v34  ;;  %vm2329_vm9 = vcmp.gt.f32.partialorder %v2297_v34, 0.0 }
 0x7f7   :  { %vm2331_vm10 = vcmp.gt.f32.partialorder %v2299_v10, 0.0  ;;  %v2363_v53 = vmul.f32 0.1, %v2299_v10  ;;  %vm2330_vm0 = vcmp.gt.f32.partialorder %v2298_v25, 0.0  ;;  %v2362_v52 = vmul.f32 0.1, %v2298_v25 }
 0x7f8   :  { %v2265_v54 = vpop.permute.xlu0 %2264  ;;  %v2392_v9 = vsel %vm2328_vm8, %v2296_v23, %v2360_v24  ;;  %v2388_v17 = vsel %vm2324_vm4, %v2292_v21, %v2356_v42  ;;  %v2393_v27 = vsel %vm2329_vm9, %v2297_v34, %v2361_v46  ;;  %v2391_v62 = vsel %vm2327_vm7, %v2295_v38, %v2359_v33 }
 0x7f9   :  { %v2198_v12 = vpop.permute.xlu1 %2197  ;;  %v4754_v45 = vadd.f32 %v2265_v54, %v2228_v0  ;;  %v2301_v28 = vadd.f32 %v2265_v54, %v2229_v44  ;;  %v4756_v37 = vadd.f32 %v2265_v54, %v2230_v3  ;;  %v2395_v30 = vsel %vm2331_vm10, %v2299_v10, %v2363_v53 }
 0x7fa   :  { %v2232_v50 = vmul.f32 %v2198_v12, %v4513_v60  ;;  %v2233_v20 = vmul.f32 %v2198_v12, %v4522_v58  ;;  %v2234_v63 = vmul.f32 %v2198_v12, %v4524_v5  ;;  %v2424_v35 = vpack.c.bf16 %v2392_v9, %v2388_v17  ;;  %v5261_v17 = vld [vmem:[#allocation6_spill] sm:$0xff] }
 0x7fb   :  { %v2235_v26 = vmul.f32 %v2198_v12, %v4533_v47  ;;  %v2303_v59 = vadd.f32 %v2265_v54, %v2231_v49  ;;  %v2389_v60 = vsel %vm2325_vm6, %v2293_v41, %v2357_v43  ;;  %v2390_v4 = vsel %vm2326_vm5, %v2294_v16, %v2358_v51 }
 0x7fc   :  { %v2425_v29 = vpack.c.bf16 %v2393_v27, %v2389_v60  ;;  %v2427_v39 = vpack.c.bf16 %v2395_v30, %v2391_v62  ;;  %v2394_v21 = vsel %vm2330_vm0, %v2298_v25, %v2362_v52  ;;  %vm2332_vm11 = vcmp.gt.f32.partialorder %v4754_v45, 0.0  ;;  %v5260_v52 = vld [vmem:[#allocation7_spill] sm:$0xff] }
 0x7fd   :  { %v2270_v31 = vpop.permute.xlu1 %2269  ;;  %v2364_v47 = vmul.f32 0.1, %v4754_v45  ;;  %v4770_v41 = vmul.f32 0.1, %v4756_v37  ;;  %vm2333_vm13 = vcmp.gt.f32.partialorder %v2301_v28, 0.0  ;;  %vm2334_vm14 = vcmp.gt.f32.partialorder %v4756_v37, 0.0 }
 0x7fe   :  { %v4761_v40 = vadd.f32 %v2270_v31, %v2232_v50  ;;  %v2305_v58 = vadd.f32 %v2270_v31, %v2233_v20  ;;  %v4763_v5 = vadd.f32 %v2270_v31, %v2234_v63  ;;  %v2307_v8 = vadd.f32 %v2270_v31, %v2235_v26  ;;  %2456 = vmatprep.subr.bf16.mxu1 %v2425_v29 }
 0x7ff   :  { %v2203_v22 = vpop.permute.xlu0 %2202  ;;  %2509 = vmatprep.subr.bf16.mxu0 %v2427_v39  ;;  %2457 = vmatpush1.bf16.msra.mxu1 %v2424_v35  ;;  %v2426_v42 = vpack.c.bf16 %v2394_v21, %v2390_v4  ;;  %v2365_v61 = vmul.f32 0.1, %v2301_v28  ;;  %v2367_v34 = vmul.f32 0.1, %v2303_v59  ;;  %vm2335_vm5 = vcmp.gt.f32.partialorder %v2303_v59, 0.0 }
 0x800   :  { %vm2336_vm15 = vcmp.gt.f32.partialorder %v4761_v40, 0.0  ;;  %vm2338_vm3 = vcmp.gt.f32.partialorder %v4763_v5, 0.0  ;;  %v2368_v16 = vmul.f32 0.1, %v4761_v40  ;;  %v2370_v38 = vmul.f32 0.1, %v4763_v5 }
 0x801   :  { %v2236_v56 = vmul.f32 %v2203_v22, %v4548_v19  ;;  %v2237_v7 = vmul.f32 %v2203_v22, %v4555_v36  ;;  %v2238_v1 = vmul.f32 %v2203_v22, %v4557_v55  ;;  %vm2337_vm4 = vcmp.gt.f32.partialorder %v2305_v58, 0.0  ;;  %2510 = vmatpush1.bf16.msra.mxu0 %v2426_v42 }
 0x802   :  { %v2239_v11 = vmul.f32 %v2203_v22, %v4569_v13  ;;  %v2369_v23 = vmul.f32 0.1, %v2305_v58  ;;  %v2371_v10 = vmul.f32 0.1, %v2307_v8  ;;  %vm2339_vm6 = vcmp.gt.f32.partialorder %v2307_v8, 0.0  ;;  %v5259_v13 = vld [vmem:[#allocation5_spill] sm:$0xff] }
 0x803   :  { %v2275_v51 = vpop.permute.xlu0 %2274  ;;  %v2397_v49 = vsel %vm2333_vm13, %v2301_v28, %v2365_v61  ;;  %v2399_v46 = vsel %vm2335_vm5, %v2303_v59, %v2367_v34  ;;  %v5262_v28 = vld [vmem:[#allocation8_spill] sm:$0xff]  ;;  %v2396_v59 = vsel %vm2332_vm11, %v4754_v45, %v2364_v47  ;;  %v2402_v45 = vsel %vm2338_vm3, %v4763_v5, %v2370_v38  ;;  %v5263_v22 = vld [vmem:[#allocation9_spill] sm:$0xff]  ;;  %v5264_v47 = vld [vmem:[#allocation11_spill] sm:$0xff] }
 0x804   :  { %v2208_v6 = vpop.permute.xlu1 %2207  ;;  %v4781_v25 = vadd.f32 %v2275_v51, %v2236_v56  ;;  %v4783_v43 = vadd.f32 %v2275_v51, %v2238_v1  ;;  %v4787_v55 = vadd.f32 %v2275_v51, %v2237_v7  ;;  %v4789_v24 = vadd.f32 %v2275_v51, %v2239_v11  ;;  %v5265_v7 = vld [vmem:[#allocation10_spill] sm:$0xff] }
 0x805   :  { %v2240_v19 = vmul.f32 %v2208_v6, %v4567_v57  ;;  %v2241_v36 = vmul.f32 %v2208_v6, %v4577_v18  ;;  %v2242_v0 = vmul.f32 %v2208_v6, %v5259_v13  ;;  %v2243_v33 = vmul.f32 %v2208_v6, %v4588_v15 }
 0x806   :  { %v4794_v44 = vmul.f32 0.1, %v4781_v25  ;;  %v4797_v3 = vmul.f32 0.1, %v4783_v43  ;;  %v2401_v57 = vsel %vm2337_vm4, %v2305_v58, %v2369_v23  ;;  %v2403_v18 = vsel %vm2339_vm6, %v2307_v8, %v2371_v10 }
 0x807   :  { %v2213_v12 = vpop.permute.xlu0 %2212  ;;  %v2429_v53 = vpack.c.bf16 %v2401_v57, %v2397_v49  ;;  %v2431_v9 = vpack.c.bf16 %v2403_v18, %v2399_v46  ;;  %vm2340_vm7 = vcmp.gt.f32.partialorder %v4781_v25, 0.0  ;;  %vm2342_vm8 = vcmp.gt.f32.partialorder %v4783_v43, 0.0 }
 0x808   :  { %v2280_v54 = vpop.permute.xlu1 %2279  ;;  %v2244_v50 = vmul.f32 %v2213_v12, %v5260_v52  ;;  %v2245_v15 = vmul.f32 %v2213_v12, %v5261_v17  ;;  %v2246_v35 = vmul.f32 %v2213_v12, %v5262_v28  ;;  %v2247_v26 = vmul.f32 %v2213_v12, %v4621_v14 }
 0x809   :  { %v2312_v20 = vadd.f32 %v2280_v54, %v2240_v19  ;;  %v2313_v63 = vadd.f32 %v2280_v54, %v2241_v36  ;;  %v2314_v27 = vadd.f32 %v2280_v54, %v2242_v0  ;;  %v2315_v30 = vadd.f32 %v2280_v54, %v2243_v33  ;;  %2458 = vmatprep.subr.bf16.mxu1 %v2429_v53 }
 0x80a   :  { %2511 = vmatprep.subr.bf16.mxu0 %v2431_v9  ;;  %vm2341_vm9 = vcmp.gt.f32.partialorder %v4787_v55, 0.0  ;;  %v2400_v58 = vsel %vm2336_vm15, %v4761_v40, %v2368_v16  ;;  %v2398_v14 = vsel %vm2334_vm14, %v4756_v37, %v4770_v41  ;;  %v2373_v61 = vmul.f32 0.1, %v4787_v55 }
 0x80b   :  { %vm2344_vm10 = vcmp.gt.f32.partialorder %v2312_v20, 0.0  ;;  %vm2346_vm0 = vcmp.gt.f32.partialorder %v2314_v27, 0.0  ;;  %v2376_v31 = vmul.f32 0.1, %v2312_v20  ;;  %v2378_v60 = vmul.f32 0.1, %v2314_v27  ;;  %v2285_v62 = vpop.permute.xlu0 %2284 }
 0x80c   :  { %v2218_v4 = vpop.permute.xlu1 %2217  ;;  %v2316_v8 = vadd.f32 %v2285_v62, %v2244_v50  ;;  %v2428_v29 = vpack.c.bf16 %v2400_v58, %v2396_v59  ;;  %v2430_v39 = vpack.c.bf16 %v2402_v45, %v2398_v14  ;;  %v2317_v16 = vadd.f32 %v2285_v62, %v2245_v15  ;;  %v3435_v59 = vld [vmem:[%s5175_s14] sm:$0xff]  }
 0x80d   :  { %v2248_v21 = vmul.f32 %v2218_v4, %v5263_v22  ;;  %v2249_v56 = vmul.f32 %v2218_v4, %v5264_v47  ;;  %v2250_v1 = vmul.f32 %v2218_v4, %v5265_v7  ;;  %v2251_v40 = vmul.f32 %v2218_v4, %v4637_v2  ;;  %v5267_v4 = vld [vmem:[#allocation3_spill] sm:$0xff] }
 0x80e   :  { %v2318_v42 = vadd.f32 %v2285_v62, %v2246_v35  ;;  %2459 = vmatpush1.bf16.msra.mxu1 %v2428_v29  ;;  %2512 = vmatpush1.bf16.msra.mxu0 %v2430_v39  ;;  %v2319_v37 = vadd.f32 %v2285_v62, %v2247_v26  ;;  %vm2348_vm11 = vcmp.gt.f32.partialorder %v2316_v8, 0.0  ;;  %v2380_v41 = vmul.f32 0.1, %v2316_v8  ;;  %v5268_v39 = vld [vmem:[#allocation4_spill] sm:$0xff] }
 0x80f   :  { %vm2345_vm13 = vcmp.gt.f32.partialorder %v2313_v63, 0.0  ;;  %vm2343_vm15 = vcmp.gt.f32.partialorder %v4789_v24, 0.0  ;;  %v2377_v2 = vmul.f32 0.1, %v2313_v63  ;;  %v2405_v10 = vsel %vm2341_vm9, %v4787_v55, %v2373_v61 }
 0x810   :  { %vm2350_vm14 = vcmp.gt.f32.partialorder %v2318_v42, 0.0  ;;  %v2382_v5 = vmul.f32 0.1, %v2318_v42  ;;  %v2290_v38 = vpop.permute.xlu1 %2289  ;;  %vm2347_vm3 = vcmp.gt.f32.partialorder %v2315_v30, 0.0  ;;  %v2375_v6 = vmul.f32 0.1, %v4789_v24 }
 0x811   :  { %v2320_v11 = vadd.f32 %v2290_v38, %v2248_v21  ;;  %v2321_v51 = vadd.f32 %v2290_v38, %v2249_v56  ;;  %v2322_v23 = vadd.f32 %v2290_v38, %v2250_v1  ;;  %v2323_v34 = vadd.f32 %v2290_v38, %v2251_v40 }
 0x812   :  { %v2409_v13 = vsel %vm2345_vm13, %v2313_v63, %v2377_v2  ;;  %v2379_v0 = vmul.f32 0.1, %v2315_v30  ;;  %v2407_v33 = vsel %vm2343_vm15, %v4789_v24, %v2375_v6  ;;  %v2404_v49 = vsel %vm2340_vm7, %v4781_v25, %v4794_v44 }
 0x813   :  { %vm2352_vm4 = vcmp.gt.f32.partialorder %v2320_v11, 0.0  ;;  %vm2354_vm5 = vcmp.gt.f32.partialorder %v2322_v23, 0.0  ;;  %v2384_v19 = vmul.f32 0.1, %v2320_v11  ;;  %v2386_v36 = vmul.f32 0.1, %v2322_v23 }
 0x814   :  { %v2433_v57 = vpack.c.bf16 %v2409_v13, %v2405_v10  ;;  %v2408_v55 = vsel %vm2344_vm10, %v2312_v20, %v2376_v31  ;;  %v2406_v46 = vsel %vm2342_vm8, %v4783_v43, %v4797_v3  ;;  %v2410_v18 = vsel %vm2346_vm0, %v2314_v27, %v2378_v60  ;;  %v3436_v60 = vld [vmem:[%s5175_s14 + $0x8] sm:$0xff]  }
 0x815   :  { %v2411_v12 = vsel %vm2347_vm3, %v2315_v30, %v2379_v0  ;;  %v2432_v54 = vpack.c.bf16 %v2408_v55, %v2404_v49  ;;  %v2434_v53 = vpack.c.bf16 %v2410_v18, %v2406_v46  ;;  %vm2349_vm6 = vcmp.gt.f32.partialorder %v2317_v16, 0.0 }
 0x816   :  { %2460 = vmatprep.subr.bf16.mxu1 %v2433_v57  ;;  %v2435_v24 = vpack.c.bf16 %v2411_v12, %v2407_v33  ;;  %vm2353_vm9 = vcmp.gt.f32.partialorder %v2321_v51, 0.0  ;;  %v2381_v9 = vmul.f32 0.1, %v2317_v16  ;;  %v2385_v52 = vmul.f32 0.1, %v2321_v51 }
 0x817   :  { %2461 = vmatpush1.bf16.msra.mxu1 %v2432_v54  ;;  %vm2351_vm7 = vcmp.gt.f32.partialorder %v2319_v37, 0.0  ;;  %vm2355_vm13 = vcmp.gt.f32.partialorder %v2323_v34, 0.0  ;;  %v2383_v25 = vmul.f32 0.1, %v2319_v37  ;;  %v2387_v44 = vmul.f32 0.1, %v2323_v34 }
 0x818   :  { %2513 = vmatprep.subr.bf16.mxu0 %v2435_v24  ;;  %v2413_v50 = vsel %vm2349_vm6, %v2317_v16, %v2381_v9  ;;  %v2417_v17 = vsel %vm2353_vm9, %v2321_v51, %v2385_v52  ;;  %v2412_v43 = vsel %vm2348_vm11, %v2316_v8, %v2380_v41  ;;  %v2416_v3 = vsel %vm2352_vm4, %v2320_v11, %v2384_v19 }
 0x819   :  { %2514 = vmatpush1.bf16.msra.mxu0 %v2434_v53  ;;  %v2437_v15 = vpack.c.bf16 %v2417_v17, %v2413_v50  ;;  %v2415_v20 = vsel %vm2351_vm7, %v2319_v37, %v2383_v25  ;;  %v2419_v63 = vsel %vm2355_vm13, %v2323_v34, %v2387_v44  ;;  %v2436_v27 = vpack.c.bf16 %v2416_v3, %v2412_v43 }
 0x81a   :  { %v2439_v30 = vpack.c.bf16 %v2419_v63, %v2415_v20  ;;  %v2414_v28 = vsel %vm2350_vm14, %v2318_v42, %v2382_v5  ;;  %v2418_v35 = vsel %vm2354_vm5, %v2322_v23, %v2386_v36  ;;  %v5266_v31 = vmov 0  }
 0x81b   :  { %2462 = vmatprep.subr.bf16.mxu1 %v2437_v15  ;;  %v2438_v26 = vpack.c.bf16 %v2418_v35, %v2414_v28 }
 0x81c   :  { %2515 = vmatprep.subr.bf16.mxu0 %v2439_v30  ;;  %2463 = vmatpush1.bf16.msra.mxu1 %v2436_v27 }
 0x81d   :  { %2516 = vmatpush1.bf16.msra.mxu0 %v2438_v26 }
 0x81f   :  { %3246 = vmatmul.mubr.msk.bf16.vlgmr.msra.gmra.mrb[60].mxu1 %vm1749_vm1, %v3435_v59 }
 0x820   :  { %3248 = vmatmul.mubr.msk.bf16.vlgmr.msra.gmra.mrb[60].mxu0 %vm1749_vm1, %v3435_v59  ;;  %2498 = vmatprep.mubr.bf16.mxu1 %v5266_v31 }
 0x821   :  { %2551 = vmatprep.mubr.bf16.mxu0 %v5266_v31 }
 0x827   :  { %3247 = vmatmul.mubr.msk.bf16.gmra.mrb[64].mxu1 %vm1749_vm1, %v3436_v60 }
 0x828   :  { %3249 = vmatmul.mubr.msk.bf16.gmra.mrb[64].mxu0 %vm1749_vm1, %v3436_v60  ;;  %2865 = vmatprep.mubr.bf16.mxu1 %v5266_v31 }
 0x8f2   :  { %v4860_v62 = vpop.f32.mrb[60].mxu1 }
 0x8f3   :  { %v2598_v58 = vmul.f32 %v4860_v62, %v4860_v62  ;;  %v4864_v14 = vpop.f32.mrb[60].mxu0  ;;  %v4866_v45 = vpop.f32.mrb[61].mxu1  ;;  %v2562_v8 = vmul.f32 %v5267_v4, %v4860_v62 }
 0x8f4   :  { %v2600_v29 = vmul.f32 %v4864_v14, %v4864_v14  ;;  %v2563_v22 = vmul.f32 %v5268_v39, %v4866_v45  ;;  %v2599_v21 = vmul.f32 %v4866_v45, %v4866_v45  ;;  %v4876_v47 = vpop.f32.mrb[61].mxu0  ;;  %v4878_v56 = vpop.f32.mrb[62].mxu1  ;;  %v2564_v1 = vmul.f32 %v3971_v48, %v4864_v14 }
 0x8f5   :  { %v2614_v7 = vmul.f32 %v5267_v4, %v2598_v58  ;;  %v2566_v40 = vmul.f32 %v5267_v4, %v4878_v56  ;;  %v2602_v16 = vmul.f32 %v4878_v56, %v4878_v56  ;;  %v4887_v42 = vpop.f32.mrb[62].mxu0  ;;  %v4889_v37 = vpop.f32.mrb[63].mxu1  ;;  %v2601_v5 = vmul.f32 %v4876_v47, %v4876_v47 }
 0x8f6   :  { %v2615_v41 = vmul.f32 %v5268_v39, %v2599_v21  ;;  %v2604_v38 = vmul.f32 %v4887_v42, %v4887_v42  ;;  %v2567_v61 = vmul.f32 %v5268_v39, %v4889_v37  ;;  %v4898_v11 = vpop.f32.mrb[63].mxu0  ;;  %v2603_v23 = vmul.f32 %v4889_v37, %v4889_v37 }
 0x8f7   :  { %v2618_v51 = vmul.f32 %v5267_v4, %v2602_v16  ;;  %v2605_v34 = vmul.f32 %v4898_v11, %v4898_v11  ;;  %v2568_v2 = vmul.f32 %v3971_v48, %v4887_v42  ;;  %v2578_v10 = vadd.f32 %v2563_v22, %v2562_v8 }
 0x8f8   :  { %v2583_v6 = vadd.f32 %v2567_v61, %v2566_v40  ;;  %v2616_v19 = vmul.f32 %v3971_v48, %v2600_v29  ;;  %v2619_v36 = vmul.f32 %v5268_v39, %v2603_v23  ;;  %v2565_v13 = vmul.f32 %v4000_v32, %v4876_v47 }
 0x8f9   :  { %v2569_v0 = vmul.f32 %v4000_v32, %v4898_v11  ;;  %v2630_v33 = vadd.f32 %v2615_v41, %v2614_v7  ;;  %v2579_v57 = vadd.f32 %v2578_v10, %v2564_v1  ;;  %v2617_v46 = vmul.f32 %v4000_v32, %v2601_v5 }
 0x8fa   :  { %v4913_v49 = vpop.f32.mrb[64].mxu1  ;;  %v2584_v55 = vadd.f32 %v2583_v6, %v2568_v2  ;;  %v2620_v18 = vmul.f32 %v3971_v48, %v2604_v38  ;;  %v2621_v9 = vmul.f32 %v4000_v32, %v2605_v34  ;;  %v2635_v52 = vadd.f32 %v2619_v36, %v2618_v51 }
 0x8fb   :  { %v2606_v12 = vmul.f32 %v4913_v49, %v4913_v49  ;;  %v4919_v54 = vpop.f32.mrb[65].mxu1  ;;  %v4921_v53 = vpop.f32.mrb[64].mxu0  ;;  %v2631_v24 = vadd.f32 %v2630_v33, %v2616_v19  ;;  %v2570_v25 = vmul.f32 %v5267_v4, %v4913_v49  ;;  %v2580_v20 = vadd.f32 %v2579_v57, %v2565_v13 }
 0x8fc   :  { %v2571_v44 = vmul.f32 %v5268_v39, %v4919_v54  ;;  %v2607_v50 = vmul.f32 %v4919_v54, %v4919_v54  ;;  %v2608_v17 = vmul.f32 %v4921_v53, %v4921_v53  ;;  %v4932_v43 = vpop.f32.mrb[66].mxu1  ;;  %v4934_v3 = vpop.f32.mrb[65].mxu0  ;;  %v2572_v8 = vmul.f32 %v3971_v48, %v4921_v53 }
 0x8fd   :  { %v2622_v15 = vmul.f32 %v5267_v4, %v2606_v12  ;;  %v2574_v63 = vmul.f32 %v5267_v4, %v4932_v43  ;;  %v2610_v27 = vmul.f32 %v4932_v43, %v4932_v43  ;;  %v4941_v30 = vpop.f32.mrb[67].mxu1  ;;  %v4943_v28 = vpop.f32.mrb[66].mxu0  ;;  %v2609_v60 = vmul.f32 %v4934_v3, %v4934_v3  ;;  %2581 = vadd.xlane.f32.xlu0 %v2580_v20 }
 0x8fe   :  { %v2623_v35 = vmul.f32 %v5268_v39, %v2607_v50  ;;  %v2575_v26 = vmul.f32 %v5268_v39, %v4941_v30  ;;  %v2611_v59 = vmul.f32 %v4941_v30, %v4941_v30  ;;  %v4952_v58 = vpop.f32.mrb[67].mxu0  ;;  %v2612_v22 = vmul.f32 %v4943_v28, %v4943_v28 }
 0x8ff   :  { %v2626_v29 = vmul.f32 %v5267_v4, %v2610_v27  ;;  %v2585_v21 = vadd.f32 %v2584_v55, %v2569_v0  ;;  %v2576_v1 = vmul.f32 %v3971_v48, %v4943_v28  ;;  %v2632_v40 = vadd.f32 %v2631_v24, %v2617_v46 }
 0x900   :  { %v2627_v7 = vmul.f32 %v5268_v39, %v2611_v59  ;;  %v2636_v16 = vadd.f32 %v2635_v52, %v2620_v18  ;;  %v2613_v41 = vmul.f32 %v4952_v58, %v4952_v58  ;;  %v2573_v5 = vmul.f32 %v4000_v32, %v4934_v3 }
 0x901   :  { %2586 = vadd.xlane.f32.xlu1 %v2585_v21  ;;  %v2588_v38 = vadd.f32 %v2571_v44, %v2570_v25  ;;  %v2624_v4 = vmul.f32 %v3971_v48, %v2608_v17  ;;  %v2625_v51 = vmul.f32 %v4000_v32, %v2609_v60  ;;  %v2640_v23 = vadd.f32 %v2623_v35, %v2622_v15 }
 0x902   :  { %v2637_v61 = vadd.f32 %v2636_v16, %v2621_v9  ;;  %v2593_v39 = vadd.f32 %v2575_v26, %v2574_v63  ;;  %2633 = vadd.xlane.f32.xlu0 %v2632_v40  ;;  %v2628_v2 = vmul.f32 %v3971_v48, %v2612_v22  ;;  %v2645_v10 = vadd.f32 %v2627_v7, %v2626_v29 }
 0x903   :  { %v2589_v34 = vadd.f32 %v2588_v38, %v2572_v8  ;;  %v2641_v6 = vadd.f32 %v2640_v23, %v2624_v4  ;;  %v2577_v19 = vmul.f32 %v4000_v32, %v4952_v58  ;;  %v2629_v0 = vmul.f32 %v4000_v32, %v2613_v41 }
 0x904   :  { %v2594_v36 = vadd.f32 %v2593_v39, %v2576_v1  ;;  %v2646_v33 = vadd.f32 %v2645_v10, %v2628_v2  ;;  %v2671_v2 = vld [vmem:[%s5176_s15 + $0x8] sm:$0xff] }
 0x905   :  { %v2590_v13 = vadd.f32 %v2589_v34, %v2573_v5  ;;  %v2642_v57 = vadd.f32 %v2641_v6, %v2625_v51  ;;  %v2686_v34 = vld [vmem:[%s5177_s16] sm:$0xff] }
 0x906   :  { %v2595_v55 = vadd.f32 %v2594_v36, %v2577_v19  ;;  %2638 = vadd.xlane.f32.xlu0 %v2637_v61  ;;  %v2647_v46 = vadd.f32 %v2646_v33, %v2629_v0  ;;  %v2670_v61 = vld [vmem:[%s5176_s15] sm:$0xff]  ;;  %v2672_v0 = vld [vmem:[%s5176_s15 + $0x10] sm:$0xff] }
 0x907   :  { %2591 = vadd.xlane.f32.xlu1 %v2590_v13  ;;  %v2687_v13 = vld [vmem:[%s5177_s16 + $0x8] sm:$0xff] }
 0x90a   :  { %2596 = vadd.xlane.f32.xlu0 %v2595_v55 }
 0x90b   :  { %2643 = vadd.xlane.f32.xlu1 %v2642_v57 }
 0x90e   :  { %2648 = vadd.xlane.f32.xlu0 %v2647_v46 }
 0x98a   :  { %v2582_v18 = vpop.xlane.xlu0 %2581 }
 0x98b   :  { %v2650_v48 = vmul.f32 0.015625, %v2582_v18  ;;  %v2688_v18 = vld [vmem:[%s5177_s16 + $0x10] sm:$0xff] }
 0x98d   :  { %v2658_v9 = vmul.f32 %v2650_v48, %v2650_v48 }
 0x98e   :  { %v2587_v12 = vpop.xlane.xlu1 %2586 }
 0x98f   :  { %v2634_v24 = vpop.xlane.xlu0 %2633  ;;  %v2651_v52 = vmul.f32 0.015625, %v2587_v12 }
 0x990   :  { %v2654_v25 = vmul.f32 0.015625, %v2634_v24 }
 0x991   :  { %v2659_v32 = vmul.f32 %v2651_v52, %v2651_v52 }
 0x992   :  { %v2662_v44 = vsub.f32 %v2654_v25, %v2658_v9 }
 0x993   :  { %v2639_v50 = vpop.xlane.xlu0 %2638 }
 0x994   :  { %v2592_v17 = vpop.xlane.xlu1 %2591  ;;  %v2666_v15 = vmax.f32 %v2662_v44, 0.0  ;;  %v2655_v20 = vmul.f32 0.015625, %v2639_v50 }
 0x995   :  { %v2652_v63 = vmul.f32 0.015625, %v2592_v17 }
 0x996   :  { %v2674_v27 = vadd.f32 1e-05, %v2666_v15  ;;  %v2663_v35 = vsub.f32 %v2655_v20, %v2659_v32 }
 0x997   :  { %v2660_v26 = vmul.f32 %v2652_v63, %v2652_v63  ;;  %v2597_v60 = vpop.xlane.xlu0 %2596 }
 0x998   :  { %v2644_v59 = vpop.xlane.xlu1 %2643  ;;  %3469 = vrsqrt.f32 %v2674_v27  ;;  %v2667_v8 = vmax.f32 %v2663_v35, 0.0  ;;  %v2653_v22 = vmul.f32 0.015625, %v2597_v60 }
 0x999   :  { %v2656_v29 = vmul.f32 0.015625, %v2644_v59 }
 0x99a   :  { %v2675_v21 = vadd.f32 1e-05, %v2667_v8  ;;  %v2661_v16 = vmul.f32 %v2653_v22, %v2653_v22 }
 0x99b   :  { %v2664_v7 = vsub.f32 %v2656_v29, %v2660_v26  ;;  %v2649_v1 = vpop.xlane.xlu0 %2648 }
 0x99c   :  { %3471 = vrsqrt.f32 %v2675_v21  ;;  %v2657_v41 = vmul.f32 0.015625, %v2649_v1 }
 0x99d   :  { %v2668_v40 = vmax.f32 %v2664_v7, 0.0 }
 0x99e   :  { %v2665_v38 = vsub.f32 %v2657_v41, %v2661_v16 }
 0x99f   :  { %v2676_v5 = vadd.f32 1e-05, %v2668_v40 }
 0x9a0   :  { %v2669_v4 = vmax.f32 %v2665_v38, 0.0 }
 0x9a1   :  { %3473 = vrsqrt.f32 %v2676_v5 }
 0x9a2   :  { %v3470_v51 = vpop.eup %3469  ;;  %v2677_v23 = vadd.f32 1e-05, %v2669_v4 }
 0x9a3   :  { %v2682_v39 = vmul.f32 %v3470_v51, %v2670_v61 }
 0x9a4   :  { %3475 = vrsqrt.f32 %v2677_v23 }
 0x9a5   :  { %2700 = vperm.xlu1 %3417, %v2682_v39   ;;  %v2690_v10 = vmul.f32 %v2682_v39, %v2650_v48  ;;  %v2673_v48 = vld [vmem:[%s5176_s15 + $0x18] sm:$0xff] }
 0x9a6   :  { %v3472_v6 = vpop.eup %3471 }
 0x9a7   :  { %v2694_v19 = vsub.f32 %v2686_v34, %v2690_v10  ;;  %v2683_v36 = vmul.f32 %v3472_v6, %v2671_v2 }
 0x9a9   :  { %2736 = vperm.xlu1 %3417, %v2694_v19   ;;  %2705 = vperm.xlu0 %3418, %v2683_v36   ;;  %v2691_v33 = vmul.f32 %v2683_v36, %v2651_v52  ;;  %v2689_v52 = vld [vmem:[%s5177_s16 + $0x18] sm:$0xff] }
 0x9ab   :  { %v3474_v57 = vpop.eup %3473  ;;  %v2695_v55 = vsub.f32 %v2687_v13, %v2691_v33 }
 0x9ac   :  { %v2684_v46 = vmul.f32 %v3474_v57, %v2672_v0 }
 0x9ad   :  { %2741 = vperm.xlu1 %3417, %v2695_v55  }
 0x9ae   :  { %2710 = vperm.xlu0 %3418, %v2684_v46   ;;  %v2692_v12 = vmul.f32 %v2684_v46, %v2652_v63  ;;  %v3476_v24 = vpop.eup %3475 }
 0x9af   :  { %v2685_v25 = vmul.f32 %v3476_v24, %v2673_v48 }
 0x9b0   :  { %v2696_v9 = vsub.f32 %v2688_v18, %v2692_v12 }
 0x9b1   :  { %2715 = vperm.xlu1 %3417, %v2685_v25   ;;  %v2693_v44 = vmul.f32 %v2685_v25, %v2653_v22 }
 0x9b2   :  { %2746 = vperm.xlu0 %3418, %v2696_v9  }
 0x9b3   :  { %v2697_v50 = vsub.f32 %v2689_v52, %v2693_v44 }
 0x9b5   :  { %2751 = vperm.xlu1 %3417, %v2697_v50  }
 0xa24   :  { %v2701_v17 = vpop.permute.xlu1 %2700 }
 0xa25   :  { %v2718_v32 = vmul.f32 %v2701_v17, %v4860_v62  ;;  %v2719_v15 = vmul.f32 %v2701_v17, %v4866_v45  ;;  %v2720_v20 = vmul.f32 %v2701_v17, %v4864_v14  ;;  %v2721_v63 = vmul.f32 %v2701_v17, %v4876_v47 }
 0xa28   :  { %v2737_v27 = vpop.permute.xlu1 %2736  ;;  %v2706_v35 = vpop.permute.xlu0 %2705 }
 0xa29   :  { %v5000_v26 = vadd.f32 %v2737_v27, %v2718_v32  ;;  %v5002_v59 = vadd.f32 %v2737_v27, %v2719_v15  ;;  %v2756_v60 = vadd.f32 %v2737_v27, %v2720_v20  ;;  %v2757_v8 = vadd.f32 %v2737_v27, %v2721_v63 }
 0xa2a   :  { %v2722_v29 = vmul.f32 %v2706_v35, %v4878_v56  ;;  %v2723_v22 = vmul.f32 %v2706_v35, %v4889_v37  ;;  %v2724_v14 = vmul.f32 %v2706_v35, %v4887_v42  ;;  %v2725_v47 = vmul.f32 %v2706_v35, %v4898_v11 }
 0xa2b   :  { %v5007_v62 = vmul.f32 0.1, %v5000_v26  ;;  %v2788_v45 = vmul.f32 0.1, %v2756_v60  ;;  %vm2772_vm1 = vcmp.gt.f32.partialorder %v2756_v60, 0.0  ;;  %vm2773_vm8 = vcmp.gt.f32.partialorder %v2757_v8, 0.0 }
 0xa2c   :  { %v2742_v21 = vpop.permute.xlu1 %2741  ;;  %v2789_v1 = vmul.f32 0.1, %v2757_v8  ;;  %v2787_v40 = vmul.f32 0.1, %v5002_v59  ;;  %vm2770_vm10 = vcmp.gt.f32.partialorder %v5000_v26, 0.0  ;;  %vm2771_vm0 = vcmp.gt.f32.partialorder %v5002_v59, 0.0 }
 0xa2d   :  { %v2711_v7 = vpop.permute.xlu0 %2710  ;;  %v2758_v16 = vadd.f32 %v2742_v21, %v2722_v29  ;;  %v5012_v41 = vadd.f32 %v2742_v21, %v2723_v22  ;;  %v2760_v56 = vadd.f32 %v2742_v21, %v2724_v14  ;;  %v2761_v37 = vadd.f32 %v2742_v21, %v2725_v47 }
 0xa2e   :  { %v2726_v5 = vmul.f32 %v2711_v7, %v4913_v49  ;;  %v2727_v42 = vmul.f32 %v2711_v7, %v4919_v54  ;;  %v2728_v11 = vmul.f32 %v2711_v7, %v4921_v53  ;;  %v2729_v38 = vmul.f32 %v2711_v7, %v4934_v3  ;;  %v2818_v7 = vld [vmem:[%s5178_s17] sm:$0x1] }
 0xa2f   :  { %vm2774_vm11 = vcmp.gt.f32.partialorder %v2758_v16, 0.0  ;;  %vm2776_vm14 = vcmp.gt.f32.partialorder %v2760_v56, 0.0  ;;  %v2790_v4 = vmul.f32 0.1, %v2758_v16  ;;  %v2792_v61 = vmul.f32 0.1, %v2760_v56 }
 0xa30   :  { %v2716_v51 = vpop.permute.xlu1 %2715  ;;  %vm2777_vm15 = vcmp.gt.f32.partialorder %v2761_v37, 0.0  ;;  %v2793_v39 = vmul.f32 0.1, %v2761_v37  ;;  %v2805_v34 = vsel %vm2773_vm8, %v2757_v8, %v2789_v1  ;;  %v2804_v49 = vsel %vm2772_vm1, %v2756_v60, %v2788_v45 }
 0xa31   :  { %v2747_v23 = vpop.permute.xlu0 %2746  ;;  %v2730_v3 = vmul.f32 %v2716_v51, %v4932_v43  ;;  %v2731_v6 = vmul.f32 %v2716_v51, %v4941_v30  ;;  %v2732_v19 = vmul.f32 %v2716_v51, %v4943_v28  ;;  %v2733_v36 = vmul.f32 %v2716_v51, %v4952_v58  ;;  %v2964_v51 = vld [vmem:[%s5179_s4 + $0xa0] sm:$0xff] }
 0xa32   :  { %v2762_v2 = vadd.f32 %v2747_v23, %v2726_v5  ;;  %v2763_v54 = vadd.f32 %v2747_v23, %v2727_v42  ;;  %v2764_v10 = vadd.f32 %v2747_v23, %v2728_v11  ;;  %v2765_v53 = vadd.f32 %v2747_v23, %v2729_v38  ;;  %v2962_v5 = vld [vmem:[%s5179_s4 + $0x90] sm:$0xff]  ;;  %v2963_v42 = vld [vmem:[%s5179_s4 + $0x98] sm:$0xff]  ;;  %v2965_v23 = vld [vmem:[%s5179_s4 + $0xa8] sm:$0xff] }
 0xa33   :  { %v2809_v57 = vsel %vm2777_vm15, %v2761_v37, %v2793_v39  ;;  %v2808_v55 = vsel %vm2776_vm14, %v2760_v56, %v2792_v61  ;;  %vm2775_vm13 = vcmp.gt.f32.partialorder %v5012_v41, 0.0  ;;  %v2791_v17 = vmul.f32 0.1, %v5012_v41  ;;  %v2945_v37 = vld [vmem:[%s5179_s4 + $0x8] sm:$0xff]  ;;  %v2947_v61 = vld [vmem:[%s5179_s4 + $0x18] sm:$0xff] }
 0xa34   :  { %vm2778_vm3 = vcmp.gt.f32.partialorder %v2762_v2, 0.0  ;;  %vm2780_vm4 = vcmp.gt.f32.partialorder %v2764_v10, 0.0  ;;  %v2794_v13 = vmul.f32 0.1, %v2762_v2  ;;  %v2796_v0 = vmul.f32 0.1, %v2764_v10  ;;  %v2752_v33 = vpop.permute.xlu1 %2751 }
 0xa35   :  { %vm2781_vm5 = vcmp.gt.f32.partialorder %v2765_v53, 0.0  ;;  %v2797_v46 = vmul.f32 0.1, %v2765_v53  ;;  %v2766_v18 = vadd.f32 %v2752_v33, %v2730_v3  ;;  %v2767_v48 = vadd.f32 %v2752_v33, %v2731_v6  ;;  %v2950_v6 = vld [vmem:[%s5179_s4 + $0x30] sm:$0xff] }
 0xa36   :  { %v2768_v43 = vadd.f32 %v2752_v33, %v2732_v19  ;;  %v2769_v12 = vadd.f32 %v2752_v33, %v2733_v36  ;;  %v2826_v30 = vpack.c.bf16 %v2809_v57, %v2805_v34  ;;  %v2825_v24 = vpack.c.bf16 %v2808_v55, %v2804_v49  ;;  %v2948_v49 = vld [vmem:[%s5179_s4 + $0x20] sm:$0xff]  ;;  %v2951_v19 = vld [vmem:[%s5179_s4 + $0x38] sm:$0xff] }
 0xa37   :  { %v2813_v28 = vsel %vm2781_vm5, %v2765_v53, %v2797_v46  ;;  %v2812_v9 = vsel %vm2780_vm4, %v2764_v10, %v2796_v0  ;;  %vm2782_vm6 = vcmp.gt.f32.partialorder %v2766_v18, 0.0  ;;  %v2798_v58 = vmul.f32 0.1, %v2766_v18  ;;  %v2967_v10 = vld [vmem:[%s5179_s4 + $0xb8] sm:$0xff]  ;;  %v5270_v0 = vld [vmem:[#allocation2_spill] sm:$0xff] }
 0xa38   :  { %vm2784_vm9 = vcmp.gt.f32.partialorder %v2768_v43, 0.0  ;;  %v2799_v25 = vmul.f32 0.1, %v2767_v48  ;;  %v2800_v52 = vmul.f32 0.1, %v2768_v43  ;;  %2833 = vmatprep.subr.bf16.mxu1 %v2826_v30  ;;  %vm2785_vm7 = vcmp.gt.f32.partialorder %v2769_v12, 0.0 }
 0xa39   :  { %v2801_v44 = vmul.f32 0.1, %v2769_v12  ;;  %v2814_v50 = vsel %vm2782_vm6, %v2766_v18, %v2798_v58  ;;  %2834 = vmatpush1.bf16.msra.mxu1 %v2825_v24  ;;  %v2803_v32 = vsel %vm2771_vm0, %v5002_v59, %v2787_v40  ;;  %v2802_v15 = vsel %vm2770_vm10, %v5000_v26, %v5007_v62  ;;  %v3250_v26 = vld [vmem:[%s5178_s17 + $0x1] sm:$0x1] }
 0xa3a   :  { %v2816_v20 = vsel %vm2784_vm9, %v2768_v43, %v2800_v52  ;;  %v2806_v27 = vsel %vm2774_vm11, %v2758_v16, %v2790_v4  ;;  %vm2779_vm1 = vcmp.gt.f32.partialorder %v2763_v54, 0.0  ;;  %v2807_v8 = vsel %vm2775_vm13, %v5012_v41, %v2791_v17  ;;  %v2960_v40 = vld [vmem:[%s5179_s4 + $0x80] sm:$0xff]  ;;  %v2961_v16 = vld [vmem:[%s5179_s4 + $0x88] sm:$0xff]  ;;  %v2946_v4 = vld [vmem:[%s5179_s4 + $0x10] sm:$0xff] }
 0xa3b   :  { %v2817_v63 = vsel %vm2785_vm7, %v2769_v12, %v2801_v44  ;;  %v2827_v60 = vpack.c.bf16 %v2816_v20, %v2812_v9  ;;  %v2819_v29 = vpack.c.bf16 %v2806_v27, %v2802_v15  ;;  %v2820_v22 = vpack.c.bf16 %v2807_v8, %v2803_v32  ;;  %v2944_v41 = vld [vmem:[%s5179_s4] sm:$0xff]  ;;  %v2969_v52 = vld [vmem:[%s5179_s4 + $0xc8] sm:$0xff]  ;;  %v2970_v32 = vld [vmem:[%s5179_s4 + $0xd0] sm:$0xff] }
 0xa3c   :  { %v2828_v35 = vpack.c.bf16 %v2817_v63, %v2813_v28  ;;  %vm2783_vm8 = vcmp.gt.f32.partialorder %v2767_v48, 0.0  ;;  %v2795_v45 = vmul.f32 0.1, %v2763_v54  ;;  %v2810_v59 = vsel %vm2778_vm3, %v2762_v2, %v2794_v13  ;;  %v2949_v2 = vld [vmem:[%s5179_s4 + $0x28] sm:$0xff]  ;;  %v2918_v13 = vld [vmem:[%s5180_s18] sm:$0x3] }
 0xa3d   :  { %v2815_v14 = vsel %vm2783_vm8, %v2767_v48, %v2799_v25  ;;  %v2821_v47 = vpack.c.bf16 %v2814_v50, %v2810_v59  ;;  %vm2829_vm10 = vcmask 261120   ;;  %v5269_v1 = vmov 0.0   ;;  %v2952_v44 = vld [vmem:[%s5179_s4 + $0x40] sm:$0xff]  ;;  %v2953_v17 = vld [vmem:[%s5179_s4 + $0x48] sm:$0xff]  ;;  %v2971_v15 = vld [vmem:[%s5179_s4 + $0xd8] sm:$0xff] }
 0xa3e   :  { %2835 = vmatprep.subr.bf16.mxu1 %v2828_v35  ;;  %v2811_v62 = vsel %vm2779_vm1, %v2763_v54, %v2795_v45  ;;  %v3331_v56 = vpack.c.bf16 %v2961_v16, %v2960_v40  ;;  %v3333_v11 = vpack.c.bf16 %v2945_v37, %v2944_v41  ;;  %v3335_v38 = vpack.c.bf16 %v2963_v42, %v2962_v5  ;;  %v2966_v54 = vld [vmem:[%s5179_s4 + $0xb0] sm:$0xff]  ;;  %v2955_v35 = vld [vmem:[%s5179_s4 + $0x58] sm:$0xff]  ;;  %v2973_v8 = vld [vmem:[%s5179_s4 + $0xe8] sm:$0xff] }
 0xa3f   :  { %2836 = vmatpush1.bf16.msra.mxu1 %v2827_v60  ;;  %v2822_v21 = vpack.c.bf16 %v2815_v14, %v2811_v62  ;;  %v3337_v39 = vpack.c.bf16 %v2947_v61, %v2946_v4  ;;  %v3339_v34 = vpack.c.bf16 %v2965_v23, %v2964_v51  ;;  %v3341_v53 = vpack.c.bf16 %v2949_v2, %v2948_v49  ;;  %v2954_v27 = vld [vmem:[%s5179_s4 + $0x50] sm:$0xff]  ;;  %v2972_v60 = vld [vmem:[%s5179_s4 + $0xe0] sm:$0xff]  ;;  %v2957_v59 = vld [vmem:[%s5179_s4 + $0x68] sm:$0xff] }
 0xa40   :  { %2877 = vmatprep.subr.bf16.mxu1 %v2820_v22  ;;  %3332 = vmatprep.subr.bf16.mxu0 %v3331_v56  ;;  %v3343_v3 = vpack.c.bf16 %v2967_v10, %v2966_v54  ;;  %v3345_v36 = vpack.c.bf16 %v2951_v19, %v2950_v6  ;;  %vm2919_vm0 = vcmp.gt.f32.partialorder %v2918_v13, 0.0  ;;  %v2923_v33 = vsub.s32 0, %v5270_v0  ;;  %v2956_v45 = vld [vmem:[%s5179_s4 + $0x60] sm:$0xff]  ;;  %v2974_v14 = vld [vmem:[%s5179_s4 + $0xf0] sm:$0xff] }
 0xa41   :  { %3334 = vmatpush3.bf16.msra.mxu0 %v3333_v11  ;;  %v2920_v57 = vsel %vm2919_vm0, 1, %v5266_v31  ;;  %v2927_v55 = vsub.s32 1, %v5270_v0  ;;  %v3349_v20 = vpack.c.bf16 %v2953_v17, %v2952_v44  ;;  %v3351_v63 = vpack.c.bf16 %v2971_v15, %v2970_v32  ;;  %v3253_v11 = vld.sshfl [vmem:[%s5167_s3] sm:$0x33 pattern:$0x76325410] }
 0xa42   :  { %3251 = vmatmul.mubr.msk.bf16.vlgmr.msra.gmra.mrb[68].mxu1 %vm2829_vm10, %v3250_v26  ;;  %3336 = vmatprep.subr.bf16.mxu0 %v3335_v38  ;;  %v2924_v46 = vrot.slane %v2920_v57, %v2923_v33  ;;  %v3355_v22 = vpack.c.bf16 %v2973_v8, %v2972_v60  ;;  %v3357_v26 = vpack.c.bf16 %v2957_v59, %v2956_v45 }
 0xa43   :  { %2878 = vmatpush1.bf16.msra.mxu1 %v2819_v29  ;;  %2909 = vmatprep.mubr.bf16.mxu1 %v5266_v31  ;;  %v2928_v18 = vrot.slane %v2920_v57, %v2927_v55  ;;  %v2968_v31 = vld [vmem:[%s5179_s4 + $0xc0] sm:$0xff]  ;;  %v3353_v29 = vpack.c.bf16 %v2955_v35, %v2954_v27  ;;  %v3057_v38 = vcombine.high %v3253_v11, %v3253_v11 }
 0xa44   :  { %2879 = vmatprep.subr.bf16.mxu1 %v2822_v21  ;;  %vm2929_vm11 = vcmp.eq.s32.totalorder %v2924_v46, 1  ;;  %v3347_v50 = vpack.c.bf16 %v2969_v52, %v2968_v31  ;;  %v2958_v21 = vld [vmem:[%s5179_s4 + $0x70] sm:$0xff] }
 0xa45   :  { %3338 = vmatpush3.bf16.msra.mxu0 %v3337_v39  ;;  %vm2930_vm14 = vcmp.eq.s32.totalorder %v2928_v18, 1 }
 0xa46   :  { %3340 = vmatprep.subr.bf16.mxu0 %v3339_v34 }
 0xa47   :  { %2880 = vmatpush1.bf16.msra.mxu1 %v2821_v47  ;;  %v2975_v47 = vld [vmem:[%s5179_s4 + $0xf8] sm:$0xff] }
 0xa48   :  { %v3359_v62 = vpack.c.bf16 %v2975_v47, %v2974_v14  ;;  %3254 = vmatprep.subr.msk.mxu1 %vm380_vm12, %v3057_v38 }
 0xa49   :  { %3342 = vmatpush3.bf16.msra.mxu0 %v3341_v53 }
 0xa4a   :  { %3344 = vmatprep.subr.bf16.mxu0 %v3343_v3 }
 0xa4d   :  { %3346 = vmatpush3.bf16.msra.mxu0 %v3345_v36 }
 0xa4e   :  { %3252 = vmatmul.mubr.msk.bf16.vlgmr.msra.gmra.mrb[68].mxu1 %vm2829_vm10, %v2818_v7  ;;  %3348 = vmatprep.subr.bf16.mxu0 %v3347_v50  ;;  %v2959_v7 = vld [vmem:[%s5179_s4 + $0x78] sm:$0xff] }
 0xa4f   :  { %3129 = vmatprep.mubr.f32.mxu1 %v5269_v1  ;;  %v3361_v1 = vpack.c.bf16 %v2959_v7, %v2958_v21  ;;  %3255 = vmatpush1.msk.msra.mxu1 %vm380_vm12, %v3253_v11 }
 0xa51   :  { %3350 = vmatpush3.bf16.msra.mxu0 %v3349_v20 }
 0xa52   :  { %3352 = vmatprep.subr.bf16.mxu0 %v3351_v63 }
 0xa55   :  { %3354 = vmatpush3.bf16.msra.mxu0 %v3353_v29 }
 0xa56   :  { %3356 = vmatprep.subr.bf16.mxu0 %v3355_v22 }
 0xa59   :  { %3358 = vmatpush3.bf16.msra.mxu0 %v3357_v26 }
 0xa5a   :  { %3360 = vmatprep.subr.bf16.mxu0 %v3359_v62 }
 0xa5d   :  { %3362 = vmatpush3.bf16.msra.mxu0 %v3361_v1 }
 0xb21   :  { %v2911_v48 = vpop.f32.mrb[68].mxu1 }
 0xb22   :  { %v2931_v43 = vsel %vm2929_vm11, -inf, %v2911_v48  ;;  %v2913_v12 = vpop.f32.mrb[69].mxu1 }
 0xb23   :  { %v2933_v30 = vsel %vm380_vm12, %v2931_v43, -inf  ;;  %v2932_v24 = vsel %vm2930_vm14, -inf, %v2913_v12  ;;  %v2915_v28 = vpop.f32.mrb[70].mxu1 }
 0xb24   :  { %v2934_v9 = vsel %vm380_vm12, %v2932_v24, -inf  ;;  %v2916_v58 = vpop.f32.mrb[71].mxu1 }
 0xb25   :  { %v2935_v25 = vmax.f32 %v2933_v30, %v2934_v9 }
 0xb27   :  { %2936 = vmax.xlane.f32.xlu0 %v2935_v25 }
 0xbb4   :  { %v2937_v40 = vpop.xlane.xlu0 %2936 }
 0xbb5   :  { %v2938_v16 = vsub.f32 %v2931_v43, %v2937_v40  ;;  %v2939_v41 = vsub.f32 %v2932_v24, %v2937_v40 }
 0xbb7   :  { %v2940_v56 = vmul.f32 1.442695, %v2938_v16  ;;  %v2942_v37 = vmul.f32 1.442695, %v2939_v41 }
 0xbb9   :  { %3477 = vpow2.f32 %v2940_v56 }
 0xbba   :  { %3479 = vpow2.f32 %v2942_v37 }
 0xbc3   :  { %v3478_v5 = vpop.eup %3477 }
 0xbc4   :  { %v3480_v42 = vpop.eup %3479 }
 0xbc5   :  { %3040 = vmatprep.mubr.f32.mxu0 %v3480_v42 }
 0xbc6   :  { %3041 = vmatmul.mubr.f32.vlgmr.msra.gmra.mrb[68].mxu0 %v3478_v5 }
 0xc99   :  { %v3301_v4 = vpop.f32.mrb[68].mxu0 }
 0xc9a   :  { %v3302_v61 = vpop.f32.mrb[69].mxu0 }
 0xc9b   :  { %v3303_v51 = vadd.f32 %v3302_v61, %v3301_v4 }
 0xc9d   :  { %3481 = vlog2.f32 %v3303_v51 }
 0xca7   :  { %v3482_v23 = vpop.eup %3481 }
 0xca8   :  { %v3047_v39 = vmul.f32 0.6931472, %v3482_v23 }
 0xcaa   :  { %3256 = vmatmul.mubr.msk.f32.vlgmr.msra.gmra.mrb[22].mxu1 %vm355_vm2, %v3047_v39 }
 0xd7d   :  { %v3131_v34 = vpop.f32.mrb[22].mxu1 }
 0xd7e   :  { %v3136_v49 = vsub.f32 %v2938_v16, %v3131_v34  ;;  %v3133_v2 = vpop.f32.mrb[23].mxu1 }
 0xd7f   :  { %v3137_v54 = vsub.f32 %v2939_v41, %v3133_v2 }
 0xd81   :  { %v3140_v10 = vcombine.low %v3136_v49, %v3137_v54 }
 0xd83   :  { %3257 = vst.sshfl [vmem:[%s5181_s19] sm:$0x33 pattern:$0x76325410] %v3140_v10 }

</bundles_post_ra>
